<compile_context>
chip_gen: v6e
topology: v6e:2x2x1
jax: 0.10.0
libtpu: 0.0.40
codegen_flags: <defaults>
</compile_context>

<pallas_src>
import jax
import jax.numpy as jnp
from jax.experimental import pallas as pl
from jax.experimental.pallas import tpu as pltpu

HIDDEN = 20
N_HIDDEN_LAYERS = 9
MAX_TILE_N = 2048  # cap on batch points (lanes) per grid step


def _mlp_kernel(x_ref, w_in_ref, b_in_ref, w_h_ref, b_h_ref,
                w_out_ref, b_out_ref, o_ref):
    # x_ref: (1, TILE_N) — batch points on lanes.
    x = x_ref[...]                                            # (1, TILE_N) f32

    # Input layer Linear(1, 20): VPU broadcast FMA in f32.
    #   (HIDDEN, 1) * (1, TILE_N) + (HIDDEN, 1)  ->  (HIDDEN, TILE_N)
    h = jnp.tanh(w_in_ref[...] * x + b_in_ref[...])

    # 9 hidden layers, static unroll: bf16 operands, f32 accumulation on the MXU.
    #   (20,20)bf16 @ (20,TILE_N)bf16 -> (20,TILE_N)f32, + bias, tanh (EUP).
    for i in range(N_HIDDEN_LAYERS):
        z = jnp.dot(w_h_ref[i], h.astype(jnp.bfloat16),
                    preferred_element_type=jnp.float32)
        h = jnp.tanh(z + b_h_ref[i])

    # Output layer Linear(20, 1), lane-dense: (1,20)bf16 @ (20,TILE_N)bf16.
    out = jnp.dot(w_out_ref[...], h.astype(jnp.bfloat16),
                  preferred_element_type=jnp.float32)
    o_ref[...] = (out + b_out_ref[0]).astype(o_ref.dtype)


def _cdiv(a, b):
    return (a + b - 1) // b


def _choose_tiling(n, max_tile=MAX_TILE_N):
    """Even number (>=2) of grid steps (balances v7x's 2 TensorCores), lane width a
    multiple of 128, per-step tile capped at ~max_tile."""
    pairs = max(1, _cdiv(n, 2 * max_tile))
    num_tiles = 2 * pairs
    tile_n = _cdiv(_cdiv(n, num_tiles), 128) * 128
    return tile_n, num_tiles


def function_approximator(x, params, max_tile=MAX_TILE_N):
    """x: (N, 1) float32.  Returns (N, 1) float32."""
    w_in, b_in, w_h, b_h, w_out, b_out = params   # PyTorch (out, in) convention
    n = x.shape[0]
    tile_n, num_tiles = _choose_tiling(n, max_tile)
    n_pad = num_tiles * tile_n

    # Lane-dense 1-row layout; pad N up to num_tiles * tile_n.
    x_row = jnp.pad(x.astype(jnp.float32).reshape(1, n), ((0, 0), (0, n_pad - n)))

    # Column-shaped biases for the transposed (features-on-sublanes) layout.
    b_in_c = b_in.reshape(HIDDEN, 1).astype(jnp.float32)
    b_h_c = b_h.reshape(N_HIDDEN_LAYERS, HIDDEN, 1).astype(jnp.float32)
    b_out_1d = b_out.reshape(1).astype(jnp.float32)            # 1-D SMEM scalar

    # Pre-cast matmul weights to bf16 once (MXU-native operands, f32 accumulation).
    w_in_f32 = w_in.astype(jnp.float32)                        # VPU input layer stays f32
    w_h_bf16 = w_h.astype(jnp.bfloat16)
    w_out_bf16 = w_out.astype(jnp.bfloat16)

    out_row = pl.pallas_call(
        _mlp_kernel,
        out_shape=jax.ShapeDtypeStruct((1, n_pad), jnp.float32),
        grid_spec=pltpu.PrefetchScalarGridSpec(
            num_scalar_prefetch=0,
            grid=(num_tiles,),
            in_specs=[
                pl.BlockSpec((1, tile_n), lambda i: (0, i)),                # x row
                pl.BlockSpec((HIDDEN, 1), lambda i: (0, 0)),                # W_in (20,1) f32
                pl.BlockSpec((HIDDEN, 1), lambda i: (0, 0)),                # b_in (20,1)
                pl.BlockSpec((N_HIDDEN_LAYERS, HIDDEN, HIDDEN),
                             lambda i: (0, 0, 0)),                          # W_h (9,20,20) bf16
                pl.BlockSpec((N_HIDDEN_LAYERS, HIDDEN, 1),
                             lambda i: (0, 0, 0)),                          # b_h (9,20,1)
                pl.BlockSpec((1, HIDDEN), lambda i: (0, 0)),                # W_out (1,20) bf16
                pl.BlockSpec(memory_space=pltpu.MemorySpace.SMEM),          # b_out (1,) scalar
            ],
            out_specs=pl.BlockSpec((1, tile_n), lambda i: (0, i)),
        ),
        compiler_params=pltpu.CompilerParams(
            dimension_semantics=("parallel",)),
    )(x_row, w_in_f32, b_in_c, w_h_bf16, b_h_c, w_out_bf16, b_out_1d)

    return out_row[0, :n].reshape(n, 1)


def init_params(key):
    """PyTorch nn.Linear default init: U[-1/sqrt(fan_in), +1/sqrt(fan_in)],
    weights stored in PyTorch (out_features, in_features) convention."""
    ks = jax.random.split(key, 6)

    def uniform(k, shape, fan_in):
        bound = 1.0 / jnp.sqrt(float(fan_in))
        return jax.random.uniform(k, shape, jnp.float32, -bound, bound)

    w_in = uniform(ks[0], (HIDDEN, 1), 1)                               # (20, 1)
    b_in = uniform(ks[1], (HIDDEN,), 1)                                 # (20,)
    w_h = uniform(ks[2], (N_HIDDEN_LAYERS, HIDDEN, HIDDEN), HIDDEN)     # (9, 20, 20)
    b_h = uniform(ks[3], (N_HIDDEN_LAYERS, HIDDEN), HIDDEN)             # (9, 20)
    w_out = uniform(ks[4], (1, HIDDEN), HIDDEN)                         # (1, 20)
    b_out = uniform(ks[5], (1,), HIDDEN)                                # (1,)
    return w_in, b_in, w_h, b_h, w_out, b_out


def generate_data(start, end, num_points_per_unit):
    num_points = int((end - start) * num_points_per_unit)
    return jnp.linspace(start, end, num_points, dtype=jnp.float32).reshape(-1, 1)


def reference_forward(x, params, matmul_dtype=jnp.float32):
    """Pure-JAX reference matching the PyTorch module (row layout, W in (out,in)).
    With matmul_dtype=bfloat16 it mirrors the kernel's bf16-operand matmuls."""
    w_in, b_in, w_h, b_h, w_out, b_out = params
    h = jnp.tanh(x @ w_in.T + b_in)
    for i in range(N_HIDDEN_LAYERS):
        z = jnp.dot(h.astype(matmul_dtype), w_h[i].T.astype(matmul_dtype),
                    preferred_element_type=jnp.float32)
        h = jnp.tanh(z + b_h[i])
    out = jnp.dot(h.astype(matmul_dtype), w_out.T.astype(matmul_dtype),
                  preferred_element_type=jnp.float32)
    return out + b_out


if __name__ == "__main__":
    key = jax.random.PRNGKey(0)
    params = init_params(key)

    # Analogue of generate_data(0, 25, 100): N = 2500 sample points (not a multiple
    # of 128 — exercises the pad-and-slice path; grid = 2 steps of 1280 lanes).
    x = generate_data(0.0, 25.0, 100)
    N = x.shape[0]

    out = function_approximator(x, params)
    out = jax.block_until_ready(out)
    assert out.shape == (N, 1)

    # Tight check against a reference that mirrors the kernel's bf16 matmul operands.
    ref_bf16 = reference_forward(x, params, matmul_dtype=jnp.bfloat16)
    err_bf16 = float(jnp.max(jnp.abs(out - ref_bf16)))
    assert err_bf16 < 2e-3, err_bf16

    # Loose check against the full-f32 PyTorch-equivalent reference (expected bf16
    # rounding, not a bug — see perf-review correctness note).
    ref_f32 = reference_forward(x, params, matmul_dtype=jnp.float32)
    err_f32 = float(jnp.max(jnp.abs(out - ref_f32)))
    assert err_f32 < 5e-2, err_f32

    print("KERNEL_OK")
</pallas_src>

<mosaic_0001>
module attributes {stable_mosaic.version = 11 : i64} {
  func.func @_mlp_kernel(%arg0: i32, %arg1: memref<1x1280xf32, #tpu.memory_space<vmem>>, %arg2: memref<20x1xf32, #tpu.memory_space<vmem>>, %arg3: memref<20x1xf32, #tpu.memory_space<vmem>>, %arg4: memref<9x20x20xbf16, #tpu.memory_space<vmem>>, %arg5: memref<9x20x1xf32, #tpu.memory_space<vmem>>, %arg6: memref<1x20xbf16, #tpu.memory_space<vmem>>, %arg7: memref<1xf32, #tpu.memory_space<smem>>, %arg8: memref<1x1280xf32, #tpu.memory_space<vmem>>) attributes {dimension_semantics = [#tpu.dimension_semantics<parallel>], iteration_bounds = array<i64: 2>, scalar_prefetch = 0 : i64, scratch_operands = 0 : i64, tpu.core_type = #tpu.core_type<tc>, window_params = [{transform_indices = @transform_0, window_bounds = array<i64: 1, 1280>}, {pipeline_mode = #tpu.pipeline_mode<synchronous>, transform_indices = @transform_1, window_bounds = array<i64: 20, 1>}, {pipeline_mode = #tpu.pipeline_mode<synchronous>, transform_indices = @transform_2, window_bounds = array<i64: 20, 1>}, {pipeline_mode = #tpu.pipeline_mode<synchronous>, transform_indices = @transform_3, window_bounds = array<i64: 9, 20, 20>}, {pipeline_mode = #tpu.pipeline_mode<synchronous>, transform_indices = @transform_4, window_bounds = array<i64: 9, 20, 1>}, {pipeline_mode = #tpu.pipeline_mode<synchronous>, transform_indices = @transform_5, window_bounds = array<i64: 1, 20>}, {transform_indices = @transform_6, window_bounds = array<i64: 1>}, {transform_indices = @transform_7, window_bounds = array<i64: 1, 1280>}]} {
    %c0 = arith.constant 0 : index
    %c0_0 = arith.constant 0 : index
    %0 = vector.load %arg1[%c0, %c0_0] : memref<1x1280xf32, #tpu.memory_space<vmem>>, vector<1x1280xf32>
    %c0_1 = arith.constant 0 : index
    %c0_2 = arith.constant 0 : index
    %1 = vector.load %arg2[%c0_1, %c0_2] : memref<20x1xf32, #tpu.memory_space<vmem>>, vector<20x1xf32>
    %2 = vector.broadcast %1 : vector<20x1xf32> to vector<20x1280xf32>
    %3 = vector.broadcast %0 : vector<1x1280xf32> to vector<20x1280xf32>
    %4 = arith.mulf %2, %3 : vector<20x1280xf32>
    %c0_3 = arith.constant 0 : index
    %c0_4 = arith.constant 0 : index
    %5 = vector.load %arg3[%c0_3, %c0_4] : memref<20x1xf32, #tpu.memory_space<vmem>>, vector<20x1xf32>
    %6 = vector.broadcast %5 : vector<20x1xf32> to vector<20x1280xf32>
    %7 = arith.addf %4, %6 : vector<20x1280xf32>
    %8 = math.tanh %7 : vector<20x1280xf32>
    %c0_5 = arith.constant 0 : index
    %c0_6 = arith.constant 0 : index
    %c0_7 = arith.constant 0 : index
    %9 = vector.load %arg4[%c0_5, %c0_6, %c0_7] : memref<9x20x20xbf16, #tpu.memory_space<vmem>>, vector<1x20x20xbf16>
    %10 = vector.shape_cast %9 : vector<1x20x20xbf16> to vector<20x20xbf16>
    %11 = arith.truncf %8 : vector<20x1280xf32> to vector<20x1280xbf16>
    %cst = arith.constant dense<0.000000e+00> : vector<20x1280xf32>
    %12 = tpu.matmul %10, %11, %cst {dimension_numbers = #tpu.dot_dimension_numbers<[1], [0], [0], [1], [0, 0, 1, 1], [], []>} : vector<20x20xbf16>, vector<20x1280xbf16>, vector<20x1280xf32> -> vector<20x1280xf32>
    %c0_8 = arith.constant 0 : index
    %c0_9 = arith.constant 0 : index
    %c0_10 = arith.constant 0 : index
    %13 = vector.load %arg5[%c0_8, %c0_9, %c0_10] : memref<9x20x1xf32, #tpu.memory_space<vmem>>, vector<1x20x1xf32>
    %14 = vector.shape_cast %13 : vector<1x20x1xf32> to vector<20x1xf32>
    %15 = vector.broadcast %14 : vector<20x1xf32> to vector<20x1280xf32>
    %16 = arith.addf %12, %15 : vector<20x1280xf32>
    %17 = math.tanh %16 : vector<20x1280xf32>
    %c1 = arith.constant 1 : index
    %c0_11 = arith.constant 0 : index
    %c0_12 = arith.constant 0 : index
    %18 = vector.load %arg4[%c1, %c0_11, %c0_12] : memref<9x20x20xbf16, #tpu.memory_space<vmem>>, vector<1x20x20xbf16>
    %19 = vector.shape_cast %18 : vector<1x20x20xbf16> to vector<20x20xbf16>
    %20 = arith.truncf %17 : vector<20x1280xf32> to vector<20x1280xbf16>
    %cst_13 = arith.constant dense<0.000000e+00> : vector<20x1280xf32>
    %21 = tpu.matmul %19, %20, %cst_13 {dimension_numbers = #tpu.dot_dimension_numbers<[1], [0], [0], [1], [0, 0, 1, 1], [], []>} : vector<20x20xbf16>, vector<20x1280xbf16>, vector<20x1280xf32> -> vector<20x1280xf32>
    %c1_14 = arith.constant 1 : index
    %c0_15 = arith.constant 0 : index
    %c0_16 = arith.constant 0 : index
    %22 = vector.load %arg5[%c1_14, %c0_15, %c0_16] : memref<9x20x1xf32, #tpu.memory_space<vmem>>, vector<1x20x1xf32>
    %23 = vector.shape_cast %22 : vector<1x20x1xf32> to vector<20x1xf32>
    %24 = vector.broadcast %23 : vector<20x1xf32> to vector<20x1280xf32>
    %25 = arith.addf %21, %24 : vector<20x1280xf32>
    %26 = math.tanh %25 : vector<20x1280xf32>
    %c2 = arith.constant 2 : index
    %c0_17 = arith.constant 0 : index
    %c0_18 = arith.constant 0 : index
    %27 = vector.load %arg4[%c2, %c0_17, %c0_18] : memref<9x20x20xbf16, #tpu.memory_space<vmem>>, vector<1x20x20xbf16>
    %28 = vector.shape_cast %27 : vector<1x20x20xbf16> to vector<20x20xbf16>
    %29 = arith.truncf %26 : vector<20x1280xf32> to vector<20x1280xbf16>
    %cst_19 = arith.constant dense<0.000000e+00> : vector<20x1280xf32>
    %30 = tpu.matmul %28, %29, %cst_19 {dimension_numbers = #tpu.dot_dimension_numbers<[1], [0], [0], [1], [0, 0, 1, 1], [], []>} : vector<20x20xbf16>, vector<20x1280xbf16>, vector<20x1280xf32> -> vector<20x1280xf32>
    %c2_20 = arith.constant 2 : index
    %c0_21 = arith.constant 0 : index
    %c0_22 = arith.constant 0 : index
    %31 = vector.load %arg5[%c2_20, %c0_21, %c0_22] : memref<9x20x1xf32, #tpu.memory_space<vmem>>, vector<1x20x1xf32>
    %32 = vector.shape_cast %31 : vector<1x20x1xf32> to vector<20x1xf32>
    %33 = vector.broadcast %32 : vector<20x1xf32> to vector<20x1280xf32>
    %34 = arith.addf %30, %33 : vector<20x1280xf32>
    %35 = math.tanh %34 : vector<20x1280xf32>
    %c3 = arith.constant 3 : index
    %c0_23 = arith.constant 0 : index
    %c0_24 = arith.constant 0 : index
    %36 = vector.load %arg4[%c3, %c0_23, %c0_24] : memref<9x20x20xbf16, #tpu.memory_space<vmem>>, vector<1x20x20xbf16>
    %37 = vector.shape_cast %36 : vector<1x20x20xbf16> to vector<20x20xbf16>
    %38 = arith.truncf %35 : vector<20x1280xf32> to vector<20x1280xbf16>
    %cst_25 = arith.constant dense<0.000000e+00> : vector<20x1280xf32>
    %39 = tpu.matmul %37, %38, %cst_25 {dimension_numbers = #tpu.dot_dimension_numbers<[1], [0], [0], [1], [0, 0, 1, 1], [], []>} : vector<20x20xbf16>, vector<20x1280xbf16>, vector<20x1280xf32> -> vector<20x1280xf32>
    %c3_26 = arith.constant 3 : index
    %c0_27 = arith.constant 0 : index
    %c0_28 = arith.constant 0 : index
    %40 = vector.load %arg5[%c3_26, %c0_27, %c0_28] : memref<9x20x1xf32, #tpu.memory_space<vmem>>, vector<1x20x1xf32>
    %41 = vector.shape_cast %40 : vector<1x20x1xf32> to vector<20x1xf32>
    %42 = vector.broadcast %41 : vector<20x1xf32> to vector<20x1280xf32>
    %43 = arith.addf %39, %42 : vector<20x1280xf32>
    %44 = math.tanh %43 : vector<20x1280xf32>
    %c4 = arith.constant 4 : index
    %c0_29 = arith.constant 0 : index
    %c0_30 = arith.constant 0 : index
    %45 = vector.load %arg4[%c4, %c0_29, %c0_30] : memref<9x20x20xbf16, #tpu.memory_space<vmem>>, vector<1x20x20xbf16>
    %46 = vector.shape_cast %45 : vector<1x20x20xbf16> to vector<20x20xbf16>
    %47 = arith.truncf %44 : vector<20x1280xf32> to vector<20x1280xbf16>
    %cst_31 = arith.constant dense<0.000000e+00> : vector<20x1280xf32>
    %48 = tpu.matmul %46, %47, %cst_31 {dimension_numbers = #tpu.dot_dimension_numbers<[1], [0], [0], [1], [0, 0, 1, 1], [], []>} : vector<20x20xbf16>, vector<20x1280xbf16>, vector<20x1280xf32> -> vector<20x1280xf32>
    %c4_32 = arith.constant 4 : index
    %c0_33 = arith.constant 0 : index
    %c0_34 = arith.constant 0 : index
    %49 = vector.load %arg5[%c4_32, %c0_33, %c0_34] : memref<9x20x1xf32, #tpu.memory_space<vmem>>, vector<1x20x1xf32>
    %50 = vector.shape_cast %49 : vector<1x20x1xf32> to vector<20x1xf32>
    %51 = vector.broadcast %50 : vector<20x1xf32> to vector<20x1280xf32>
    %52 = arith.addf %48, %51 : vector<20x1280xf32>
    %53 = math.tanh %52 : vector<20x1280xf32>
    %c5 = arith.constant 5 : index
    %c0_35 = arith.constant 0 : index
    %c0_36 = arith.constant 0 : index
    %54 = vector.load %arg4[%c5, %c0_35, %c0_36] : memref<9x20x20xbf16, #tpu.memory_space<vmem>>, vector<1x20x20xbf16>
    %55 = vector.shape_cast %54 : vector<1x20x20xbf16> to vector<20x20xbf16>
    %56 = arith.truncf %53 : vector<20x1280xf32> to vector<20x1280xbf16>
    %cst_37 = arith.constant dense<0.000000e+00> : vector<20x1280xf32>
    %57 = tpu.matmul %55, %56, %cst_37 {dimension_numbers = #tpu.dot_dimension_numbers<[1], [0], [0], [1], [0, 0, 1, 1], [], []>} : vector<20x20xbf16>, vector<20x1280xbf16>, vector<20x1280xf32> -> vector<20x1280xf32>
    %c5_38 = arith.constant 5 : index
    %c0_39 = arith.constant 0 : index
    %c0_40 = arith.constant 0 : index
    %58 = vector.load %arg5[%c5_38, %c0_39, %c0_40] : memref<9x20x1xf32, #tpu.memory_space<vmem>>, vector<1x20x1xf32>
    %59 = vector.shape_cast %58 : vector<1x20x1xf32> to vector<20x1xf32>
    %60 = vector.broadcast %59 : vector<20x1xf32> to vector<20x1280xf32>
    %61 = arith.addf %57, %60 : vector<20x1280xf32>
    %62 = math.tanh %61 : vector<20x1280xf32>
    %c6 = arith.constant 6 : index
    %c0_41 = arith.constant 0 : index
    %c0_42 = arith.constant 0 : index
    %63 = vector.load %arg4[%c6, %c0_41, %c0_42] : memref<9x20x20xbf16, #tpu.memory_space<vmem>>, vector<1x20x20xbf16>
    %64 = vector.shape_cast %63 : vector<1x20x20xbf16> to vector<20x20xbf16>
    %65 = arith.truncf %62 : vector<20x1280xf32> to vector<20x1280xbf16>
    %cst_43 = arith.constant dense<0.000000e+00> : vector<20x1280xf32>
    %66 = tpu.matmul %64, %65, %cst_43 {dimension_numbers = #tpu.dot_dimension_numbers<[1], [0], [0], [1], [0, 0, 1, 1], [], []>} : vector<20x20xbf16>, vector<20x1280xbf16>, vector<20x1280xf32> -> vector<20x1280xf32>
    %c6_44 = arith.constant 6 : index
    %c0_45 = arith.constant 0 : index
    %c0_46 = arith.constant 0 : index
    %67 = vector.load %arg5[%c6_44, %c0_45, %c0_46] : memref<9x20x1xf32, #tpu.memory_space<vmem>>, vector<1x20x1xf32>
    %68 = vector.shape_cast %67 : vector<1x20x1xf32> to vector<20x1xf32>
    %69 = vector.broadcast %68 : vector<20x1xf32> to vector<20x1280xf32>
    %70 = arith.addf %66, %69 : vector<20x1280xf32>
    %71 = math.tanh %70 : vector<20x1280xf32>
    %c7 = arith.constant 7 : index
    %c0_47 = arith.constant 0 : index
    %c0_48 = arith.constant 0 : index
    %72 = vector.load %arg4[%c7, %c0_47, %c0_48] : memref<9x20x20xbf16, #tpu.memory_space<vmem>>, vector<1x20x20xbf16>
    %73 = vector.shape_cast %72 : vector<1x20x20xbf16> to vector<20x20xbf16>
    %74 = arith.truncf %71 : vector<20x1280xf32> to vector<20x1280xbf16>
    %cst_49 = arith.constant dense<0.000000e+00> : vector<20x1280xf32>
    %75 = tpu.matmul %73, %74, %cst_49 {dimension_numbers = #tpu.dot_dimension_numbers<[1], [0], [0], [1], [0, 0, 1, 1], [], []>} : vector<20x20xbf16>, vector<20x1280xbf16>, vector<20x1280xf32> -> vector<20x1280xf32>
    %c7_50 = arith.constant 7 : index
    %c0_51 = arith.constant 0 : index
    %c0_52 = arith.constant 0 : index
    %76 = vector.load %arg5[%c7_50, %c0_51, %c0_52] : memref<9x20x1xf32, #tpu.memory_space<vmem>>, vector<1x20x1xf32>
    %77 = vector.shape_cast %76 : vector<1x20x1xf32> to vector<20x1xf32>
    %78 = vector.broadcast %77 : vector<20x1xf32> to vector<20x1280xf32>
    %79 = arith.addf %75, %78 : vector<20x1280xf32>
    %80 = math.tanh %79 : vector<20x1280xf32>
    %c8 = arith.constant 8 : index
    %c0_53 = arith.constant 0 : index
    %c0_54 = arith.constant 0 : index
    %81 = vector.load %arg4[%c8, %c0_53, %c0_54] : memref<9x20x20xbf16, #tpu.memory_space<vmem>>, vector<1x20x20xbf16>
    %82 = vector.shape_cast %81 : vector<1x20x20xbf16> to vector<20x20xbf16>
    %83 = arith.truncf %80 : vector<20x1280xf32> to vector<20x1280xbf16>
    %cst_55 = arith.constant dense<0.000000e+00> : vector<20x1280xf32>
    %84 = tpu.matmul %82, %83, %cst_55 {dimension_numbers = #tpu.dot_dimension_numbers<[1], [0], [0], [1], [0, 0, 1, 1], [], []>} : vector<20x20xbf16>, vector<20x1280xbf16>, vector<20x1280xf32> -> vector<20x1280xf32>
    %c8_56 = arith.constant 8 : index
    %c0_57 = arith.constant 0 : index
    %c0_58 = arith.constant 0 : index
    %85 = vector.load %arg5[%c8_56, %c0_57, %c0_58] : memref<9x20x1xf32, #tpu.memory_space<vmem>>, vector<1x20x1xf32>
    %86 = vector.shape_cast %85 : vector<1x20x1xf32> to vector<20x1xf32>
    %87 = vector.broadcast %86 : vector<20x1xf32> to vector<20x1280xf32>
    %88 = arith.addf %84, %87 : vector<20x1280xf32>
    %89 = math.tanh %88 : vector<20x1280xf32>
    %c0_59 = arith.constant 0 : index
    %c0_60 = arith.constant 0 : index
    %90 = vector.load %arg6[%c0_59, %c0_60] : memref<1x20xbf16, #tpu.memory_space<vmem>>, vector<1x20xbf16>
    %91 = arith.truncf %89 : vector<20x1280xf32> to vector<20x1280xbf16>
    %cst_61 = arith.constant dense<0.000000e+00> : vector<1x1280xf32>
    %92 = tpu.matmul %90, %91, %cst_61 {dimension_numbers = #tpu.dot_dimension_numbers<[1], [0], [0], [1], [0, 0, 1, 1], [], []>} : vector<1x20xbf16>, vector<20x1280xbf16>, vector<1x1280xf32> -> vector<1x1280xf32>
    %c0_62 = arith.constant 0 : index
    %93 = memref.load %arg7[%c0_62] : memref<1xf32, #tpu.memory_space<smem>>
    %94 = vector.broadcast %93 : f32 to vector<1x1280xf32>
    %95 = arith.addf %92, %94 : vector<1x1280xf32>
    %c0_63 = arith.constant 0 : index
    %c0_64 = arith.constant 0 : index
    %96 = vector.load %arg8[%c0_63, %c0_64] : memref<1x1280xf32, #tpu.memory_space<vmem>>, vector<1x1280xf32>
    tpu.vector_store %arg8[%c0_63, %c0_64], %95 {strides = array<i32>} : memref<1x1280xf32, #tpu.memory_space<vmem>>, vector<1x1280xf32>,
    return
  }
  func.func @transform_0(%arg0: i32) -> (i32, i32) {
    %c0_i32 = arith.constant 0 : i32
    %c0_i32_0 = arith.constant 0 : i32
    return %c0_i32, %arg0 : i32, i32
  }
  func.func @transform_1(%arg0: i32) -> (i32, i32) {
    %c0_i32 = arith.constant 0 : i32
    %c0_i32_0 = arith.constant 0 : i32
    %c0_i32_1 = arith.constant 0 : i32
    return %c0_i32, %c0_i32_0 : i32, i32
  }
  func.func @transform_2(%arg0: i32) -> (i32, i32) {
    %c0_i32 = arith.constant 0 : i32
    %c0_i32_0 = arith.constant 0 : i32
    %c0_i32_1 = arith.constant 0 : i32
    return %c0_i32, %c0_i32_0 : i32, i32
  }
  func.func @transform_3(%arg0: i32) -> (i32, i32, i32) {
    %c0_i32 = arith.constant 0 : i32
    %c0_i32_0 = arith.constant 0 : i32
    %c0_i32_1 = arith.constant 0 : i32
    %c0_i32_2 = arith.constant 0 : i32
    return %c0_i32, %c0_i32_0, %c0_i32_1 : i32, i32, i32
  }
  func.func @transform_4(%arg0: i32) -> (i32, i32, i32) {
    %c0_i32 = arith.constant 0 : i32
    %c0_i32_0 = arith.constant 0 : i32
    %c0_i32_1 = arith.constant 0 : i32
    %c0_i32_2 = arith.constant 0 : i32
    return %c0_i32, %c0_i32_0, %c0_i32_1 : i32, i32, i32
  }
  func.func @transform_5(%arg0: i32) -> (i32, i32) {
    %c0_i32 = arith.constant 0 : i32
    %c0_i32_0 = arith.constant 0 : i32
    %c0_i32_1 = arith.constant 0 : i32
    return %c0_i32, %c0_i32_0 : i32, i32
  }
  func.func @transform_6(%arg0: i32) -> i32 {
    %c0_i32 = arith.constant 0 : i32
    %c0_i32_0 = arith.constant 0 : i32
    return %c0_i32 : i32
  }
  func.func @transform_7(%arg0: i32) -> (i32, i32) {
    %c0_i32 = arith.constant 0 : i32
    %c0_i32_0 = arith.constant 0 : i32
    return %c0_i32, %arg0 : i32, i32
  }
}

</mosaic_0001>

<bundles_post_ra>
// kernel: tpu_custom_call.1
= control target key start
LH: loop header
LB: loop body
LE: loop exit
PB: predicated region body
PF: predicated region fallthrough
CT: control target
= control target key end

     0   :  { %s6296_s0 = inlined_call_operand.vmem [shape: f32[1,2560], index: 0, kind: input, shape index: {}]   ;;  %s6297_s1 = inlined_call_operand.vmem [shape: f32[20,1], index: 1, kind: input, shape index: {}]   ;;  %s6298_s2 = inlined_call_operand.vmem [shape: f32[20,1], index: 2, kind: input, shape index: {}]   ;;  %s6299_s3 = inlined_call_operand.vmem [shape: bf16[9,20,20], index: 3, kind: input, shape index: {}]   ;;  %s6300_s4 = inlined_call_operand.vmem [shape: f32[9,20,1], index: 4, kind: input, shape index: {}]   ;;  %s6301_s5 = inlined_call_operand.vmem [shape: bf16[1,20], index: 5, kind: input, shape index: {}]   ;;  %s6302_s6 = inlined_call_operand.<no memory space> [shape: f32[1], index: 6, kind: input, shape index: {}]   ;;  %s6303_s7 = inlined_call_operand.hbm [shape: f32[1,2560], index: 7, kind: output, shape index: {}]  }
   0x1   :  { %12 = sst [smem:[#allocation2]] %s6302_s6 }
   0x2   :  { %13 = vsyncpa [#allocation4], 0 }
   0x3   :  { %15 = vsyncpa [#allocation4 + $0x1], 0  ;;  %s5210_s26 = smov 0   ;;  %s5212_s27 = smov 0  }
   0x4   :  { %s5214_s28 = smov 0   ;;  %s5216_s29 = smov 0  }
   0x5 LB: > { %s5231_s6 = sadd.s32 4294967295, %s5162_s29   ;;  %s4221_s30 = sadd.s32 4294967294, %s5162_s29   ;;  %s5162_s29 = sphi %s5216_s29, %s6309_s29   ;;  %s5158_s28 = sphi %s5214_s28, %s6308_s28   ;;  %s5154_s27 = sphi %s5212_s27, %s6307_s27   ;;  %s5150_s26 = sphi %s5210_s26, %s6306_s26  }
   0x6   : > { %s5235_s8 = sadd.s32 1, %s5162_s29   ;;  %s180_s9 = sadd.s32 1, %s5158_s28 }
   0x7   : > { %s177_s10 = ssub.s32 %s5162_s29, %s5235_s8  ;;  %p190_p0 = scmp.ne.s32.totalorder %s5158_s28, %s5154_s27 }
   0x8   : > { %p178_p1 = scmp.eq.s32.totalorder %s177_s10, 0  ;;  %p191_p2 = scmp.eq.s32.totalorder %s5231_s6, 1 }
   0x9   : > { %p196_p3 = scmp.ne.s32.totalorder %s5154_s27, %s5150_s26  ;;  %p197_p4 = scmp.eq.s32.totalorder %s4221_s30, 1 }
   0xa   : > { %s5246_s11 = scalar_select %p178_p1, %s5158_s28, %s180_s9  }
   0xb   : > { %p5248_p5 = por %p191_p2, %p190_p0  ;;  %p5252_p6 = por %p197_p4, %p196_p3 }
   0xc   : > { %p4224_p7 = scmp.ge.s32.totalorder %s5162_s29, 1  ;;  %p241_p8 = scmp.lt.s32.totalorder %s5162_s29, 3 }
   0xe   : > { %p242_p9 = pnand %p4224_p7, %p241_p8 }
   0xf   : > { %s272_s20 = smul.u32 (!%p242_p9), 10, %s5231_s6  ;;  %s3828_s17 = sld [smem:[#allocation2]] (!%p242_p9) }
  0x10   : > { %245 = sbr.rel (%p242_p9) target bundleno = 2493 (0x9bd), region = 48  ;;  %s269_s18 = sand.u32 (!%p242_p9), 1, %s5154_s27  }
  0x11   : > { %p273_p10 = scmp.lt.s32.totalorder (!%p242_p9), %s272_s20, 19  ;;  %s4440_s19 = smul.u32 (!%p242_p9), 10, %s269_s18 }
  0x12   : > { %s4439_s21 = smul.u32 (!%p242_p9), 160, %s5231_s6  ;;  %s4151_s30 = scalar_lea.sflag (!%p242_p9), [#allocation4], %s269_s18 }
  0x13   : > { %s5166_s10 = smov (!%p242_p9), [#allocation3]  }
  0x14   : > { %s4163_s25 = scalar_lea.hbm (!%p242_p9), %s6303_s7, %s4439_s21  ;;  %s5106_s6 = sshll.u32 (!%p242_p9), %s5166_s10, 4  ;;  %s5107_s6 = int_to_ptr.vmem [resolvable:$false] %s5106_s6 }
  0x15   : > { %v283_v0 = vld [vmem:[%s6297_s1 + $0x10] sm:$0xf]  ;;  %v281_v1 = vld [vmem:[%s6297_s1] sm:$0xff]  ;;  %v5164_v2 = vmov 0   ;;  %v282_v4 = vld [vmem:[%s6297_s1 + $0x8] sm:$0xff]  ;;  %v301_v34 = vlaneseq  ;;  %s6311_s20 = smov (!%p273_p10, %s272_s20), 19 }
  0x16   : > { %4483 = vset.pattern.permute.xlu1 %v5164_v2  ;;  %4482 = vset.pattern.permute.xlu0 %v5164_v2  ;;  %v383_v3 = vld [vmem:[%s6298_s2 + $0x10] sm:$0xf]  ;;  %v381_v5 = vld [vmem:[%s6298_s2] sm:$0xff]  ;;  %v382_v6 = vld [vmem:[%s6298_s2 + $0x8] sm:$0xff]  ;;  %s5368_s23 = scalar_lea.vmem %s6296_s0, %s6311_s20  ;;  %vm515_vm0 = vcmask 1041408   ;;  %vm508_vm1 = vcmask 162816  }
  0x17   : > { %296 = vperm.xlu0 %4482, %v283_v0   ;;  %286 = vperm.xlu1 %4483, %v281_v1   ;;  %v484_v7 = vld [vmem:[%s6300_s4 + $0x10] sm:$0xf]  ;;  %v482_v8 = vld [vmem:[%s6300_s4] sm:$0xff]  ;;  %v483_v9 = vld [vmem:[%s6300_s4 + $0x8] sm:$0xff]  ;;  %v5363_v35 = vshrl.u32 %v301_v34, 7  ;;  %s271_s20 = scalar_lea.vmem [#allocation3], %s4440_s19 }
  0x18   : > { %578 = vmatprep.mubr.bf16.mxu0 %v5164_v2  ;;  %629 = vmatprep.mubr.bf16.mxu1 %v5164_v2  ;;  %v4247_v10 = vld [vmem:[%s6300_s4 + $0x28] sm:$0xf]  ;;  %v4245_v11 = vld [vmem:[%s6300_s4 + $0x18] sm:$0xff]  ;;  %v4246_v12 = vld [vmem:[%s6300_s4 + $0x20] sm:$0xff]  ;;  %s4165_s22 = sshll.u32 %s271_s20, 4  ;;  %vm4147_vm2 = vcmp.lt.s32.totalorder %v301_v34, 256  ;;  %s4166_s22 = int_to_ptr.vmem [resolvable:$true] %s4165_s22 }
  0x19   : > { %v4270_v13 = vld [vmem:[%s6300_s4 + $0x40] sm:$0xf]  ;;  %v4268_v14 = vld [vmem:[%s6300_s4 + $0x30] sm:$0xff]  ;;  %v4269_v15 = vld [vmem:[%s6300_s4 + $0x38] sm:$0xff]  ;;  %v307_v36 = vsub.s32 1, %v5363_v35  ;;  %v315_v37 = vsub.s32 3, %v5363_v35  ;;  %p5109_p0 = scmp.lt.s32.totalorder %s4166_s22, %s5107_s6 }
  0x1a   : > { %v4293_v16 = vld [vmem:[%s6300_s4 + $0x58] sm:$0xf]  ;;  %v4291_v17 = vld [vmem:[%s6300_s4 + $0x48] sm:$0xff]  ;;  %v4292_v18 = vld [vmem:[%s6300_s4 + $0x50] sm:$0xff]  ;;  %v303_v39 = vsub.s32 0, %v5363_v35  ;;  %v311_v40 = vsub.s32 2, %v5363_v35 }
  0x1b   : > { %396 = vperm.xlu0 %4482, %v383_v3   ;;  %291 = vperm.xlu1 %4483, %v282_v4   ;;  %v4316_v19 = vld [vmem:[%s6300_s4 + $0x70] sm:$0xf]  ;;  %v4314_v20 = vld [vmem:[%s6300_s4 + $0x60] sm:$0xff]  ;;  %v4315_v21 = vld [vmem:[%s6300_s4 + $0x68] sm:$0xff]  ;;  %v323_v53 = vsub.s32 5, %v5363_v35  ;;  %v331_v56 = vsub.s32 7, %v5363_v35 }
  0x1c   : > { %v4339_v22 = vld [vmem:[%s6300_s4 + $0x88] sm:$0xf]  ;;  %v4337_v23 = vld [vmem:[%s6300_s4 + $0x78] sm:$0xff]  ;;  %v4338_v24 = vld [vmem:[%s6300_s4 + $0x80] sm:$0xff]  ;;  %v319_v59 = vsub.s32 4, %v5363_v35  ;;  %v327_v60 = vsub.s32 6, %v5363_v35 }
  0x1d   : > { %v4362_v25 = vld [vmem:[%s6300_s4 + $0xa0] sm:$0xf]  ;;  %v4360_v26 = vld [vmem:[%s6300_s4 + $0x90] sm:$0xff]  ;;  %v4361_v27 = vld [vmem:[%s6300_s4 + $0x98] sm:$0xff]  ;;  %s5102_s9 = scalar_lea.vmem %s4166_s22, 160  ;;  %s5108_s14 = scalar_lea.vmem %s5107_s6, 320 }
  0x1e   : > { %v4385_v28 = vld [vmem:[%s6300_s4 + $0xb8] sm:$0xf]  ;;  %v4383_v29 = vld [vmem:[%s6300_s4 + $0xa8] sm:$0xff]  ;;  %v4384_v30 = vld [vmem:[%s6300_s4 + $0xb0] sm:$0xff]  ;;  %p5103_p11 = scmp.ne.s32.totalorder %s4166_s22, %s5102_s9  ;;  %p5110_p1 = scmp.lt.s32.totalorder %s5108_s14, %s5102_s9 }
  0x1f   : > { %386 = vperm.xlu0 %4482, %v381_v5   ;;  %391 = vperm.xlu1 %4483, %v382_v6   ;;  %v4408_v31 = vld [vmem:[%s6300_s4 + $0xd0] sm:$0xf]  ;;  %v4406_v32 = vld [vmem:[%s6300_s4 + $0xc0] sm:$0xff]  ;;  %v4407_v33 = vld [vmem:[%s6300_s4 + $0xc8] sm:$0xff] }
  0x20   : > { %v279_v38 = vld [vmem:[%s5368_s23] sm:$0xff]  ;;  %p5104_p12 = pnand %p5103_p11, %p5248_p5  ;;  %p5111_p2 = por %p5110_p1, %p5109_p0 }
  0x21   : > { %v308_v41 = vrot.slane %v279_v38, %v307_v36  ;;  %v316_v42 = vrot.slane %v279_v38, %v315_v37  ;;  %v304_v45 = vrot.slane %v279_v38, %v303_v39  ;;  %v312_v46 = vrot.slane %v279_v38, %v311_v40 }
  0x22   : > { %v324_v5 = vrot.slane %v279_v38, %v323_v53  ;;  %p5105_p13 = pneg %p5104_p12 }
  0x23   : > { %497 = vperm.xlu0 %4482, %v484_v7   ;;  %487 = vperm.xlu1 %4483, %v482_v8  }
  0x24   : > { %p5112_p3 = pnand %p5111_p2, %p5105_p13 }
  0x27   : > { %492 = vperm.xlu0 %4482, %v483_v9   ;;  %871 = vperm.xlu1 %4483, %v4247_v10  }
  0x2b   : > { %861 = vperm.xlu0 %4482, %v4245_v11   ;;  %866 = vperm.xlu1 %4483, %v4246_v12   ;;  %v332_v11 = vrot.slane %v279_v38, %v331_v56 }
  0x2f   : > { %1243 = vperm.xlu0 %4482, %v4270_v13   ;;  %1233 = vperm.xlu1 %4483, %v4268_v14   ;;  %v320_v14 = vrot.slane %v279_v38, %v319_v59 }
  0x33   : > { %1238 = vperm.xlu0 %4482, %v4269_v15   ;;  %1615 = vperm.xlu1 %4483, %v4293_v16  }
  0x37   : > { %1605 = vperm.xlu0 %4482, %v4291_v17   ;;  %1610 = vperm.xlu1 %4483, %v4292_v18   ;;  %v328_v17 = vrot.slane %v279_v38, %v327_v60 }
  0x3b   : > { %1987 = vperm.xlu0 %4482, %v4316_v19   ;;  %1977 = vperm.xlu1 %4483, %v4314_v20   ;;  %v280_v20 = vld [vmem:[%s5368_s23 + $0x8] sm:$0x3] }
  0x3c   : > { %v5436_v37 = vrot.slane %v280_v20, %v303_v39 }
  0x3f   : > { %1982 = vperm.xlu0 %4482, %v4315_v21   ;;  %2359 = vperm.xlu1 %4483, %v4339_v22  }
  0x43   : > { %2349 = vperm.xlu0 %4482, %v4337_v23   ;;  %2354 = vperm.xlu1 %4483, %v4338_v24  }
  0x47   : > { %2731 = vperm.xlu0 %4482, %v4362_v25   ;;  %2721 = vperm.xlu1 %4483, %v4360_v26  }
  0x4b   : > { %2726 = vperm.xlu0 %4482, %v4361_v27   ;;  %3103 = vperm.xlu1 %4483, %v4385_v28   ;;  %v340_v27 = vrot.slane %v280_v20, %v307_v36 }
  0x4f   : > { %3093 = vperm.xlu0 %4482, %v4383_v29   ;;  %3098 = vperm.xlu1 %4483, %v4384_v30  }
  0x53   : > { %3475 = vperm.xlu0 %4482, %v4408_v31   ;;  %3465 = vperm.xlu1 %4483, %v4406_v32  }
  0x57   : > { %3470 = vperm.xlu0 %4482, %v4407_v33  }
  0x92   : > { %v5377_v43 = vpop.permute.xlu0 %296  ;;  %v5379_v44 = vpop.permute.xlu1 %286 }
  0x93   : > { %v372_v47 = vmul.f32 %v308_v41, %v5377_v43  ;;  %v374_v48 = vmul.f32 %v316_v42, %v5377_v43  ;;  %v371_v51 = vmul.f32 %v304_v45, %v5377_v43  ;;  %v373_v52 = vmul.f32 %v312_v46, %v5377_v43 }
  0x94   : > { %v352_v61 = vmul.f32 %v308_v41, %v5379_v44  ;;  %v354_v63 = vmul.f32 %v316_v42, %v5379_v44  ;;  %v351_v4 = vmul.f32 %v304_v45, %v5379_v44  ;;  %v353_v12 = vmul.f32 %v312_v46, %v5379_v44 }
  0x95   : > { %v376_v19 = vmul.f32 %v324_v5, %v5377_v43  ;;  %v378_v22 = vmul.f32 %v332_v11, %v5377_v43  ;;  %v375_v24 = vmul.f32 %v320_v14, %v5377_v43  ;;  %v377_v26 = vmul.f32 %v328_v17, %v5377_v43 }
  0x96   : > { %v5385_v49 = vpop.permute.xlu0 %396  ;;  %v5387_v50 = vpop.permute.xlu1 %291  ;;  %v356_v29 = vmul.f32 %v324_v5, %v5379_v44  ;;  %v358_v33 = vmul.f32 %v332_v11, %v5379_v44  ;;  %v355_v38 = vmul.f32 %v320_v14, %v5379_v44 }
  0x97   : > { %v420_v54 = vadd.f32 %v5385_v49, %v372_v47  ;;  %v422_v55 = vadd.f32 %v5385_v49, %v374_v48  ;;  %v419_v57 = vadd.f32 %v5385_v49, %v371_v51  ;;  %v421_v58 = vadd.f32 %v5385_v49, %v373_v52 }
  0x98   : > { %v362_v62 = vmul.f32 %v308_v41, %v5387_v50  ;;  %v364_v3 = vmul.f32 %v316_v42, %v5387_v50  ;;  %v361_v9 = vmul.f32 %v304_v45, %v5387_v50  ;;  %v363_v15 = vmul.f32 %v312_v46, %v5387_v50 }
  0x99   : > { %4502 = vtanh.f32 %v420_v54  ;;  %v424_v23 = vadd.f32 %v5385_v49, %v376_v19  ;;  %v426_v25 = vadd.f32 %v5385_v49, %v378_v22  ;;  %v423_v28 = vadd.f32 %v5385_v49, %v375_v24  ;;  %v5465_v19 = vld [vmem:[%s6299_s3] sm:$0xff]  }
  0x9a   : > { %v5402_v0 = vpop.permute.xlu0 %386  ;;  %v5404_v1 = vpop.permute.xlu1 %391  ;;  %4504 = vtanh.f32 %v422_v55  ;;  %v425_v30 = vadd.f32 %v5385_v49, %v377_v26  ;;  %v366_v31 = vmul.f32 %v324_v5, %v5387_v50  ;;  %v368_v41 = vmul.f32 %v332_v11, %v5387_v50 }
  0x9b   : > { %4506 = vtanh.f32 %v419_v57  ;;  %v400_v6 = vadd.f32 %v5402_v0, %v352_v61  ;;  %v410_v7 = vadd.f32 %v5404_v1, %v362_v62  ;;  %v402_v8 = vadd.f32 %v5402_v0, %v354_v63 }
  0x9c   : > { %4508 = vtanh.f32 %v421_v58  ;;  %v412_v10 = vadd.f32 %v5404_v1, %v364_v3  ;;  %v399_v13 = vadd.f32 %v5402_v0, %v351_v4  ;;  %v409_v16 = vadd.f32 %v5404_v1, %v361_v9 }
  0x9d   : > { %4510 = vtanh.f32 %v400_v6  ;;  %v401_v18 = vadd.f32 %v5402_v0, %v353_v12  ;;  %v411_v21 = vadd.f32 %v5404_v1, %v363_v15  ;;  %v404_v32 = vadd.f32 %v5402_v0, %v356_v29 }
  0x9e   : > { %4512 = vtanh.f32 %v410_v7  ;;  %v414_v40 = vadd.f32 %v5404_v1, %v366_v31  ;;  %v357_v46 = vmul.f32 %v328_v17, %v5379_v44  ;;  %v406_v47 = vadd.f32 %v5402_v0, %v358_v33 }
  0x9f   : > { %4514 = vtanh.f32 %v402_v8  ;;  %v365_v39 = vmul.f32 %v320_v14, %v5387_v50  ;;  %v416_v52 = vadd.f32 %v5404_v1, %v368_v41  ;;  %v367_v55 = vmul.f32 %v328_v17, %v5387_v50 }
  0xa0   : > { %4516 = vtanh.f32 %v412_v10  ;;  %v403_v56 = vadd.f32 %v5402_v0, %v355_v38  ;;  %v405_v60 = vadd.f32 %v5402_v0, %v357_v46  ;;  %v380_v3 = vmul.f32 %v340_v27, %v5377_v43  ;;  %v4485_v38 = vld [vmem:[%s6299_s3 + $0x8] ss:$0 sps:$4 sm:$0x33]  }
  0xa1   : > { %4518 = vtanh.f32 %v399_v13  ;;  %v413_v59 = vadd.f32 %v5404_v1, %v365_v39  ;;  %v415_v63 = vadd.f32 %v5404_v1, %v367_v55  ;;  %v379_v7 = vmul.f32 %v5436_v37, %v5377_v43 }
  0xa2   : > { %4520 = vtanh.f32 %v409_v16  ;;  %v428_v9 = vadd.f32 %v5385_v49, %v380_v3  ;;  %v360_v13 = vmul.f32 %v340_v27, %v5379_v44  ;;  %v370_v15 = vmul.f32 %v340_v27, %v5387_v50 }
  0xa3   : > { %4522 = vtanh.f32 %v401_v18  ;;  %v427_v12 = vadd.f32 %v5385_v49, %v379_v7  ;;  %v359_v49 = vmul.f32 %v5436_v37, %v5379_v44 }
  0xa4   : > { %4524 = vtanh.f32 %v411_v21  ;;  %v408_v17 = vadd.f32 %v5402_v0, %v360_v13  ;;  %v418_v20 = vadd.f32 %v5404_v1, %v370_v15 }
  0xa5   : > { %4526 = vtanh.f32 %v424_v23  ;;  %v369_v23 = vmul.f32 %v5436_v37, %v5387_v50  ;;  %v407_v26 = vadd.f32 %v5402_v0, %v359_v49 }
  0xa6   : > { %v4503_v36 = vpop.eup %4502  ;;  %4528 = vtanh.f32 %v426_v25 }
  0xa7   : > { %v4505_v42 = vpop.eup %4504  ;;  %v473_v45 = vpack.c.bf16 %v4503_v36, %v4503_v36  ;;  %4530 = vtanh.f32 %v423_v28  ;;  %v417_v44 = vadd.f32 %v5404_v1, %v369_v23 }
  0xa8   : > { %v4507_v48 = vpop.eup %4506  ;;  %v475_v51 = vpack.c.bf16 %v4505_v42, %v4505_v42  ;;  %4532 = vtanh.f32 %v425_v30 }
  0xa9   : > { %v4509_v53 = vpop.eup %4508  ;;  %4227 = vmatprep.subr.msk.bf16.mxu0 %vm515_vm0, %v473_v45  ;;  %v472_v54 = vpack.c.bf16 %v4507_v48, %v4507_v48  ;;  %4534 = vtanh.f32 %v404_v32 }
  0xaa   : > { %v4511_v57 = vpop.eup %4510  ;;  %4230 = vmatprep.subr.msk.bf16.mxu1 %vm515_vm0, %v475_v51  ;;  %v474_v58 = vpack.c.bf16 %v4509_v53, %v4509_v53  ;;  %4536 = vtanh.f32 %v414_v40 }
  0xab   : > { %v4513_v61 = vpop.eup %4512  ;;  %v517_v62 = vsel %vm515_vm0, %v472_v54, 0  ;;  %4538 = vtanh.f32 %v406_v47 }
  0xac   : > { %v4515_v4 = vpop.eup %4514  ;;  %559 = vmatpush1.bf16.msra.mxu0 %v517_v62  ;;  %v523_v5 = vsel %vm515_vm0, %v474_v58, 0  ;;  %v463_v6 = vpack.c.bf16 %v4513_v61, %v4511_v57  ;;  %4540 = vtanh.f32 %v416_v52  ;;  %v5508_v61 = vpop.permute.xlu0 %497 }
  0xad   : > { %v4517_v8 = vpop.eup %4516  ;;  %610 = vmatpush1.bf16.msra.mxu1 %v523_v5  ;;  %4542 = vtanh.f32 %v403_v56 }
  0xae   : > { %v4519_v10 = vpop.eup %4518  ;;  %560 = vmatprep.subr.bf16.mxu0 %v463_v6  ;;  %v465_v11 = vpack.c.bf16 %v4517_v8, %v4515_v4  ;;  %4544 = vtanh.f32 %v413_v59  ;;  %v5510_v4 = vpop.permute.xlu1 %487 }
  0xaf   : > { %v4521_v14 = vpop.eup %4520  ;;  %4546 = vtanh.f32 %v405_v60 }
  0xb0   : > { %v4523_v16 = vpop.eup %4522  ;;  %611 = vmatprep.subr.bf16.mxu1 %v465_v11  ;;  %v462_v43 = vpack.c.bf16 %v4521_v14, %v4519_v10  ;;  %4548 = vtanh.f32 %v415_v63  ;;  %v5512_v7 = vpop.permute.xlu0 %492 }
  0xb1   : > { %v4525_v18 = vpop.eup %4524  ;;  %4550 = vtanh.f32 %v428_v9 }
  0xb2   : > { %v4527_v21 = vpop.eup %4526  ;;  %561 = vmatpush1.bf16.msra.mxu0 %v462_v43  ;;  %v464_v22 = vpack.c.bf16 %v4525_v18, %v4523_v16  ;;  %4552 = vtanh.f32 %v427_v12 }
  0xb3   : > { %v4529_v24 = vpop.eup %4528  ;;  %v477_v25 = vpack.c.bf16 %v4527_v21, %v4527_v21  ;;  %4554 = vtanh.f32 %v408_v17 }
  0xb4   : > { %v4531_v27 = vpop.eup %4530  ;;  %612 = vmatpush1.bf16.msra.mxu1 %v464_v22  ;;  %v479_v28 = vpack.c.bf16 %v4529_v24, %v4529_v24  ;;  %4556 = vtanh.f32 %v418_v20 }
  0xb5   : > { %v4533_v29 = vpop.eup %4532  ;;  %4233 = vmatprep.subr.msk.bf16.mxu0 %vm515_vm0, %v477_v25  ;;  %4228 = vmatmul.mubr.msk.bf16.vlgmr.msra.gmra.mxu0 %vm508_vm1, %v5465_v19  ;;  %v476_v30 = vpack.c.bf16 %v4531_v27, %v4531_v27  ;;  %4558 = vtanh.f32 %v407_v26 }
  0xb6   : > { %v4535_v50 = vpop.eup %4534  ;;  %4236 = vmatprep.subr.msk.bf16.mxu1 %vm515_vm0, %v479_v28  ;;  %v478_v31 = vpack.c.bf16 %v4533_v29, %v4533_v29  ;;  %588 = vmatprep.mubr.bf16.mxu0 %v5164_v2  ;;  %4560 = vtanh.f32 %v417_v44 }
  0xb7   : > { %v4537_v0 = vpop.eup %4536  ;;  %4231 = vmatmul.mubr.msk.bf16.vlgmr.msra.gmra.mxu1 %vm508_vm1, %v5465_v19  ;;  %v529_v1 = vsel %vm515_vm0, %v476_v30, 0 }
  0xb8   : > { %v4539_v32 = vpop.eup %4538  ;;  %661 = vmatpush1.bf16.msra.mxu0 %v529_v1  ;;  %v535_v33 = vsel %vm515_vm0, %v478_v31, 0  ;;  %v467_v37 = vpack.c.bf16 %v4537_v0, %v4535_v50  ;;  %639 = vmatprep.mubr.bf16.mxu1 %v5164_v2 }
  0xb9   : > { %v4541_v36 = vpop.eup %4540  ;;  %712 = vmatpush1.bf16.msra.mxu1 %v535_v33 }
  0xba   : > { %v4543_v40 = vpop.eup %4542  ;;  %662 = vmatprep.subr.bf16.mxu0 %v467_v37  ;;  %v469_v41 = vpack.c.bf16 %v4541_v36, %v4539_v32 }
  0xbb   : > { %v4545_v42 = vpop.eup %4544 }
  0xbc   : > { %v4547_v45 = vpop.eup %4546  ;;  %713 = vmatprep.subr.bf16.mxu1 %v469_v41  ;;  %v466_v46 = vpack.c.bf16 %v4545_v42, %v4543_v40 }
  0xbd   : > { %v4549_v47 = vpop.eup %4548  ;;  %4229 = vmatmul.mubr.msk.bf16.gmra.mxu0 %vm508_vm1, %v4485_v38 }
  0xbe   : > { %v4551_v48 = vpop.eup %4550  ;;  %663 = vmatpush1.bf16.msra.mxu0 %v466_v46  ;;  %v468_v51 = vpack.c.bf16 %v4549_v47, %v4547_v45  ;;  %680 = vmatprep.mubr.bf16.mxu0 %v5164_v2 }
  0xbf   : > { %v4553_v39 = vpop.eup %4552  ;;  %v481_v52 = vpack.c.bf16 %v4551_v48, %v4551_v48  ;;  %4232 = vmatmul.mubr.msk.bf16.gmra.mxu1 %vm508_vm1, %v4485_v38 }
  0xc0   : > { %714 = vmatpush1.bf16.msra.mxu1 %v468_v51  ;;  %731 = vmatprep.mubr.bf16.mxu1 %v5164_v2  ;;  %v4555_v53 = vpop.eup %4554  ;;  %v480_v54 = vpack.c.bf16 %v4553_v39, %v4553_v39 }
  0xc1   : > { %4239 = vmatprep.subr.msk.bf16.mxu0 %vm515_vm0, %v481_v52  ;;  %v4557_v55 = vpop.eup %4556 }
  0xc2   : > { %v4559_v56 = vpop.eup %4558  ;;  %v541_v58 = vsel %vm515_vm0, %v480_v54, 0  ;;  %v471_v59 = vpack.c.bf16 %v4557_v55, %v4555_v53 }
  0xc3   : > { %v4561_v57 = vpop.eup %4560 }
  0xc4   : > { %v470_v60 = vpack.c.bf16 %v4561_v57, %v4559_v56 }
  0xc5   : > { %4234 = vmatmul.mubr.msk.bf16.vlgmr.msra.gmra.mxu0 %vm508_vm1, %v5465_v19 }
  0xc6   : > { %763 = vmatpush1.bf16.msra.mxu0 %v541_v58  ;;  %690 = vmatprep.mubr.bf16.mxu0 %v5164_v2 }
  0xc7   : > { %4237 = vmatmul.mubr.msk.bf16.vlgmr.msra.gmra.mxu1 %vm508_vm1, %v5465_v19  ;;  %764 = vmatprep.subr.bf16.mxu0 %v471_v59 }
  0xc8   : > { %741 = vmatprep.mubr.bf16.mxu1 %v5164_v2 }
  0xca   : > { %765 = vmatpush1.bf16.msra.mxu0 %v470_v60 }
  0xcd   : > { %4235 = vmatmul.mubr.msk.bf16.gmra.mxu0 %vm508_vm1, %v4485_v38 }
  0xce   : > { %782 = vmatprep.mubr.bf16.mxu0 %v5164_v2 }
  0xcf   : > { %4238 = vmatmul.mubr.msk.bf16.gmra.mxu1 %vm508_vm1, %v4485_v38 }
  0xd0   : > { %950 = vmatprep.mubr.bf16.mxu1 %v5164_v2 }
  0xd5   : > { %4240 = vmatmul.mubr.msk.bf16.vlgmr.msra.gmra.mxu0 %vm508_vm1, %v5465_v19 }
  0xd6   : > { %792 = vmatprep.mubr.bf16.mxu0 %v5164_v2 }
  0xdd   : > { %4241 = vmatmul.mubr.msk.bf16.gmra.mxu0 %vm508_vm1, %v4485_v38 }
  0xde   : > { %1001 = vmatprep.mubr.bf16.mxu0 %v5164_v2 }
 0x175   : > { %v580_v62 = vpop.f32.mrf.mxu0 }
 0x176   : > { %v581_v26 = vadd.f32 %v580_v62, %v5510_v4 }
 0x177   : > { %v631_v63 = vpop.f32.mrf.mxu1  ;;  %v582_v3 = vpop.f32.mrf.mxu0 }
 0x178   : > { %v583_v8 = vadd.f32 %v582_v3, %v5510_v4  ;;  %v632_v27 = vadd.f32 %v631_v63, %v5510_v4 }
 0x179   : > { %v633_v5 = vpop.f32.mrf.mxu1  ;;  %v584_v6 = vpop.f32.mrf.mxu0 }
 0x17a   : > { %4562 = vtanh.f32 %v583_v8  ;;  %v634_v19 = vadd.f32 %v633_v5, %v5510_v4  ;;  %v585_v21 = vadd.f32 %v584_v6, %v5512_v7 }
 0x17b   : > { %v635_v9 = vpop.f32.mrf.mxu1  ;;  %v586_v10 = vpop.f32.mrf.mxu0 }
 0x17c   : > { %v587_v11 = vadd.f32 %v586_v10, %v5512_v7  ;;  %v636_v23 = vadd.f32 %v635_v9, %v5512_v7 }
 0x17d   : > { %v637_v12 = vpop.f32.mrf.mxu1  ;;  %v590_v13 = vpop.f32.mrf.mxu0 }
 0x17e   : > { %v638_v14 = vadd.f32 %v637_v12, %v5512_v7  ;;  %v591_v15 = vadd.f32 %v590_v13, %v5508_v61  ;;  %4564 = vtanh.f32 %v587_v11 }
 0x17f   : > { %v641_v16 = vpop.f32.mrf.mxu1  ;;  %v592_v43 = vpop.f32.mrf.mxu0 }
 0x180   : > { %4566 = vtanh.f32 %v638_v14  ;;  %v642_v17 = vadd.f32 %v641_v16, %v5508_v61  ;;  %v593_v18 = vadd.f32 %v592_v43, %v5508_v61 }
 0x181   : > { %4568 = vtanh.f32 %v591_v15  ;;  %v643_v49 = vpop.f32.mrf.mxu1  ;;  %v594_v20 = vpop.f32.mrf.mxu0 }
 0x182   : > { %4570 = vtanh.f32 %v642_v17  ;;  %v644_v22 = vadd.f32 %v643_v49, %v5508_v61 }
 0x183   : > { %4572 = vtanh.f32 %v593_v18  ;;  %v645_v24 = vpop.f32.mrf.mxu1  ;;  %v595_v25 = vpop.f32.mrf.mxu0 }
 0x184   : > { %4574 = vtanh.f32 %v644_v22 }
 0x185   : > { %4576 = vtanh.f32 %v634_v19  ;;  %v646_v28 = vpop.f32.mrf.mxu1  ;;  %v682_v44 = vpop.f32.mrf.mxu0 }
 0x186   : > { %4578 = vtanh.f32 %v585_v21  ;;  %v683_v14 = vadd.f32 %v682_v44, %v5510_v4 }
 0x187   : > { %4580 = vtanh.f32 %v636_v23  ;;  %v733_v29 = vpop.f32.mrf.mxu1  ;;  %v684_v30 = vpop.f32.mrf.mxu0  ;;  %v5545_v23 = vld [vmem:[%s6299_s3 + $0xc] sm:$0xff]  }
 0x188   : > { %4582 = vtanh.f32 %v581_v26  ;;  %v685_v0 = vadd.f32 %v684_v30, %v5510_v4  ;;  %v4563_v1 = vpop.eup %4562  ;;  %v734_v17 = vadd.f32 %v733_v29, %v5510_v4 }
 0x189   : > { %4584 = vtanh.f32 %v632_v27  ;;  %v735_v50 = vpop.f32.mrf.mxu1  ;;  %v686_v31 = vpop.f32.mrf.mxu0 }
 0x18a   : > { %4586 = vtanh.f32 %v685_v0  ;;  %v736_v58 = vadd.f32 %v735_v50, %v5510_v4  ;;  %v687_v3 = vadd.f32 %v686_v31, %v5512_v7 }
 0x18b   : > { %v737_v32 = vpop.f32.mrf.mxu1  ;;  %v688_v33 = vpop.f32.mrf.mxu0 }
 0x18c   : > { %v4565_v37 = vpop.eup %4564  ;;  %v689_v36 = vadd.f32 %v688_v33, %v5512_v7  ;;  %v738_v8 = vadd.f32 %v737_v32, %v5512_v7  ;;  %v5559_v32 = vld [vmem:[%s6299_s3 + $0x14] ss:$0 sps:$4 sm:$0x33]  }
 0x18d   : > { %v4567_v38 = vpop.eup %4566  ;;  %v739_v40 = vpop.f32.mrf.mxu1  ;;  %v836_v11 = vpack.c.bf16 %v4565_v37, %v4563_v1 }
 0x18e   : > { %v692_v41 = vpop.f32.mrf.mxu0  ;;  %v4569_v42 = vpop.eup %4568  ;;  %v740_v45 = vadd.f32 %v739_v40, %v5512_v7  ;;  %4588 = vtanh.f32 %v689_v36 }
 0x18f   : > { %v693_v46 = vadd.f32 %v692_v41, %v5508_v61  ;;  %v4571_v47 = vpop.eup %4570  ;;  %v845_v48 = vpack.c.bf16 %v4569_v42, %v4569_v42  ;;  %v743_v51 = vpop.f32.mrf.mxu1 }
 0x190   : > { %v694_v39 = vpop.f32.mrf.mxu0  ;;  %v4573_v52 = vpop.eup %4572  ;;  %v847_v53 = vpack.c.bf16 %v4571_v47, %v4571_v47  ;;  %4590 = vtanh.f32 %v740_v45  ;;  %v744_v54 = vadd.f32 %v743_v51, %v5508_v61 }
 0x191   : > { %v695_v55 = vadd.f32 %v694_v39, %v5508_v61  ;;  %v4575_v56 = vpop.eup %4574  ;;  %v846_v57 = vpack.c.bf16 %v4573_v52, %v4573_v52  ;;  %4592 = vtanh.f32 %v693_v46  ;;  %v745_v59 = vpop.f32.mrf.mxu1  ;;  %v889_v10 = vsel %vm515_vm0, %v845_v48, 0 }
 0x192   : > { %v696_v60 = vpop.f32.mrf.mxu0  ;;  %v4577_v62 = vpop.eup %4576  ;;  %v848_v63 = vpack.c.bf16 %v4575_v56, %v4575_v56  ;;  %4594 = vtanh.f32 %v744_v54  ;;  %v746_v5 = vadd.f32 %v745_v59, %v5508_v61  ;;  %v895_v15 = vsel %vm515_vm0, %v847_v53, 0 }
 0x193   : > { %v4579_v6 = vpop.eup %4578  ;;  %4596 = vtanh.f32 %v695_v55  ;;  %4250 = vmatprep.subr.msk.bf16.mxu1 %vm515_vm0, %v846_v57  ;;  %v747_v12 = vpop.f32.mrf.mxu1  ;;  %v838_v16 = vpack.c.bf16 %v4567_v38, %v4577_v62 }
 0x194   : > { %v697_v9 = vpop.f32.mrf.mxu0  ;;  %v4581_v13 = vpop.eup %4580  ;;  %4598 = vtanh.f32 %v746_v5  ;;  %4253 = vmatprep.subr.msk.bf16.mxu0 %vm515_vm0, %v848_v63  ;;  %931 = vmatpush1.bf16.msra.mxu1 %v889_v10 }
 0x195   : > { %v4583_v43 = vpop.eup %4582  ;;  %4600 = vtanh.f32 %v736_v58  ;;  %982 = vmatpush1.bf16.msra.mxu0 %v895_v15  ;;  %932 = vmatprep.subr.bf16.mxu1 %v836_v11  ;;  %v748_v19 = vpop.f32.mrf.mxu1 }
 0x196   : > { %v784_v18 = vpop.f32.mrf.mxu0  ;;  %v4585_v49 = vpop.eup %4584  ;;  %4602 = vtanh.f32 %v687_v3  ;;  %983 = vmatprep.subr.bf16.mxu0 %v838_v16  ;;  %v835_v20 = vpack.c.bf16 %v4579_v6, %v4583_v43 }
 0x197   : > { %4604 = vtanh.f32 %v738_v8  ;;  %v837_v22 = vpack.c.bf16 %v4581_v13, %v4585_v49  ;;  %v4587_v25 = vpop.eup %4586  ;;  %v785_v51 = vadd.f32 %v784_v18, %v5510_v4  ;;  %v5594_v11 = vpop.permute.xlu1 %871 }
 0x198   : > { %v786_v21 = vpop.f32.mrf.mxu0  ;;  %4606 = vtanh.f32 %v683_v14  ;;  %933 = vmatpush1.bf16.msra.mxu1 %v835_v20  ;;  %v5596_v15 = vpop.permute.xlu0 %861 }
 0x199   : > { %4608 = vtanh.f32 %v734_v17  ;;  %984 = vmatpush1.bf16.msra.mxu0 %v837_v22  ;;  %v787_v44 = vadd.f32 %v786_v21, %v5510_v4 }
 0x19a   : > { %v788_v24 = vpop.f32.mrf.mxu0 }
 0x19b   : > { %4251 = vmatmul.mubr.msk.bf16.vlgmr.msra.gmra.mxu1 %vm508_vm1, %v5545_v23  ;;  %v4589_v27 = vpop.eup %4588  ;;  %v789_v42 = vadd.f32 %v788_v24, %v5512_v7  ;;  %v5599_v19 = vpop.permute.xlu1 %866 }
 0x19c   : > { %v790_v26 = vpop.f32.mrf.mxu0  ;;  %4254 = vmatmul.mubr.msk.bf16.vlgmr.msra.gmra.mxu0 %vm508_vm1, %v5545_v23  ;;  %960 = vmatprep.mubr.bf16.mxu1 %v5164_v2  ;;  %v840_v53 = vpack.c.bf16 %v4589_v27, %v4587_v25 }
 0x19d   : > { %v4591_v28 = vpop.eup %4590  ;;  %1011 = vmatprep.mubr.bf16.mxu0 %v5164_v2  ;;  %v791_v0 = vadd.f32 %v790_v26, %v5512_v7 }
 0x19e   : > { %v794_v29 = vpop.f32.mrf.mxu0  ;;  %v4593_v30 = vpop.eup %4592 }
 0x19f   : > { %v795_v50 = vadd.f32 %v794_v29, %v5508_v61  ;;  %v4595_v31 = vpop.eup %4594  ;;  %v849_v37 = vpack.c.bf16 %v4593_v30, %v4593_v30 }
 0x1a0   : > { %v796_v1 = vpop.f32.mrf.mxu0  ;;  %v4597_v33 = vpop.eup %4596  ;;  %v851_v36 = vpack.c.bf16 %v4595_v31, %v4595_v31 }
 0x1a1   : > { %4610 = vtanh.f32 %v795_v50  ;;  %v797_v38 = vadd.f32 %v796_v1, %v5508_v61  ;;  %v4599_v40 = vpop.eup %4598  ;;  %v850_v41 = vpack.c.bf16 %v4597_v33, %v4597_v33  ;;  %v901_v7 = vsel %vm515_vm0, %v849_v37, 0 }
 0x1a2   : > { %4612 = vtanh.f32 %v787_v44  ;;  %v798_v45 = vpop.f32.mrf.mxu0  ;;  %v4601_v46 = vpop.eup %4600  ;;  %v852_v47 = vpack.c.bf16 %v4599_v40, %v4599_v40  ;;  %v907_v52 = vsel %vm515_vm0, %v851_v36, 0 }
 0x1a3   : > { %4614 = vtanh.f32 %v797_v38  ;;  %v4603_v48 = vpop.eup %4602  ;;  %4252 = vmatmul.mubr.msk.bf16.gmra.mxu1 %vm508_vm1, %v5559_v32  ;;  %4256 = vmatprep.subr.msk.bf16.mxu1 %vm515_vm0, %v850_v41  ;;  %v842_v54 = vpack.c.bf16 %v4591_v28, %v4601_v46 }
 0x1a4   : > { %4616 = vtanh.f32 %v791_v0  ;;  %v799_v39 = vpop.f32.mrf.mxu0  ;;  %v4605_v61 = vpop.eup %4604  ;;  %4255 = vmatmul.mubr.msk.bf16.gmra.mxu0 %vm508_vm1, %v5559_v32  ;;  %4259 = vmatprep.subr.msk.bf16.mxu0 %vm515_vm0, %v852_v47 }
 0x1a5   : > { %v4607_v4 = vpop.eup %4606  ;;  %4618 = vtanh.f32 %v789_v42  ;;  %1033 = vmatpush1.bf16.msra.mxu1 %v901_v7  ;;  %1084 = vmatpush1.bf16.msra.mxu0 %v907_v52 }
 0x1a6   : > { %v4609_v55 = vpop.eup %4608  ;;  %1034 = vmatprep.subr.bf16.mxu1 %v840_v53  ;;  %1085 = vmatprep.subr.bf16.mxu0 %v842_v54  ;;  %4620 = vtanh.f32 %v785_v51  ;;  %v839_v56 = vpack.c.bf16 %v4603_v48, %v4607_v4 }
 0x1a7   : > { %v841_v57 = vpack.c.bf16 %v4605_v61, %v4609_v55  ;;  %1052 = vmatprep.mubr.bf16.mxu1 %v5164_v2  ;;  %1103 = vmatprep.mubr.bf16.mxu0 %v5164_v2 }
 0x1a9   : > { %1035 = vmatpush1.bf16.msra.mxu1 %v839_v56  ;;  %1086 = vmatpush1.bf16.msra.mxu0 %v841_v57 }
 0x1ac   : > { %4257 = vmatmul.mubr.msk.bf16.vlgmr.msra.gmra.mxu1 %vm508_vm1, %v5545_v23  ;;  %4260 = vmatmul.mubr.msk.bf16.vlgmr.msra.gmra.mxu0 %vm508_vm1, %v5545_v23 }
 0x1ad   : > { %1062 = vmatprep.mubr.bf16.mxu1 %v5164_v2  ;;  %1113 = vmatprep.mubr.bf16.mxu0 %v5164_v2 }
 0x1ae   : > { %v4611_v58 = vpop.eup %4610 }
 0x1af   : > { %v4613_v59 = vpop.eup %4612  ;;  %v853_v60 = vpack.c.bf16 %v4611_v58, %v4611_v58 }
 0x1b0   : > { %v4615_v62 = vpop.eup %4614 }
 0x1b1   : > { %v4617_v63 = vpop.eup %4616  ;;  %v854_v3 = vpack.c.bf16 %v4615_v62, %v4615_v62  ;;  %v913_v6 = vsel %vm515_vm0, %v853_v60, 0 }
 0x1b2   : > { %v4619_v5 = vpop.eup %4618  ;;  %v844_v8 = vpack.c.bf16 %v4617_v63, %v4613_v59 }
 0x1b3   : > { %4262 = vmatprep.subr.msk.bf16.mxu1 %vm515_vm0, %v854_v3  ;;  %v4621_v9 = vpop.eup %4620 }
 0x1b4   : > { %1135 = vmatpush1.bf16.msra.mxu1 %v913_v6  ;;  %4261 = vmatmul.mubr.msk.bf16.gmra.mxu0 %vm508_vm1, %v5559_v32  ;;  %v843_v10 = vpack.c.bf16 %v4619_v5, %v4621_v9 }
 0x1b5   : > { %4258 = vmatmul.mubr.msk.bf16.gmra.mxu1 %vm508_vm1, %v5559_v32  ;;  %1136 = vmatprep.subr.bf16.mxu1 %v844_v8 }
 0x1b6   : > { %1154 = vmatprep.mubr.bf16.mxu1 %v5164_v2  ;;  %1322 = vmatprep.mubr.bf16.mxu0 %v5164_v2 }
 0x1b8   : > { %1137 = vmatpush1.bf16.msra.mxu1 %v843_v10 }
 0x1bd   : > { %4263 = vmatmul.mubr.msk.bf16.vlgmr.msra.gmra.mxu1 %vm508_vm1, %v5545_v23 }
 0x1be   : > { %1164 = vmatprep.mubr.bf16.mxu1 %v5164_v2 }
 0x1c5   : > { %4264 = vmatmul.mubr.msk.bf16.gmra.mxu1 %vm508_vm1, %v5559_v32 }
 0x1c6   : > { %1373 = vmatprep.mubr.bf16.mxu1 %v5164_v2 }
 0x25b   : > { %v952_v12 = vpop.f32.mrf.mxu1 }
 0x25c   : > { %v1003_v13 = vpop.f32.mrf.mxu0  ;;  %v953_v32 = vadd.f32 %v952_v12, %v5596_v15 }
 0x25d   : > { %v954_v14 = vpop.f32.mrf.mxu1  ;;  %v1004_v37 = vadd.f32 %v1003_v13, %v5596_v15 }
 0x25e   : > { %v1005_v16 = vpop.f32.mrf.mxu0  ;;  %v955_v43 = vadd.f32 %v954_v14, %v5596_v15 }
 0x25f   : > { %v956_v17 = vpop.f32.mrf.mxu1  ;;  %v1006_v28 = vadd.f32 %v1005_v16, %v5596_v15 }
 0x260   : > { %v1007_v18 = vpop.f32.mrf.mxu0  ;;  %4622 = vtanh.f32 %v955_v43  ;;  %v957_v30 = vadd.f32 %v956_v17, %v5599_v19 }
 0x261   : > { %v958_v49 = vpop.f32.mrf.mxu1  ;;  %v1008_v0 = vadd.f32 %v1007_v18, %v5599_v19 }
 0x262   : > { %v959_v20 = vadd.f32 %v958_v49, %v5599_v19  ;;  %v1009_v21 = vpop.f32.mrf.mxu0 }
 0x263   : > { %v1010_v22 = vadd.f32 %v1009_v21, %v5599_v19  ;;  %v962_v23 = vpop.f32.mrf.mxu1 }
 0x264   : > { %4624 = vtanh.f32 %v959_v20  ;;  %v963_v24 = vadd.f32 %v962_v23, %v5594_v11  ;;  %v1013_v25 = vpop.f32.mrf.mxu0 }
 0x265   : > { %4626 = vtanh.f32 %v1010_v22  ;;  %v1014_v26 = vadd.f32 %v1013_v25, %v5594_v11  ;;  %v964_v27 = vpop.f32.mrf.mxu1 }
 0x266   : > { %4628 = vtanh.f32 %v963_v24  ;;  %v965_v44 = vadd.f32 %v964_v27, %v5594_v11  ;;  %v1015_v29 = vpop.f32.mrf.mxu0 }
 0x267   : > { %4630 = vtanh.f32 %v1014_v26  ;;  %v1016_v50 = vadd.f32 %v1015_v29, %v5594_v11  ;;  %v966_v31 = vpop.f32.mrf.mxu1 }
 0x268   : > { %4632 = vtanh.f32 %v965_v44  ;;  %v1017_v1 = vpop.f32.mrf.mxu0  ;;  %v5631_v31 = vld [vmem:[%s6299_s3 + $0x18] sm:$0xff]  }
 0x269   : > { %4634 = vtanh.f32 %v1016_v50  ;;  %v967_v33 = vpop.f32.mrf.mxu1 }
 0x26a   : > { %4636 = vtanh.f32 %v1006_v28  ;;  %v1018_v36 = vpop.f32.mrf.mxu0 }
 0x26b   : > { %4638 = vtanh.f32 %v957_v30 }
 0x26c   : > { %4640 = vtanh.f32 %v1008_v0  ;;  %v1054_v38 = vpop.f32.mrf.mxu1  ;;  %v1105_v40 = vpop.f32.mrf.mxu0 }
 0x26d   : > { %4642 = vtanh.f32 %v953_v32  ;;  %v4623_v45 = vpop.eup %4622  ;;  %v1055_v25 = vadd.f32 %v1054_v38, %v5596_v15  ;;  %v1106_v44 = vadd.f32 %v1105_v40, %v5596_v15 }
 0x26e   : > { %4644 = vtanh.f32 %v1004_v37  ;;  %v1056_v41 = vpop.f32.mrf.mxu1  ;;  %v1107_v42 = vpop.f32.mrf.mxu0 }
 0x26f   : > { %v1057_v46 = vadd.f32 %v1056_v41, %v5596_v15  ;;  %v1108_v5 = vadd.f32 %v1107_v42, %v5596_v15  ;;  %v5643_v42 = vld [vmem:[%s6299_s3 + $0x20] ss:$0 sps:$4 sm:$0x33]  }
 0x270   : > { %v1058_v47 = vpop.f32.mrf.mxu1  ;;  %v1109_v48 = vpop.f32.mrf.mxu0 }
 0x271   : > { %v4625_v51 = vpop.eup %4624  ;;  %4646 = vtanh.f32 %v1057_v46  ;;  %v1059_v16 = vadd.f32 %v1058_v47, %v5599_v19  ;;  %v1110_v21 = vadd.f32 %v1109_v48, %v5599_v19 }
 0x272   : > { %v4627_v39 = vpop.eup %4626  ;;  %v1060_v61 = vpop.f32.mrf.mxu1  ;;  %v1208_v18 = vpack.c.bf16 %v4625_v51, %v4623_v45 }
 0x273   : > { %v1111_v7 = vpop.f32.mrf.mxu0  ;;  %v4629_v52 = vpop.eup %4628  ;;  %v1061_v53 = vadd.f32 %v1060_v61, %v5599_v19 }
 0x274   : > { %v1112_v54 = vadd.f32 %v1111_v7, %v5599_v19  ;;  %v4631_v4 = vpop.eup %4630  ;;  %v1217_v55 = vpack.c.bf16 %v4629_v52, %v4629_v52 }
 0x275   : > { %v1064_v56 = vpop.f32.mrf.mxu1  ;;  %v1115_v57 = vpop.f32.mrf.mxu0  ;;  %v1219_v59 = vpack.c.bf16 %v4631_v4, %v4631_v4  ;;  %4648 = vtanh.f32 %v1061_v53 }
 0x276   : > { %v4633_v58 = vpop.eup %4632  ;;  %v1065_v60 = vadd.f32 %v1064_v56, %v5594_v11  ;;  %v1116_v62 = vadd.f32 %v1115_v57, %v5594_v11  ;;  %4650 = vtanh.f32 %v1112_v54  ;;  %v1261_v17 = vsel %vm515_vm0, %v1217_v55, 0 }
 0x277   : > { %v4635_v63 = vpop.eup %4634  ;;  %v1218_v3 = vpack.c.bf16 %v4633_v58, %v4633_v58  ;;  %v1066_v6 = vpop.f32.mrf.mxu1  ;;  %v1267_v22 = vsel %vm515_vm0, %v1219_v59, 0 }
 0x278   : > { %v1117_v8 = vpop.f32.mrf.mxu0  ;;  %v4637_v9 = vpop.eup %4636  ;;  %v1220_v10 = vpack.c.bf16 %v4635_v63, %v4635_v63  ;;  %4652 = vtanh.f32 %v1065_v60  ;;  %v1067_v12 = vadd.f32 %v1066_v6, %v5594_v11 }
 0x279   : > { %v1118_v13 = vadd.f32 %v1117_v8, %v5594_v11  ;;  %v4639_v14 = vpop.eup %4638  ;;  %4654 = vtanh.f32 %v1116_v62  ;;  %v1068_v43 = vpop.f32.mrf.mxu1  ;;  %4273 = vmatprep.subr.msk.bf16.mxu0 %vm515_vm0, %v1218_v3  ;;  %v1210_v23 = vpack.c.bf16 %v4627_v39, %v4637_v9 }
 0x27a   : > { %v1119_v49 = vpop.f32.mrf.mxu0  ;;  %v4641_v20 = vpop.eup %4640  ;;  %4656 = vtanh.f32 %v1067_v12  ;;  %4276 = vmatprep.subr.msk.bf16.mxu1 %vm515_vm0, %v1220_v10  ;;  %1303 = vmatpush1.bf16.msra.mxu0 %v1261_v17 }
 0x27b   : > { %v4643_v24 = vpop.eup %4642  ;;  %4658 = vtanh.f32 %v1118_v13  ;;  %v1069_v26 = vpop.f32.mrf.mxu1  ;;  %1354 = vmatpush1.bf16.msra.mxu1 %v1267_v22  ;;  %1304 = vmatprep.subr.bf16.mxu0 %v1208_v18 }
 0x27c   : > { %v1120_v27 = vpop.f32.mrf.mxu0  ;;  %v4645_v28 = vpop.eup %4644  ;;  %4660 = vtanh.f32 %v1108_v5  ;;  %1355 = vmatprep.subr.bf16.mxu1 %v1210_v23  ;;  %v1207_v29 = vpack.c.bf16 %v4639_v14, %v4643_v24 }
 0x27d   : > { %4662 = vtanh.f32 %v1059_v16  ;;  %v1156_v30 = vpop.f32.mrf.mxu1  ;;  %v1209_v50 = vpack.c.bf16 %v4641_v20, %v4645_v28  ;;  %v5680_v20 = vpop.permute.xlu0 %1243 }
 0x27e   : > { %4664 = vtanh.f32 %v1110_v21  ;;  %1305 = vmatpush1.bf16.msra.mxu0 %v1207_v29  ;;  %v4647_v32 = vpop.eup %4646  ;;  %v1157_v60 = vadd.f32 %v1156_v30, %v5596_v15  ;;  %v5682_v24 = vpop.permute.xlu1 %1233 }
 0x27f   : > { %4666 = vtanh.f32 %v1055_v25  ;;  %v1158_v0 = vpop.f32.mrf.mxu1  ;;  %1356 = vmatpush1.bf16.msra.mxu1 %v1209_v50 }
 0x280   : > { %4668 = vtanh.f32 %v1106_v44  ;;  %v1159_v52 = vadd.f32 %v1158_v0, %v5596_v15 }
 0x281   : > { %v1160_v1 = vpop.f32.mrf.mxu1  ;;  %4274 = vmatmul.mubr.msk.bf16.vlgmr.msra.gmra.mxu0 %vm508_vm1, %v5631_v31  ;;  %v5685_v44 = vpop.permute.xlu0 %1238 }
 0x282   : > { %4277 = vmatmul.mubr.msk.bf16.vlgmr.msra.gmra.mxu1 %vm508_vm1, %v5631_v31  ;;  %1332 = vmatprep.mubr.bf16.mxu0 %v5164_v2  ;;  %v4649_v33 = vpop.eup %4648  ;;  %v1161_v55 = vadd.f32 %v1160_v1, %v5599_v19 }
 0x283   : > { %v1162_v37 = vpop.f32.mrf.mxu1  ;;  %1383 = vmatprep.mubr.bf16.mxu1 %v5164_v2  ;;  %v4651_v36 = vpop.eup %4650  ;;  %v1212_v59 = vpack.c.bf16 %v4649_v33, %v4647_v32 }
 0x284   : > { %v1163_v40 = vadd.f32 %v1162_v37, %v5599_v19 }
 0x285   : > { %v4653_v38 = vpop.eup %4652  ;;  %v1166_v41 = vpop.f32.mrf.mxu1 }
 0x286   : > { %v4655_v45 = vpop.eup %4654  ;;  %v1221_v46 = vpack.c.bf16 %v4653_v38, %v4653_v38  ;;  %v1167_v47 = vadd.f32 %v1166_v41, %v5594_v11 }
 0x287   : > { %v4657_v48 = vpop.eup %4656  ;;  %v1223_v51 = vpack.c.bf16 %v4655_v45, %v4655_v45  ;;  %v1168_v39 = vpop.f32.mrf.mxu1 }
 0x288   : > { %v4659_v61 = vpop.eup %4658  ;;  %v1222_v7 = vpack.c.bf16 %v4657_v48, %v4657_v48  ;;  %4670 = vtanh.f32 %v1167_v47  ;;  %v1169_v53 = vadd.f32 %v1168_v39, %v5594_v11  ;;  %v1273_v58 = vsel %vm515_vm0, %v1221_v46, 0 }
 0x289   : > { %v4661_v54 = vpop.eup %4660  ;;  %v1224_v4 = vpack.c.bf16 %v4659_v61, %v4659_v61  ;;  %4672 = vtanh.f32 %v1163_v40  ;;  %v1170_v56 = vpop.f32.mrf.mxu1  ;;  %4275 = vmatmul.mubr.msk.bf16.gmra.mxu0 %vm508_vm1, %v5643_v42  ;;  %v1279_v62 = vsel %vm515_vm0, %v1223_v51, 0 }
 0x28a   : > { %v4663_v57 = vpop.eup %4662  ;;  %4674 = vtanh.f32 %v1169_v53  ;;  %4278 = vmatmul.mubr.msk.bf16.gmra.mxu1 %vm508_vm1, %v5643_v42  ;;  %4279 = vmatprep.subr.msk.bf16.mxu0 %vm515_vm0, %v1222_v7  ;;  %v1214_v63 = vpack.c.bf16 %v4651_v36, %v4661_v54 }
 0x28b   : > { %v4665_v11 = vpop.eup %4664  ;;  %4282 = vmatprep.subr.msk.bf16.mxu1 %vm515_vm0, %v1224_v4  ;;  %v1171_v19 = vpop.f32.mrf.mxu1  ;;  %1405 = vmatpush1.bf16.msra.mxu0 %v1273_v58  ;;  %4676 = vtanh.f32 %v1159_v52 }
 0x28c   : > { %v4667_v3 = vpop.eup %4666  ;;  %1456 = vmatpush1.bf16.msra.mxu1 %v1279_v62  ;;  %1406 = vmatprep.subr.bf16.mxu0 %v1212_v59  ;;  %4678 = vtanh.f32 %v1161_v55 }
 0x28d   : > { %v4669_v5 = vpop.eup %4668  ;;  %1457 = vmatprep.subr.bf16.mxu1 %v1214_v63  ;;  %v1211_v6 = vpack.c.bf16 %v4663_v57, %v4667_v3  ;;  %1424 = vmatprep.mubr.bf16.mxu0 %v5164_v2  ;;  %4680 = vtanh.f32 %v1157_v60 }
 0x28e   : > { %v1213_v8 = vpack.c.bf16 %v4665_v11, %v4669_v5  ;;  %1475 = vmatprep.mubr.bf16.mxu1 %v5164_v2 }
 0x28f   : > { %1407 = vmatpush1.bf16.msra.mxu0 %v1211_v6 }
 0x290   : > { %1458 = vmatpush1.bf16.msra.mxu1 %v1213_v8 }
 0x292   : > { %4280 = vmatmul.mubr.msk.bf16.vlgmr.msra.gmra.mxu0 %vm508_vm1, %v5631_v31 }
 0x293   : > { %4283 = vmatmul.mubr.msk.bf16.vlgmr.msra.gmra.mxu1 %vm508_vm1, %v5631_v31  ;;  %1434 = vmatprep.mubr.bf16.mxu0 %v5164_v2 }
 0x294   : > { %1485 = vmatprep.mubr.bf16.mxu1 %v5164_v2 }
 0x295   : > { %v4671_v15 = vpop.eup %4670 }
 0x296   : > { %v4673_v9 = vpop.eup %4672  ;;  %v1225_v10 = vpack.c.bf16 %v4671_v15, %v4671_v15 }
 0x297   : > { %v4675_v12 = vpop.eup %4674 }
 0x298   : > { %v1226_v13 = vpack.c.bf16 %v4675_v12, %v4675_v12  ;;  %v4677_v14 = vpop.eup %4676  ;;  %v1285_v43 = vsel %vm515_vm0, %v1225_v10, 0 }
 0x299   : > { %v4679_v16 = vpop.eup %4678  ;;  %v1216_v17 = vpack.c.bf16 %v4673_v9, %v4677_v14 }
 0x29a   : > { %4281 = vmatmul.mubr.msk.bf16.gmra.mxu0 %vm508_vm1, %v5643_v42  ;;  %4285 = vmatprep.subr.msk.bf16.mxu0 %vm515_vm0, %v1226_v13  ;;  %v4681_v18 = vpop.eup %4680 }
 0x29b   : > { %4284 = vmatmul.mubr.msk.bf16.gmra.mxu1 %vm508_vm1, %v5643_v42  ;;  %1507 = vmatpush1.bf16.msra.mxu0 %v1285_v43  ;;  %v1215_v49 = vpack.c.bf16 %v4679_v16, %v4681_v18 }
 0x29c   : > { %1508 = vmatprep.subr.bf16.mxu0 %v1216_v17  ;;  %1526 = vmatprep.mubr.bf16.mxu0 %v5164_v2 }
 0x29d   : > { %1694 = vmatprep.mubr.bf16.mxu1 %v5164_v2 }
 0x29f   : > { %1509 = vmatpush1.bf16.msra.mxu0 %v1215_v49 }
 0x2a2   : > { %4286 = vmatmul.mubr.msk.bf16.vlgmr.msra.gmra.mxu0 %vm508_vm1, %v5631_v31 }
 0x2a3   : > { %1536 = vmatprep.mubr.bf16.mxu0 %v5164_v2 }
 0x2aa   : > { %4287 = vmatmul.mubr.msk.bf16.gmra.mxu0 %vm508_vm1, %v5643_v42 }
 0x2ab   : > { %1745 = vmatprep.mubr.bf16.mxu0 %v5164_v2 }
 0x341   : > { %v1324_v21 = vpop.f32.mrf.mxu0 }
 0x342   : > { %v1375_v22 = vpop.f32.mrf.mxu1  ;;  %v1325_v48 = vadd.f32 %v1324_v21, %v5682_v24 }
 0x343   : > { %v1326_v23 = vpop.f32.mrf.mxu0  ;;  %v1376_v39 = vadd.f32 %v1375_v22, %v5682_v24 }
 0x344   : > { %v1377_v25 = vpop.f32.mrf.mxu1  ;;  %v1327_v26 = vadd.f32 %v1326_v23, %v5682_v24 }
 0x345   : > { %v1328_v27 = vpop.f32.mrf.mxu0  ;;  %v1378_v36 = vadd.f32 %v1377_v25, %v5682_v24 }
 0x346   : > { %v1379_v28 = vpop.f32.mrf.mxu1  ;;  %4682 = vtanh.f32 %v1327_v26  ;;  %v1329_v41 = vadd.f32 %v1328_v27, %v5685_v44 }
 0x347   : > { %v1330_v29 = vpop.f32.mrf.mxu0  ;;  %v1380_v46 = vadd.f32 %v1379_v28, %v5685_v44 }
 0x348   : > { %v1331_v30 = vadd.f32 %v1330_v29, %v5685_v44  ;;  %v1381_v50 = vpop.f32.mrf.mxu1 }
 0x349   : > { %v1382_v31 = vadd.f32 %v1381_v50, %v5685_v44  ;;  %v1334_v0 = vpop.f32.mrf.mxu0 }
 0x34a   : > { %4684 = vtanh.f32 %v1331_v30  ;;  %v1335_v1 = vadd.f32 %v1334_v0, %v5680_v20  ;;  %v1385_v32 = vpop.f32.mrf.mxu1 }
 0x34b   : > { %4686 = vtanh.f32 %v1382_v31  ;;  %v1386_v33 = vadd.f32 %v1385_v32, %v5680_v20  ;;  %v1336_v37 = vpop.f32.mrf.mxu0 }
 0x34c   : > { %4688 = vtanh.f32 %v1335_v1  ;;  %v1337_v38 = vadd.f32 %v1336_v37, %v5680_v20  ;;  %v1387_v40 = vpop.f32.mrf.mxu1 }
 0x34d   : > { %4690 = vtanh.f32 %v1386_v33  ;;  %v1388_v42 = vadd.f32 %v1387_v40, %v5680_v20  ;;  %v1338_v45 = vpop.f32.mrf.mxu0 }
 0x34e   : > { %4692 = vtanh.f32 %v1337_v38  ;;  %v1389_v47 = vpop.f32.mrf.mxu1  ;;  %v5717_v45 = vld [vmem:[%s6299_s3 + $0x24] sm:$0xff]  }
 0x34f   : > { %4694 = vtanh.f32 %v1388_v42  ;;  %v1339_v51 = vpop.f32.mrf.mxu0 }
 0x350   : > { %4696 = vtanh.f32 %v1378_v36  ;;  %v1390_v61 = vpop.f32.mrf.mxu1 }
 0x351   : > { %4698 = vtanh.f32 %v1329_v41 }
 0x352   : > { %4700 = vtanh.f32 %v1380_v46  ;;  %v1426_v7 = vpop.f32.mrf.mxu0 }
 0x353   : > { %4702 = vtanh.f32 %v1325_v48  ;;  %v1477_v52 = vpop.f32.mrf.mxu1  ;;  %v4683_v4 = vpop.eup %4682  ;;  %v1427_v32 = vadd.f32 %v1426_v7, %v5682_v24 }
 0x354   : > { %4704 = vtanh.f32 %v1376_v39  ;;  %v1428_v53 = vpop.f32.mrf.mxu0  ;;  %v1478_v36 = vadd.f32 %v1477_v52, %v5682_v24 }
 0x355   : > { %v1479_v54 = vpop.f32.mrf.mxu1  ;;  %v1429_v55 = vadd.f32 %v1428_v53, %v5682_v24 }
 0x356   : > { %v1430_v56 = vpop.f32.mrf.mxu0  ;;  %v1480_v14 = vadd.f32 %v1479_v54, %v5682_v24  ;;  %v5729_v54 = vld [vmem:[%s6299_s3 + $0x2c] ss:$0 sps:$4 sm:$0x33]  }
 0x357   : > { %v4685_v57 = vpop.eup %4684  ;;  %v1481_v58 = vpop.f32.mrf.mxu1  ;;  %4706 = vtanh.f32 %v1429_v55  ;;  %v1431_v49 = vadd.f32 %v1430_v56, %v5685_v44 }
 0x358   : > { %v4687_v59 = vpop.eup %4686  ;;  %v1432_v11 = vpop.f32.mrf.mxu0  ;;  %v1580_v28 = vpack.c.bf16 %v4685_v57, %v4683_v4  ;;  %v1482_v30 = vadd.f32 %v1481_v58, %v5685_v44 }
 0x359   : > { %v4689_v60 = vpop.eup %4688  ;;  %v1433_v19 = vadd.f32 %v1432_v11, %v5685_v44  ;;  %v1483_v62 = vpop.f32.mrf.mxu1 }
 0x35a   : > { %v4691_v63 = vpop.eup %4690  ;;  %v1589_v3 = vpack.c.bf16 %v4689_v60, %v4689_v60  ;;  %v1484_v5 = vadd.f32 %v1483_v62, %v5685_v44  ;;  %v1436_v6 = vpop.f32.mrf.mxu0 }
 0x35b   : > { %v4693_v8 = vpop.eup %4692  ;;  %v1591_v15 = vpack.c.bf16 %v4691_v63, %v4691_v63  ;;  %4708 = vtanh.f32 %v1433_v19  ;;  %v1437_v9 = vadd.f32 %v1436_v6, %v5680_v20  ;;  %v1487_v10 = vpop.f32.mrf.mxu1 }
 0x35c   : > { %v4695_v12 = vpop.eup %4694  ;;  %v1590_v13 = vpack.c.bf16 %v4693_v8, %v4693_v8  ;;  %4710 = vtanh.f32 %v1484_v5  ;;  %v1488_v16 = vadd.f32 %v1487_v10, %v5680_v20  ;;  %v1438_v43 = vpop.f32.mrf.mxu0  ;;  %v1633_v27 = vsel %vm515_vm0, %v1589_v3, 0 }
 0x35d   : > { %v4697_v17 = vpop.eup %4696  ;;  %v1592_v18 = vpack.c.bf16 %v4695_v12, %v4695_v12  ;;  %4712 = vtanh.f32 %v1437_v9  ;;  %v1439_v21 = vadd.f32 %v1438_v43, %v5680_v20  ;;  %v1489_v22 = vpop.f32.mrf.mxu1  ;;  %v1639_v50 = vsel %vm515_vm0, %v1591_v15, 0 }
 0x35e   : > { %v4699_v23 = vpop.eup %4698  ;;  %4714 = vtanh.f32 %v1488_v16  ;;  %v1490_v25 = vadd.f32 %v1489_v22, %v5680_v20  ;;  %v1440_v26 = vpop.f32.mrf.mxu0  ;;  %4296 = vmatprep.subr.msk.bf16.mxu1 %vm515_vm0, %v1590_v13  ;;  %v1582_v31 = vpack.c.bf16 %v4687_v59, %v4697_v17 }
 0x35f   : > { %v4701_v29 = vpop.eup %4700  ;;  %4716 = vtanh.f32 %v1439_v21  ;;  %4299 = vmatprep.subr.msk.bf16.mxu0 %vm515_vm0, %v1592_v18  ;;  %1675 = vmatpush1.bf16.msra.mxu1 %v1633_v27  ;;  %v1491_v0 = vpop.f32.mrf.mxu1 }
 0x360   : > { %v4703_v1 = vpop.eup %4702  ;;  %4718 = vtanh.f32 %v1490_v25  ;;  %v1441_v33 = vpop.f32.mrf.mxu0  ;;  %1726 = vmatpush1.bf16.msra.mxu0 %v1639_v50  ;;  %1676 = vmatprep.subr.bf16.mxu1 %v1580_v28 }
 0x361   : > { %v4705_v37 = vpop.eup %4704  ;;  %4720 = vtanh.f32 %v1480_v14  ;;  %1727 = vmatprep.subr.bf16.mxu0 %v1582_v31  ;;  %v1579_v38 = vpack.c.bf16 %v4699_v23, %v4703_v1  ;;  %v1492_v40 = vpop.f32.mrf.mxu1 }
 0x362   : > { %4722 = vtanh.f32 %v1431_v49  ;;  %v1528_v41 = vpop.f32.mrf.mxu0  ;;  %v1581_v42 = vpack.c.bf16 %v4701_v29, %v4705_v37  ;;  %v5768_v1 = vpop.permute.xlu0 %1605 }
 0x363   : > { %4724 = vtanh.f32 %v1482_v30  ;;  %1677 = vmatpush1.bf16.msra.mxu1 %v1579_v38  ;;  %v1529_v10 = vadd.f32 %v1528_v41, %v5682_v24  ;;  %v5766_v30 = vpop.permute.xlu1 %1615 }
 0x364   : > { %4726 = vtanh.f32 %v1427_v32  ;;  %v1530_v46 = vpop.f32.mrf.mxu0  ;;  %1728 = vmatpush1.bf16.msra.mxu0 %v1581_v42  ;;  %v4707_v48 = vpop.eup %4706 }
 0x365   : > { %4728 = vtanh.f32 %v1478_v36  ;;  %v1531_v19 = vadd.f32 %v1530_v46, %v5682_v24 }
 0x366   : > { %v1532_v47 = vpop.f32.mrf.mxu0  ;;  %4297 = vmatmul.mubr.msk.bf16.vlgmr.msra.gmra.mxu1 %vm508_vm1, %v5717_v45 }
 0x367   : > { %4300 = vmatmul.mubr.msk.bf16.vlgmr.msra.gmra.mxu0 %vm508_vm1, %v5717_v45  ;;  %1704 = vmatprep.mubr.bf16.mxu1 %v5164_v2  ;;  %v1533_v5 = vadd.f32 %v1532_v47, %v5685_v44  ;;  %v5771_v38 = vpop.permute.xlu1 %1610 }
 0x368   : > { %v4709_v51 = vpop.eup %4708  ;;  %v1534_v39 = vpop.f32.mrf.mxu0  ;;  %1755 = vmatprep.mubr.bf16.mxu0 %v5164_v2 }
 0x369   : > { %v4711_v61 = vpop.eup %4710  ;;  %v1535_v52 = vadd.f32 %v1534_v39, %v5685_v44  ;;  %v1584_v9 = vpack.c.bf16 %v4709_v51, %v4707_v48 }
 0x36a   : > { %v4713_v7 = vpop.eup %4712  ;;  %v1538_v53 = vpop.f32.mrf.mxu0 }
 0x36b   : > { %v4715_v4 = vpop.eup %4714  ;;  %v1593_v55 = vpack.c.bf16 %v4713_v7, %v4713_v7  ;;  %v1539_v56 = vadd.f32 %v1538_v53, %v5680_v20 }
 0x36c   : > { %v4717_v57 = vpop.eup %4716  ;;  %v1595_v58 = vpack.c.bf16 %v4715_v4, %v4715_v4  ;;  %v1540_v59 = vpop.f32.mrf.mxu0 }
 0x36d   : > { %v4719_v11 = vpop.eup %4718  ;;  %v1594_v60 = vpack.c.bf16 %v4717_v57, %v4717_v57  ;;  %4730 = vtanh.f32 %v1539_v56  ;;  %v1541_v62 = vadd.f32 %v1540_v59, %v5680_v20  ;;  %v1645_v15 = vsel %vm515_vm0, %v1593_v55, 0 }
 0x36e   : > { %v4721_v63 = vpop.eup %4720  ;;  %v1596_v3 = vpack.c.bf16 %v4719_v11, %v4719_v11  ;;  %4732 = vtanh.f32 %v1535_v52  ;;  %v1542_v6 = vpop.f32.mrf.mxu0  ;;  %4298 = vmatmul.mubr.msk.bf16.gmra.mxu1 %vm508_vm1, %v5729_v54  ;;  %v1651_v12 = vsel %vm515_vm0, %v1595_v58, 0 }
 0x36f   : > { %v4723_v8 = vpop.eup %4722  ;;  %4734 = vtanh.f32 %v1541_v62  ;;  %4301 = vmatmul.mubr.msk.bf16.gmra.mxu0 %vm508_vm1, %v5729_v54  ;;  %4302 = vmatprep.subr.msk.bf16.mxu1 %vm515_vm0, %v1594_v60  ;;  %v1586_v13 = vpack.c.bf16 %v4711_v61, %v4721_v63 }
 0x370   : > { %v4725_v20 = vpop.eup %4724  ;;  %4305 = vmatprep.subr.msk.bf16.mxu0 %vm515_vm0, %v1596_v3  ;;  %v1543_v44 = vpop.f32.mrf.mxu0  ;;  %1777 = vmatpush1.bf16.msra.mxu1 %v1645_v15  ;;  %4736 = vtanh.f32 %v1531_v19 }
 0x371   : > { %v4727_v14 = vpop.eup %4726  ;;  %1828 = vmatpush1.bf16.msra.mxu0 %v1651_v12  ;;  %1778 = vmatprep.subr.bf16.mxu1 %v1584_v9  ;;  %4738 = vtanh.f32 %v1533_v5 }
 0x372   : > { %v4729_v16 = vpop.eup %4728  ;;  %1829 = vmatprep.subr.bf16.mxu0 %v1586_v13  ;;  %v1583_v43 = vpack.c.bf16 %v4723_v8, %v4727_v14  ;;  %1796 = vmatprep.mubr.bf16.mxu1 %v5164_v2  ;;  %4740 = vtanh.f32 %v1529_v10 }
 0x373   : > { %v1585_v17 = vpack.c.bf16 %v4725_v20, %v4729_v16  ;;  %1847 = vmatprep.mubr.bf16.mxu0 %v5164_v2 }
 0x374   : > { %1779 = vmatpush1.bf16.msra.mxu1 %v1583_v43 }
 0x375   : > { %1830 = vmatpush1.bf16.msra.mxu0 %v1585_v17 }
 0x377   : > { %4303 = vmatmul.mubr.msk.bf16.vlgmr.msra.gmra.mxu1 %vm508_vm1, %v5717_v45 }
 0x378   : > { %4306 = vmatmul.mubr.msk.bf16.vlgmr.msra.gmra.mxu0 %vm508_vm1, %v5717_v45  ;;  %1806 = vmatprep.mubr.bf16.mxu1 %v5164_v2 }
 0x379   : > { %1857 = vmatprep.mubr.bf16.mxu0 %v5164_v2 }
 0x37a   : > { %v4731_v24 = vpop.eup %4730 }
 0x37b   : > { %v4733_v18 = vpop.eup %4732  ;;  %v1597_v49 = vpack.c.bf16 %v4731_v24, %v4731_v24 }
 0x37c   : > { %v4735_v21 = vpop.eup %4734 }
 0x37d   : > { %v1598_v22 = vpack.c.bf16 %v4735_v21, %v4735_v21  ;;  %v4737_v23 = vpop.eup %4736  ;;  %v1657_v26 = vsel %vm515_vm0, %v1597_v49, 0 }
 0x37e   : > { %v4739_v25 = vpop.eup %4738  ;;  %v1588_v27 = vpack.c.bf16 %v4733_v18, %v4737_v23 }
 0x37f   : > { %4304 = vmatmul.mubr.msk.bf16.gmra.mxu1 %vm508_vm1, %v5729_v54  ;;  %4308 = vmatprep.subr.msk.bf16.mxu1 %vm515_vm0, %v1598_v22  ;;  %v4741_v28 = vpop.eup %4740 }
 0x380   : > { %4307 = vmatmul.mubr.msk.bf16.gmra.mxu0 %vm508_vm1, %v5729_v54  ;;  %1879 = vmatpush1.bf16.msra.mxu1 %v1657_v26  ;;  %v1587_v29 = vpack.c.bf16 %v4739_v25, %v4741_v28 }
 0x381   : > { %1880 = vmatprep.subr.bf16.mxu1 %v1588_v27  ;;  %1898 = vmatprep.mubr.bf16.mxu1 %v5164_v2 }
 0x382   : > { %2066 = vmatprep.mubr.bf16.mxu0 %v5164_v2 }
 0x384   : > { %1881 = vmatpush1.bf16.msra.mxu1 %v1587_v29 }
 0x387   : > { %4309 = vmatmul.mubr.msk.bf16.vlgmr.msra.gmra.mxu1 %vm508_vm1, %v5717_v45 }
 0x388   : > { %1908 = vmatprep.mubr.bf16.mxu1 %v5164_v2 }
 0x38f   : > { %4310 = vmatmul.mubr.msk.bf16.gmra.mxu1 %vm508_vm1, %v5729_v54 }
 0x390   : > { %2117 = vmatprep.mubr.bf16.mxu1 %v5164_v2 }
 0x426   : > { %v1696_v50 = vpop.f32.mrf.mxu1 }
 0x427   : > { %v1747_v31 = vpop.f32.mrf.mxu0  ;;  %v1697_v57 = vadd.f32 %v1696_v50, %v5768_v1 }
 0x428   : > { %v1698_v0 = vpop.f32.mrf.mxu1  ;;  %v1748_v59 = vadd.f32 %v1747_v31, %v5768_v1 }
 0x429   : > { %v1749_v32 = vpop.f32.mrf.mxu0  ;;  %v1699_v33 = vadd.f32 %v1698_v0, %v5768_v1 }
 0x42a   : > { %v1700_v37 = vpop.f32.mrf.mxu1  ;;  %v1750_v61 = vadd.f32 %v1749_v32, %v5768_v1 }
 0x42b   : > { %v1751_v36 = vpop.f32.mrf.mxu0  ;;  %4742 = vtanh.f32 %v1699_v33  ;;  %v1701_v53 = vadd.f32 %v1700_v37, %v5771_v38 }
 0x42c   : > { %v1702_v40 = vpop.f32.mrf.mxu1  ;;  %v1752_v55 = vadd.f32 %v1751_v36, %v5771_v38 }
 0x42d   : > { %v1703_v41 = vadd.f32 %v1702_v40, %v5771_v38  ;;  %v1753_v42 = vpop.f32.mrf.mxu0 }
 0x42e   : > { %v1754_v45 = vadd.f32 %v1753_v42, %v5771_v38  ;;  %v1706_v46 = vpop.f32.mrf.mxu1 }
 0x42f   : > { %4744 = vtanh.f32 %v1703_v41  ;;  %v1707_v47 = vadd.f32 %v1706_v46, %v5766_v30  ;;  %v1757_v48 = vpop.f32.mrf.mxu0 }
 0x430   : > { %4746 = vtanh.f32 %v1754_v45  ;;  %v1758_v51 = vadd.f32 %v1757_v48, %v5766_v30  ;;  %v1708_v39 = vpop.f32.mrf.mxu1 }
 0x431   : > { %4748 = vtanh.f32 %v1707_v47  ;;  %v1709_v7 = vadd.f32 %v1708_v39, %v5766_v30  ;;  %v1759_v52 = vpop.f32.mrf.mxu0 }
 0x432   : > { %4750 = vtanh.f32 %v1758_v51  ;;  %v1760_v54 = vadd.f32 %v1759_v52, %v5766_v30  ;;  %v1710_v4 = vpop.f32.mrf.mxu1 }
 0x433   : > { %4752 = vtanh.f32 %v1709_v7  ;;  %v1761_v56 = vpop.f32.mrf.mxu0  ;;  %v5803_v4 = vld [vmem:[%s6299_s3 + $0x30] sm:$0xff]  }
 0x434   : > { %4754 = vtanh.f32 %v1760_v54  ;;  %v1711_v58 = vpop.f32.mrf.mxu1 }
 0x435   : > { %4756 = vtanh.f32 %v1750_v61  ;;  %v1762_v11 = vpop.f32.mrf.mxu0 }
 0x436   : > { %4758 = vtanh.f32 %v1701_v53 }
 0x437   : > { %4760 = vtanh.f32 %v1752_v55  ;;  %v1798_v60 = vpop.f32.mrf.mxu1 }
 0x438   : > { %4762 = vtanh.f32 %v1697_v57  ;;  %v1849_v19 = vpop.f32.mrf.mxu0  ;;  %v4743_v3 = vpop.eup %4742  ;;  %v1799_v48 = vadd.f32 %v1798_v60, %v5768_v1 }
 0x439   : > { %4764 = vtanh.f32 %v1748_v59  ;;  %v1800_v62 = vpop.f32.mrf.mxu1  ;;  %v1850_v61 = vadd.f32 %v1849_v19, %v5768_v1 }
 0x43a   : > { %v1851_v63 = vpop.f32.mrf.mxu0  ;;  %v1801_v5 = vadd.f32 %v1800_v62, %v5768_v1 }
 0x43b   : > { %v1802_v6 = vpop.f32.mrf.mxu1  ;;  %v1852_v23 = vadd.f32 %v1851_v63, %v5768_v1  ;;  %v5815_v63 = vld [vmem:[%s6299_s3 + $0x38] ss:$0 sps:$4 sm:$0x33]  }
 0x43c   : > { %v4745_v8 = vpop.eup %4744  ;;  %v1853_v15 = vpop.f32.mrf.mxu0  ;;  %4766 = vtanh.f32 %v1801_v5  ;;  %v1803_v29 = vadd.f32 %v1802_v6, %v5771_v38 }
 0x43d   : > { %v4747_v9 = vpop.eup %4746  ;;  %v1804_v20 = vpop.f32.mrf.mxu1  ;;  %v1952_v36 = vpack.c.bf16 %v4745_v8, %v4743_v3  ;;  %v1854_v41 = vadd.f32 %v1853_v15, %v5771_v38 }
 0x43e   : > { %v4749_v10 = vpop.eup %4748  ;;  %v1805_v44 = vadd.f32 %v1804_v20, %v5771_v38  ;;  %v1855_v12 = vpop.f32.mrf.mxu0 }
 0x43f   : > { %v4751_v13 = vpop.eup %4750  ;;  %v1961_v14 = vpack.c.bf16 %v4749_v10, %v4749_v10  ;;  %v1856_v16 = vadd.f32 %v1855_v12, %v5771_v38  ;;  %v1808_v43 = vpop.f32.mrf.mxu1 }
 0x440   : > { %v4753_v17 = vpop.eup %4752  ;;  %v1963_v24 = vpack.c.bf16 %v4751_v13, %v4751_v13  ;;  %4768 = vtanh.f32 %v1805_v44  ;;  %v1809_v18 = vadd.f32 %v1808_v43, %v5766_v30  ;;  %v1859_v49 = vpop.f32.mrf.mxu0 }
 0x441   : > { %v4755_v21 = vpop.eup %4754  ;;  %v1962_v22 = vpack.c.bf16 %v4753_v17, %v4753_v17  ;;  %4770 = vtanh.f32 %v1856_v16  ;;  %v1860_v25 = vadd.f32 %v1859_v49, %v5766_v30  ;;  %v1810_v26 = vpop.f32.mrf.mxu1  ;;  %v2005_v37 = vsel %vm515_vm0, %v1961_v14, 0 }
 0x442   : > { %v4757_v27 = vpop.eup %4756  ;;  %v1964_v28 = vpack.c.bf16 %v4755_v21, %v4755_v21  ;;  %4772 = vtanh.f32 %v1809_v18  ;;  %v1811_v50 = vadd.f32 %v1810_v26, %v5766_v30  ;;  %v1861_v31 = vpop.f32.mrf.mxu0  ;;  %v2011_v42 = vsel %vm515_vm0, %v1963_v24, 0 }
 0x443   : > { %v4759_v0 = vpop.eup %4758  ;;  %4774 = vtanh.f32 %v1860_v25  ;;  %v1862_v32 = vadd.f32 %v1861_v31, %v5766_v30  ;;  %v1812_v33 = vpop.f32.mrf.mxu1  ;;  %4319 = vmatprep.subr.msk.bf16.mxu0 %vm515_vm0, %v1962_v22  ;;  %v1954_v45 = vpack.c.bf16 %v4747_v9, %v4757_v27 }
 0x444   : > { %v4761_v40 = vpop.eup %4760  ;;  %4776 = vtanh.f32 %v1811_v50  ;;  %4322 = vmatprep.subr.msk.bf16.mxu1 %vm515_vm0, %v1964_v28  ;;  %2047 = vmatpush1.bf16.msra.mxu0 %v2005_v37  ;;  %v1863_v46 = vpop.f32.mrf.mxu0 }
 0x445   : > { %v4763_v47 = vpop.eup %4762  ;;  %4778 = vtanh.f32 %v1862_v32  ;;  %v1813_v51 = vpop.f32.mrf.mxu1  ;;  %2098 = vmatpush1.bf16.msra.mxu1 %v2011_v42  ;;  %2048 = vmatprep.subr.bf16.mxu0 %v1952_v36 }
 0x446   : > { %v4765_v39 = vpop.eup %4764  ;;  %4780 = vtanh.f32 %v1852_v23  ;;  %2099 = vmatprep.subr.bf16.mxu1 %v1954_v45  ;;  %v1951_v7 = vpack.c.bf16 %v4759_v0, %v4763_v47  ;;  %v1864_v52 = vpop.f32.mrf.mxu0 }
 0x447   : > { %4782 = vtanh.f32 %v1803_v29  ;;  %v1900_v53 = vpop.f32.mrf.mxu1  ;;  %v1953_v54 = vpack.c.bf16 %v4761_v40, %v4765_v39  ;;  %v5854_v47 = vpop.permute.xlu1 %1977 }
 0x448   : > { %4784 = vtanh.f32 %v1854_v41  ;;  %2049 = vmatpush1.bf16.msra.mxu0 %v1951_v7  ;;  %v1901_v49 = vadd.f32 %v1900_v53, %v5768_v1  ;;  %v5852_v41 = vpop.permute.xlu0 %1987 }
 0x449   : > { %4786 = vtanh.f32 %v1799_v48  ;;  %v1902_v55 = vpop.f32.mrf.mxu1  ;;  %2100 = vmatpush1.bf16.msra.mxu1 %v1953_v54  ;;  %v4767_v57 = vpop.eup %4766 }
 0x44a   : > { %4788 = vtanh.f32 %v1850_v61  ;;  %v1903_v44 = vadd.f32 %v1902_v55, %v5768_v1 }
 0x44b   : > { %v1904_v56 = vpop.f32.mrf.mxu1  ;;  %4320 = vmatmul.mubr.msk.bf16.vlgmr.msra.gmra.mxu0 %vm508_vm1, %v5803_v4 }
 0x44c   : > { %4323 = vmatmul.mubr.msk.bf16.vlgmr.msra.gmra.mxu1 %vm508_vm1, %v5803_v4  ;;  %2076 = vmatprep.mubr.bf16.mxu0 %v5164_v2  ;;  %v1905_v16 = vadd.f32 %v1904_v56, %v5771_v38  ;;  %v5857_v7 = vpop.permute.xlu0 %1982 }
 0x44d   : > { %v4769_v58 = vpop.eup %4768  ;;  %v1906_v59 = vpop.f32.mrf.mxu1  ;;  %2127 = vmatprep.mubr.bf16.mxu1 %v5164_v2 }
 0x44e   : > { %v4771_v11 = vpop.eup %4770  ;;  %v1907_v19 = vadd.f32 %v1906_v59, %v5771_v38  ;;  %v1956_v18 = vpack.c.bf16 %v4769_v58, %v4767_v57 }
 0x44f   : > { %v4773_v60 = vpop.eup %4772  ;;  %v1910_v62 = vpop.f32.mrf.mxu1 }
 0x450   : > { %v4775_v3 = vpop.eup %4774  ;;  %v1965_v5 = vpack.c.bf16 %v4773_v60, %v4773_v60  ;;  %v1911_v6 = vadd.f32 %v1910_v62, %v5766_v30 }
 0x451   : > { %v4777_v8 = vpop.eup %4776  ;;  %v1967_v15 = vpack.c.bf16 %v4775_v3, %v4775_v3  ;;  %v1912_v9 = vpop.f32.mrf.mxu1 }
 0x452   : > { %v4779_v20 = vpop.eup %4778  ;;  %v1966_v10 = vpack.c.bf16 %v4777_v8, %v4777_v8  ;;  %4790 = vtanh.f32 %v1911_v6  ;;  %v1913_v12 = vadd.f32 %v1912_v9, %v5766_v30  ;;  %v2017_v24 = vsel %vm515_vm0, %v1965_v5, 0 }
 0x453   : > { %v4781_v13 = vpop.eup %4780  ;;  %v1968_v14 = vpack.c.bf16 %v4779_v20, %v4779_v20  ;;  %4792 = vtanh.f32 %v1907_v19  ;;  %v1914_v43 = vpop.f32.mrf.mxu1  ;;  %4321 = vmatmul.mubr.msk.bf16.gmra.mxu0 %vm508_vm1, %v5815_v63  ;;  %v2023_v21 = vsel %vm515_vm0, %v1967_v15, 0 }
 0x454   : > { %v4783_v17 = vpop.eup %4782  ;;  %4794 = vtanh.f32 %v1913_v12  ;;  %4324 = vmatmul.mubr.msk.bf16.gmra.mxu1 %vm508_vm1, %v5815_v63  ;;  %4325 = vmatprep.subr.msk.bf16.mxu0 %vm515_vm0, %v1966_v10  ;;  %v1958_v22 = vpack.c.bf16 %v4771_v11, %v4781_v13 }
 0x455   : > { %v4785_v30 = vpop.eup %4784  ;;  %4328 = vmatprep.subr.msk.bf16.mxu1 %vm515_vm0, %v1968_v14  ;;  %v1915_v38 = vpop.f32.mrf.mxu1  ;;  %2149 = vmatpush1.bf16.msra.mxu0 %v2017_v24  ;;  %4796 = vtanh.f32 %v1903_v44 }
 0x456   : > { %v4787_v23 = vpop.eup %4786  ;;  %2200 = vmatpush1.bf16.msra.mxu1 %v2023_v21  ;;  %2150 = vmatprep.subr.bf16.mxu0 %v1956_v18  ;;  %4798 = vtanh.f32 %v1905_v16 }
 0x457   : > { %v4789_v25 = vpop.eup %4788  ;;  %2201 = vmatprep.subr.bf16.mxu1 %v1958_v22  ;;  %v1955_v26 = vpack.c.bf16 %v4783_v17, %v4787_v23  ;;  %2168 = vmatprep.mubr.bf16.mxu0 %v5164_v2  ;;  %4800 = vtanh.f32 %v1901_v49 }
 0x458   : > { %v1957_v27 = vpack.c.bf16 %v4785_v30, %v4789_v25  ;;  %2219 = vmatprep.mubr.bf16.mxu1 %v5164_v2 }
 0x459   : > { %2151 = vmatpush1.bf16.msra.mxu0 %v1955_v26 }
 0x45a   : > { %2202 = vmatpush1.bf16.msra.mxu1 %v1957_v27 }
 0x45c   : > { %4326 = vmatmul.mubr.msk.bf16.vlgmr.msra.gmra.mxu0 %vm508_vm1, %v5803_v4 }
 0x45d   : > { %4329 = vmatmul.mubr.msk.bf16.vlgmr.msra.gmra.mxu1 %vm508_vm1, %v5803_v4  ;;  %2178 = vmatprep.mubr.bf16.mxu0 %v5164_v2 }
 0x45e   : > { %2229 = vmatprep.mubr.bf16.mxu1 %v5164_v2 }
 0x45f   : > { %v4791_v1 = vpop.eup %4790 }
 0x460   : > { %v4793_v28 = vpop.eup %4792  ;;  %v1969_v29 = vpack.c.bf16 %v4791_v1, %v4791_v1 }
 0x461   : > { %v4795_v50 = vpop.eup %4794 }
 0x462   : > { %v1970_v31 = vpack.c.bf16 %v4795_v50, %v4795_v50  ;;  %v4797_v0 = vpop.eup %4796  ;;  %v2029_v33 = vsel %vm515_vm0, %v1969_v29, 0 }
 0x463   : > { %v4799_v32 = vpop.eup %4798  ;;  %v1960_v37 = vpack.c.bf16 %v4793_v28, %v4797_v0 }
 0x464   : > { %4327 = vmatmul.mubr.msk.bf16.gmra.mxu0 %vm508_vm1, %v5815_v63  ;;  %4331 = vmatprep.subr.msk.bf16.mxu0 %vm515_vm0, %v1970_v31  ;;  %v4801_v36 = vpop.eup %4800 }
 0x465   : > { %4330 = vmatmul.mubr.msk.bf16.gmra.mxu1 %vm508_vm1, %v5815_v63  ;;  %2251 = vmatpush1.bf16.msra.mxu0 %v2029_v33  ;;  %v1959_v40 = vpack.c.bf16 %v4799_v32, %v4801_v36 }
 0x466   : > { %2252 = vmatprep.subr.bf16.mxu0 %v1960_v37  ;;  %2270 = vmatprep.mubr.bf16.mxu0 %v5164_v2 }
 0x467   : > { %2438 = vmatprep.mubr.bf16.mxu1 %v5164_v2 }
 0x469   : > { %2253 = vmatpush1.bf16.msra.mxu0 %v1959_v40 }
 0x46c   : > { %4332 = vmatmul.mubr.msk.bf16.vlgmr.msra.gmra.mxu0 %vm508_vm1, %v5803_v4 }
 0x46d   : > { %2280 = vmatprep.mubr.bf16.mxu0 %v5164_v2 }
 0x474   : > { %4333 = vmatmul.mubr.msk.bf16.gmra.mxu0 %vm508_vm1, %v5815_v63 }
 0x475   : > { %2489 = vmatprep.mubr.bf16.mxu0 %v5164_v2 }
 0x50b   : > { %v2068_v42 = vpop.f32.mrf.mxu0 }
 0x50c   : > { %v2119_v45 = vpop.f32.mrf.mxu1  ;;  %v2069_v8 = vadd.f32 %v2068_v42, %v5854_v47 }
 0x50d   : > { %v2070_v46 = vpop.f32.mrf.mxu0  ;;  %v2120_v9 = vadd.f32 %v2119_v45, %v5854_v47 }
 0x50e   : > { %v2121_v48 = vpop.f32.mrf.mxu1  ;;  %v2071_v51 = vadd.f32 %v2070_v46, %v5854_v47 }
 0x50f   : > { %v2072_v39 = vpop.f32.mrf.mxu0  ;;  %v2122_v11 = vadd.f32 %v2121_v48, %v5854_v47 }
 0x510   : > { %v2123_v61 = vpop.f32.mrf.mxu1  ;;  %4802 = vtanh.f32 %v2071_v51  ;;  %v2073_v62 = vadd.f32 %v2072_v39, %v5857_v7 }
 0x511   : > { %v2074_v52 = vpop.f32.mrf.mxu0  ;;  %v2124_v5 = vadd.f32 %v2123_v61, %v5857_v7 }
 0x512   : > { %v2075_v53 = vadd.f32 %v2074_v52, %v5857_v7  ;;  %v2125_v54 = vpop.f32.mrf.mxu1 }
 0x513   : > { %v2126_v4 = vadd.f32 %v2125_v54, %v5857_v7  ;;  %v2078_v55 = vpop.f32.mrf.mxu0 }
 0x514   : > { %4804 = vtanh.f32 %v2075_v53  ;;  %v2079_v56 = vadd.f32 %v2078_v55, %v5852_v41  ;;  %v2129_v57 = vpop.f32.mrf.mxu1 }
 0x515   : > { %4806 = vtanh.f32 %v2126_v4  ;;  %v2130_v58 = vadd.f32 %v2129_v57, %v5852_v41  ;;  %v2080_v59 = vpop.f32.mrf.mxu0 }
 0x516   : > { %4808 = vtanh.f32 %v2079_v56  ;;  %v2081_v60 = vadd.f32 %v2080_v59, %v5852_v41  ;;  %v2131_v19 = vpop.f32.mrf.mxu1 }
 0x517   : > { %4810 = vtanh.f32 %v2130_v58  ;;  %v2132_v63 = vadd.f32 %v2131_v19, %v5852_v41  ;;  %v2082_v3 = vpop.f32.mrf.mxu0 }
 0x518   : > { %4812 = vtanh.f32 %v2081_v60  ;;  %v2133_v6 = vpop.f32.mrf.mxu1  ;;  %v5889_v3 = vld [vmem:[%s6299_s3 + $0x3c] sm:$0xff]  }
 0x519   : > { %4814 = vtanh.f32 %v2132_v63  ;;  %v2083_v15 = vpop.f32.mrf.mxu0 }
 0x51a   : > { %4816 = vtanh.f32 %v2122_v11  ;;  %v2134_v20 = vpop.f32.mrf.mxu1 }
 0x51b   : > { %4818 = vtanh.f32 %v2073_v62 }
 0x51c   : > { %4820 = vtanh.f32 %v2124_v5  ;;  %v2170_v10 = vpop.f32.mrf.mxu0 }
 0x51d   : > { %4822 = vtanh.f32 %v2069_v8  ;;  %v2221_v44 = vpop.f32.mrf.mxu1  ;;  %v4803_v14 = vpop.eup %4802  ;;  %v2171_v57 = vadd.f32 %v2170_v10, %v5854_v47 }
 0x51e   : > { %4824 = vtanh.f32 %v2120_v9  ;;  %v2172_v12 = vpop.f32.mrf.mxu0  ;;  %v2222_v11 = vadd.f32 %v2221_v44, %v5854_v47 }
 0x51f   : > { %v2223_v13 = vpop.f32.mrf.mxu1  ;;  %v2173_v16 = vadd.f32 %v2172_v12, %v5854_v47 }
 0x520   : > { %v2174_v43 = vpop.f32.mrf.mxu0  ;;  %v2224_v0 = vadd.f32 %v2223_v13, %v5854_v47  ;;  %v5901_v13 = vld [vmem:[%s6299_s3 + $0x44] ss:$0 sps:$4 sm:$0x33]  }
 0x521   : > { %v4805_v17 = vpop.eup %4804  ;;  %v2225_v24 = vpop.f32.mrf.mxu1  ;;  %4826 = vtanh.f32 %v2173_v16  ;;  %v2175_v40 = vadd.f32 %v2174_v43, %v5857_v7 }
 0x522   : > { %v4807_v18 = vpop.eup %4806  ;;  %v2176_v30 = vpop.f32.mrf.mxu0  ;;  %v2324_v61 = vpack.c.bf16 %v4805_v17, %v4803_v14  ;;  %v2226_v53 = vadd.f32 %v2225_v24, %v5857_v7 }
 0x523   : > { %v4809_v49 = vpop.eup %4808  ;;  %v2177_v38 = vadd.f32 %v2176_v30, %v5857_v7  ;;  %v2227_v21 = vpop.f32.mrf.mxu1 }
 0x524   : > { %v4811_v22 = vpop.eup %4810  ;;  %v2333_v23 = vpack.c.bf16 %v4809_v49, %v4809_v49  ;;  %v2228_v25 = vadd.f32 %v2227_v21, %v5857_v7  ;;  %v2180_v26 = vpop.f32.mrf.mxu0 }
 0x525   : > { %v4813_v27 = vpop.eup %4812  ;;  %v2335_v1 = vpack.c.bf16 %v4811_v22, %v4811_v22  ;;  %4828 = vtanh.f32 %v2177_v38  ;;  %v2181_v28 = vadd.f32 %v2180_v26, %v5852_v41  ;;  %v2231_v29 = vpop.f32.mrf.mxu1 }
 0x526   : > { %v4815_v50 = vpop.eup %4814  ;;  %v2334_v31 = vpack.c.bf16 %v4813_v27, %v4813_v27  ;;  %4830 = vtanh.f32 %v2228_v25  ;;  %v2232_v32 = vadd.f32 %v2231_v29, %v5852_v41  ;;  %v2182_v33 = vpop.f32.mrf.mxu0  ;;  %v2377_v39 = vsel %vm515_vm0, %v2333_v23, 0 }
 0x527   : > { %v4817_v37 = vpop.eup %4816  ;;  %v2336_v36 = vpack.c.bf16 %v4815_v50, %v4815_v50  ;;  %4832 = vtanh.f32 %v2181_v28  ;;  %v2183_v42 = vadd.f32 %v2182_v33, %v5852_v41  ;;  %v2233_v45 = vpop.f32.mrf.mxu1  ;;  %v2383_v54 = vsel %vm515_vm0, %v2335_v1, 0 }
 0x528   : > { %v4819_v46 = vpop.eup %4818  ;;  %4834 = vtanh.f32 %v2232_v32  ;;  %v2234_v48 = vadd.f32 %v2233_v45, %v5852_v41  ;;  %v2184_v51 = vpop.f32.mrf.mxu0  ;;  %4342 = vmatprep.subr.msk.bf16.mxu1 %vm515_vm0, %v2334_v31  ;;  %v2326_v4 = vpack.c.bf16 %v4807_v18, %v4817_v37 }
 0x529   : > { %v4821_v52 = vpop.eup %4820  ;;  %4836 = vtanh.f32 %v2183_v42  ;;  %4345 = vmatprep.subr.msk.bf16.mxu0 %vm515_vm0, %v2336_v36  ;;  %2419 = vmatpush1.bf16.msra.mxu1 %v2377_v39  ;;  %v2235_v55 = vpop.f32.mrf.mxu1 }
 0x52a   : > { %v4823_v56 = vpop.eup %4822  ;;  %4838 = vtanh.f32 %v2234_v48  ;;  %v2185_v58 = vpop.f32.mrf.mxu0  ;;  %2470 = vmatpush1.bf16.msra.mxu0 %v2383_v54  ;;  %2420 = vmatprep.subr.bf16.mxu1 %v2324_v61 }
 0x52b   : > { %v4825_v59 = vpop.eup %4824  ;;  %4840 = vtanh.f32 %v2224_v0  ;;  %2471 = vmatprep.subr.bf16.mxu0 %v2326_v4  ;;  %v2323_v60 = vpack.c.bf16 %v4819_v46, %v4823_v56  ;;  %v2236_v19 = vpop.f32.mrf.mxu1 }
 0x52c   : > { %4842 = vtanh.f32 %v2175_v40  ;;  %v2272_v62 = vpop.f32.mrf.mxu0  ;;  %v2325_v63 = vpack.c.bf16 %v4821_v52, %v4825_v59  ;;  %v5940_v56 = vpop.permute.xlu0 %2349 }
 0x52d   : > { %4844 = vtanh.f32 %v2226_v53  ;;  %2421 = vmatpush1.bf16.msra.mxu1 %v2323_v60  ;;  %v2273_v29 = vadd.f32 %v2272_v62, %v5854_v47  ;;  %v5938_v53 = vpop.permute.xlu1 %2359 }
 0x52e   : > { %4846 = vtanh.f32 %v2171_v57  ;;  %v2274_v5 = vpop.f32.mrf.mxu0  ;;  %2472 = vmatpush1.bf16.msra.mxu0 %v2325_v63  ;;  %v4827_v8 = vpop.eup %4826 }
 0x52f   : > { %4848 = vtanh.f32 %v2222_v11  ;;  %v2275_v38 = vadd.f32 %v2274_v5, %v5854_v47 }
 0x530   : > { %v2276_v6 = vpop.f32.mrf.mxu0  ;;  %4343 = vmatmul.mubr.msk.bf16.vlgmr.msra.gmra.mxu1 %vm508_vm1, %v5889_v3 }
 0x531   : > { %4346 = vmatmul.mubr.msk.bf16.vlgmr.msra.gmra.mxu0 %vm508_vm1, %v5889_v3  ;;  %2448 = vmatprep.mubr.bf16.mxu1 %v5164_v2  ;;  %v2277_v25 = vadd.f32 %v2276_v6, %v5857_v7  ;;  %v5943_v60 = vpop.permute.xlu1 %2354 }
 0x532   : > { %v4829_v15 = vpop.eup %4828  ;;  %v2278_v9 = vpop.f32.mrf.mxu0  ;;  %2499 = vmatprep.mubr.bf16.mxu0 %v5164_v2 }
 0x533   : > { %v4831_v20 = vpop.eup %4830  ;;  %v2279_v44 = vadd.f32 %v2278_v9, %v5857_v7  ;;  %v2328_v28 = vpack.c.bf16 %v4829_v15, %v4827_v8 }
 0x534   : > { %v4833_v10 = vpop.eup %4832  ;;  %v2282_v12 = vpop.f32.mrf.mxu0 }
 0x535   : > { %v4835_v14 = vpop.eup %4834  ;;  %v2337_v16 = vpack.c.bf16 %v4833_v10, %v4833_v10  ;;  %v2283_v43 = vadd.f32 %v2282_v12, %v5852_v41 }
 0x536   : > { %v4837_v17 = vpop.eup %4836  ;;  %v2339_v24 = vpack.c.bf16 %v4835_v14, %v4835_v14  ;;  %v2284_v18 = vpop.f32.mrf.mxu0 }
 0x537   : > { %v4839_v30 = vpop.eup %4838  ;;  %v2338_v49 = vpack.c.bf16 %v4837_v17, %v4837_v17  ;;  %4850 = vtanh.f32 %v2283_v43  ;;  %v2285_v21 = vadd.f32 %v2284_v18, %v5852_v41  ;;  %v2389_v1 = vsel %vm515_vm0, %v2337_v16, 0 }
 0x538   : > { %v4841_v22 = vpop.eup %4840  ;;  %v2340_v23 = vpack.c.bf16 %v4839_v30, %v4839_v30  ;;  %4852 = vtanh.f32 %v2279_v44  ;;  %v2286_v26 = vpop.f32.mrf.mxu0  ;;  %4344 = vmatmul.mubr.msk.bf16.gmra.mxu1 %vm508_vm1, %v5901_v13  ;;  %v2395_v50 = vsel %vm515_vm0, %v2339_v24, 0 }
 0x539   : > { %v4843_v27 = vpop.eup %4842  ;;  %4854 = vtanh.f32 %v2285_v21  ;;  %4347 = vmatmul.mubr.msk.bf16.gmra.mxu0 %vm508_vm1, %v5901_v13  ;;  %4348 = vmatprep.subr.msk.bf16.mxu1 %vm515_vm0, %v2338_v49  ;;  %v2330_v31 = vpack.c.bf16 %v4831_v20, %v4841_v22 }
 0x53a   : > { %v4845_v41 = vpop.eup %4844  ;;  %4351 = vmatprep.subr.msk.bf16.mxu0 %vm515_vm0, %v2340_v23  ;;  %v2287_v7 = vpop.f32.mrf.mxu0  ;;  %2521 = vmatpush1.bf16.msra.mxu1 %v2389_v1  ;;  %4856 = vtanh.f32 %v2275_v38 }
 0x53b   : > { %v4847_v0 = vpop.eup %4846  ;;  %2572 = vmatpush1.bf16.msra.mxu0 %v2395_v50  ;;  %2522 = vmatprep.subr.bf16.mxu1 %v2328_v28  ;;  %4858 = vtanh.f32 %v2277_v25 }
 0x53c   : > { %v4849_v32 = vpop.eup %4848  ;;  %2573 = vmatprep.subr.bf16.mxu0 %v2330_v31  ;;  %v2327_v33 = vpack.c.bf16 %v4843_v27, %v4847_v0  ;;  %2540 = vmatprep.mubr.bf16.mxu1 %v5164_v2  ;;  %4860 = vtanh.f32 %v2273_v29 }
 0x53d   : > { %v2329_v37 = vpack.c.bf16 %v4845_v41, %v4849_v32  ;;  %2591 = vmatprep.mubr.bf16.mxu0 %v5164_v2 }
 0x53e   : > { %2523 = vmatpush1.bf16.msra.mxu1 %v2327_v33 }
 0x53f   : > { %2574 = vmatpush1.bf16.msra.mxu0 %v2329_v37 }
 0x541   : > { %4349 = vmatmul.mubr.msk.bf16.vlgmr.msra.gmra.mxu1 %vm508_vm1, %v5889_v3 }
 0x542   : > { %4352 = vmatmul.mubr.msk.bf16.vlgmr.msra.gmra.mxu0 %vm508_vm1, %v5889_v3  ;;  %2550 = vmatprep.mubr.bf16.mxu1 %v5164_v2 }
 0x543   : > { %2601 = vmatprep.mubr.bf16.mxu0 %v5164_v2 }
 0x544   : > { %v4851_v47 = vpop.eup %4850 }
 0x545   : > { %v4853_v36 = vpop.eup %4852  ;;  %v2341_v40 = vpack.c.bf16 %v4851_v47, %v4851_v47 }
 0x546   : > { %v4855_v42 = vpop.eup %4854 }
 0x547   : > { %v2342_v45 = vpack.c.bf16 %v4855_v42, %v4855_v42  ;;  %v4857_v46 = vpop.eup %4856  ;;  %v2401_v51 = vsel %vm515_vm0, %v2341_v40, 0 }
 0x548   : > { %v4859_v48 = vpop.eup %4858  ;;  %v2332_v39 = vpack.c.bf16 %v4853_v36, %v4857_v46 }
 0x549   : > { %4350 = vmatmul.mubr.msk.bf16.gmra.mxu1 %vm508_vm1, %v5901_v13  ;;  %4354 = vmatprep.subr.msk.bf16.mxu1 %vm515_vm0, %v2342_v45  ;;  %v4861_v61 = vpop.eup %4860 }
 0x54a   : > { %4353 = vmatmul.mubr.msk.bf16.gmra.mxu0 %vm508_vm1, %v5901_v13  ;;  %2623 = vmatpush1.bf16.msra.mxu1 %v2401_v51  ;;  %v2331_v52 = vpack.c.bf16 %v4859_v48, %v4861_v61 }
 0x54b   : > { %2624 = vmatprep.subr.bf16.mxu1 %v2332_v39  ;;  %2642 = vmatprep.mubr.bf16.mxu1 %v5164_v2 }
 0x54c   : > { %2810 = vmatprep.mubr.bf16.mxu0 %v5164_v2 }
 0x54e   : > { %2625 = vmatpush1.bf16.msra.mxu1 %v2331_v52 }
 0x551   : > { %4355 = vmatmul.mubr.msk.bf16.vlgmr.msra.gmra.mxu1 %vm508_vm1, %v5889_v3 }
 0x552   : > { %2652 = vmatprep.mubr.bf16.mxu1 %v5164_v2 }
 0x559   : > { %4356 = vmatmul.mubr.msk.bf16.gmra.mxu1 %vm508_vm1, %v5901_v13 }
 0x55a   : > { %2861 = vmatprep.mubr.bf16.mxu1 %v5164_v2 }
 0x5f0   : > { %v2440_v54 = vpop.f32.mrf.mxu1 }
 0x5f1   : > { %v2491_v4 = vpop.f32.mrf.mxu0  ;;  %v2441_v17 = vadd.f32 %v2440_v54, %v5940_v56 }
 0x5f2   : > { %v2442_v55 = vpop.f32.mrf.mxu1  ;;  %v2492_v18 = vadd.f32 %v2491_v4, %v5940_v56 }
 0x5f3   : > { %v2493_v57 = vpop.f32.mrf.mxu0  ;;  %v2443_v58 = vadd.f32 %v2442_v55, %v5940_v56 }
 0x5f4   : > { %v2444_v59 = vpop.f32.mrf.mxu1  ;;  %v2494_v20 = vadd.f32 %v2493_v57, %v5940_v56 }
 0x5f5   : > { %v2495_v11 = vpop.f32.mrf.mxu0  ;;  %4862 = vtanh.f32 %v2443_v58  ;;  %v2445_v12 = vadd.f32 %v2444_v59, %v5943_v60 }
 0x5f6   : > { %v2446_v19 = vpop.f32.mrf.mxu1  ;;  %v2496_v16 = vadd.f32 %v2495_v11, %v5943_v60 }
 0x5f7   : > { %v2447_v62 = vadd.f32 %v2446_v19, %v5943_v60  ;;  %v2497_v63 = vpop.f32.mrf.mxu0 }
 0x5f8   : > { %v2498_v3 = vadd.f32 %v2497_v63, %v5943_v60  ;;  %v2450_v5 = vpop.f32.mrf.mxu1 }
 0x5f9   : > { %4864 = vtanh.f32 %v2447_v62  ;;  %v2451_v6 = vadd.f32 %v2450_v5, %v5938_v53  ;;  %v2501_v8 = vpop.f32.mrf.mxu0 }
 0x5fa   : > { %4866 = vtanh.f32 %v2498_v3  ;;  %v2502_v15 = vadd.f32 %v2501_v8, %v5938_v53  ;;  %v2452_v9 = vpop.f32.mrf.mxu1 }
 0x5fb   : > { %4868 = vtanh.f32 %v2451_v6  ;;  %v2453_v10 = vadd.f32 %v2452_v9, %v5938_v53  ;;  %v2503_v44 = vpop.f32.mrf.mxu0 }
 0x5fc   : > { %4870 = vtanh.f32 %v2502_v15  ;;  %v2504_v13 = vadd.f32 %v2503_v44, %v5938_v53  ;;  %v2454_v14 = vpop.f32.mrf.mxu1 }
 0x5fd   : > { %4872 = vtanh.f32 %v2453_v10  ;;  %v2505_v43 = vpop.f32.mrf.mxu0  ;;  %v5975_v14 = vld [vmem:[%s6299_s3 + $0x48] sm:$0xff]  }
 0x5fe   : > { %4874 = vtanh.f32 %v2504_v13  ;;  %v2455_v24 = vpop.f32.mrf.mxu1 }
 0x5ff   : > { %4876 = vtanh.f32 %v2494_v20  ;;  %v2506_v30 = vpop.f32.mrf.mxu0 }
 0x600   : > { %4878 = vtanh.f32 %v2445_v12 }
 0x601   : > { %4880 = vtanh.f32 %v2496_v16  ;;  %v2542_v49 = vpop.f32.mrf.mxu1 }
 0x602   : > { %4882 = vtanh.f32 %v2441_v17  ;;  %v2593_v38 = vpop.f32.mrf.mxu0  ;;  %v4863_v23 = vpop.eup %4862  ;;  %v2543_v8 = vadd.f32 %v2542_v49, %v5940_v56 }
 0x603   : > { %4884 = vtanh.f32 %v2492_v18  ;;  %v2544_v21 = vpop.f32.mrf.mxu1  ;;  %v2594_v20 = vadd.f32 %v2593_v38, %v5940_v56 }
 0x604   : > { %v2595_v22 = vpop.f32.mrf.mxu0  ;;  %v2545_v25 = vadd.f32 %v2544_v21, %v5940_v56 }
 0x605   : > { %v2546_v26 = vpop.f32.mrf.mxu1  ;;  %v2596_v46 = vadd.f32 %v2595_v22, %v5940_v56  ;;  %v5987_v22 = vld [vmem:[%s6299_s3 + $0x50] ss:$0 sps:$4 sm:$0x33]  }
 0x606   : > { %v4865_v27 = vpop.eup %4864  ;;  %v2597_v1 = vpop.f32.mrf.mxu0  ;;  %4886 = vtanh.f32 %v2545_v25  ;;  %v2547_v52 = vadd.f32 %v2546_v26, %v5943_v60 }
 0x607   : > { %v4867_v28 = vpop.eup %4866  ;;  %v2548_v41 = vpop.f32.mrf.mxu1  ;;  %v2696_v11 = vpack.c.bf16 %v4865_v27, %v4863_v23  ;;  %v2598_v62 = vadd.f32 %v2597_v1, %v5943_v60 }
 0x608   : > { %v4869_v29 = vpop.eup %4868  ;;  %v2549_v7 = vadd.f32 %v2548_v41, %v5943_v60  ;;  %v2599_v50 = vpop.f32.mrf.mxu0 }
 0x609   : > { %v4871_v31 = vpop.eup %4870  ;;  %v2705_v0 = vpack.c.bf16 %v4869_v29, %v4869_v29  ;;  %v2600_v32 = vadd.f32 %v2599_v50, %v5943_v60  ;;  %v2552_v33 = vpop.f32.mrf.mxu1 }
 0x60a   : > { %v4873_v37 = vpop.eup %4872  ;;  %v2707_v47 = vpack.c.bf16 %v4871_v31, %v4871_v31  ;;  %4888 = vtanh.f32 %v2549_v7  ;;  %v2553_v36 = vadd.f32 %v2552_v33, %v5938_v53  ;;  %v2603_v40 = vpop.f32.mrf.mxu0 }
 0x60b   : > { %v4875_v42 = vpop.eup %4874  ;;  %v2706_v45 = vpack.c.bf16 %v4873_v37, %v4873_v37  ;;  %4890 = vtanh.f32 %v2600_v32  ;;  %v2604_v48 = vadd.f32 %v2603_v40, %v5938_v53  ;;  %v2554_v51 = vpop.f32.mrf.mxu1  ;;  %v2749_v59 = vsel %vm515_vm0, %v2705_v0, 0 }
 0x60c   : > { %v4877_v39 = vpop.eup %4876  ;;  %v2708_v61 = vpack.c.bf16 %v4875_v42, %v4875_v42  ;;  %4892 = vtanh.f32 %v2553_v36  ;;  %v2555_v54 = vadd.f32 %v2554_v51, %v5938_v53  ;;  %v2605_v4 = vpop.f32.mrf.mxu0  ;;  %v2755_v63 = vsel %vm515_vm0, %v2707_v47, 0 }
 0x60d   : > { %v4879_v55 = vpop.eup %4878  ;;  %4894 = vtanh.f32 %v2604_v48  ;;  %v2606_v57 = vadd.f32 %v2605_v4, %v5938_v53  ;;  %v2556_v58 = vpop.f32.mrf.mxu1  ;;  %4365 = vmatprep.subr.msk.bf16.mxu0 %vm515_vm0, %v2706_v45  ;;  %v2698_v3 = vpack.c.bf16 %v4867_v28, %v4877_v39 }
 0x60e   : > { %v4881_v19 = vpop.eup %4880  ;;  %4896 = vtanh.f32 %v2555_v54  ;;  %4368 = vmatprep.subr.msk.bf16.mxu1 %vm515_vm0, %v2708_v61  ;;  %2791 = vmatpush1.bf16.msra.mxu0 %v2749_v59  ;;  %v2607_v5 = vpop.f32.mrf.mxu0 }
 0x60f   : > { %v4883_v6 = vpop.eup %4882  ;;  %4898 = vtanh.f32 %v2606_v57  ;;  %v2557_v15 = vpop.f32.mrf.mxu1  ;;  %2842 = vmatpush1.bf16.msra.mxu1 %v2755_v63  ;;  %2792 = vmatprep.subr.bf16.mxu0 %v2696_v11 }
 0x610   : > { %v4885_v9 = vpop.eup %4884  ;;  %4900 = vtanh.f32 %v2596_v46  ;;  %2843 = vmatprep.subr.bf16.mxu1 %v2698_v3  ;;  %v2695_v10 = vpack.c.bf16 %v4879_v55, %v4883_v6  ;;  %v2608_v44 = vpop.f32.mrf.mxu0 }
 0x611   : > { %4902 = vtanh.f32 %v2547_v52  ;;  %v2644_v12 = vpop.f32.mrf.mxu1  ;;  %v2697_v13 = vpack.c.bf16 %v4881_v19, %v4885_v9  ;;  %v6026_v6 = vpop.permute.xlu1 %2721 }
 0x612   : > { %4904 = vtanh.f32 %v2598_v62  ;;  %2793 = vmatpush1.bf16.msra.mxu0 %v2695_v10  ;;  %v2645_v40 = vadd.f32 %v2644_v12, %v5940_v56  ;;  %v6024_v62 = vpop.permute.xlu0 %2731 }
 0x613   : > { %4906 = vtanh.f32 %v2543_v8  ;;  %v2646_v16 = vpop.f32.mrf.mxu1  ;;  %2844 = vmatpush1.bf16.msra.mxu1 %v2697_v13  ;;  %v4887_v17 = vpop.eup %4886 }
 0x614   : > { %4908 = vtanh.f32 %v2594_v20  ;;  %v2647_v7 = vadd.f32 %v2646_v16, %v5940_v56 }
 0x615   : > { %v2648_v43 = vpop.f32.mrf.mxu1  ;;  %4366 = vmatmul.mubr.msk.bf16.vlgmr.msra.gmra.mxu0 %vm508_vm1, %v5975_v14 }
 0x616   : > { %4369 = vmatmul.mubr.msk.bf16.vlgmr.msra.gmra.mxu1 %vm508_vm1, %v5975_v14  ;;  %2820 = vmatprep.mubr.bf16.mxu0 %v5164_v2  ;;  %v2649_v32 = vadd.f32 %v2648_v43, %v5943_v60  ;;  %v6029_v10 = vpop.permute.xlu0 %2726 }
 0x617   : > { %v4889_v24 = vpop.eup %4888  ;;  %v2650_v18 = vpop.f32.mrf.mxu1  ;;  %2871 = vmatprep.mubr.bf16.mxu1 %v5164_v2 }
 0x618   : > { %v4891_v30 = vpop.eup %4890  ;;  %v2651_v38 = vadd.f32 %v2650_v18, %v5943_v60  ;;  %v2700_v36 = vpack.c.bf16 %v4889_v24, %v4887_v17 }
 0x619   : > { %v4893_v49 = vpop.eup %4892  ;;  %v2654_v21 = vpop.f32.mrf.mxu1 }
 0x61a   : > { %v4895_v23 = vpop.eup %4894  ;;  %v2709_v25 = vpack.c.bf16 %v4893_v49, %v4893_v49  ;;  %v2655_v26 = vadd.f32 %v2654_v21, %v5938_v53 }
 0x61b   : > { %v4897_v27 = vpop.eup %4896  ;;  %v2711_v1 = vpack.c.bf16 %v4895_v23, %v4895_v23  ;;  %v2656_v28 = vpop.f32.mrf.mxu1 }
 0x61c   : > { %v4899_v41 = vpop.eup %4898  ;;  %v2710_v29 = vpack.c.bf16 %v4897_v27, %v4897_v27  ;;  %4910 = vtanh.f32 %v2655_v26  ;;  %v2657_v50 = vadd.f32 %v2656_v28, %v5938_v53  ;;  %v2761_v47 = vsel %vm515_vm0, %v2709_v25, 0 }
 0x61d   : > { %v4901_v31 = vpop.eup %4900  ;;  %v2712_v0 = vpack.c.bf16 %v4899_v41, %v4899_v41  ;;  %4912 = vtanh.f32 %v2651_v38  ;;  %v2658_v33 = vpop.f32.mrf.mxu1  ;;  %4367 = vmatmul.mubr.msk.bf16.gmra.mxu0 %vm508_vm1, %v5987_v22  ;;  %v2767_v42 = vsel %vm515_vm0, %v2711_v1, 0 }
 0x61e   : > { %v4903_v37 = vpop.eup %4902  ;;  %4914 = vtanh.f32 %v2657_v50  ;;  %4370 = vmatmul.mubr.msk.bf16.gmra.mxu1 %vm508_vm1, %v5987_v22  ;;  %4371 = vmatprep.subr.msk.bf16.mxu0 %vm515_vm0, %v2710_v29  ;;  %v2702_v45 = vpack.c.bf16 %v4891_v30, %v4901_v31 }
 0x61f   : > { %v4905_v53 = vpop.eup %4904  ;;  %4374 = vmatprep.subr.msk.bf16.mxu1 %vm515_vm0, %v2712_v0  ;;  %v2659_v60 = vpop.f32.mrf.mxu1  ;;  %2893 = vmatpush1.bf16.msra.mxu0 %v2761_v47  ;;  %4916 = vtanh.f32 %v2647_v7 }
 0x620   : > { %v4907_v46 = vpop.eup %4906  ;;  %2944 = vmatpush1.bf16.msra.mxu1 %v2767_v42  ;;  %2894 = vmatprep.subr.bf16.mxu0 %v2700_v36  ;;  %4918 = vtanh.f32 %v2649_v32 }
 0x621   : > { %v4909_v48 = vpop.eup %4908  ;;  %2945 = vmatprep.subr.bf16.mxu1 %v2702_v45  ;;  %v2699_v51 = vpack.c.bf16 %v4903_v37, %v4907_v46  ;;  %2912 = vmatprep.mubr.bf16.mxu0 %v5164_v2  ;;  %4920 = vtanh.f32 %v2645_v40 }
 0x622   : > { %v2701_v39 = vpack.c.bf16 %v4905_v53, %v4909_v48  ;;  %2963 = vmatprep.mubr.bf16.mxu1 %v5164_v2 }
 0x623   : > { %2895 = vmatpush1.bf16.msra.mxu0 %v2699_v51 }
 0x624   : > { %2946 = vmatpush1.bf16.msra.mxu1 %v2701_v39 }
 0x626   : > { %4372 = vmatmul.mubr.msk.bf16.vlgmr.msra.gmra.mxu0 %vm508_vm1, %v5975_v14 }
 0x627   : > { %4375 = vmatmul.mubr.msk.bf16.vlgmr.msra.gmra.mxu1 %vm508_vm1, %v5975_v14  ;;  %2922 = vmatprep.mubr.bf16.mxu0 %v5164_v2 }
 0x628   : > { %2973 = vmatprep.mubr.bf16.mxu1 %v5164_v2 }
 0x629   : > { %v4911_v56 = vpop.eup %4910 }
 0x62a   : > { %v4913_v61 = vpop.eup %4912  ;;  %v2713_v52 = vpack.c.bf16 %v4911_v56, %v4911_v56 }
 0x62b   : > { %v4915_v54 = vpop.eup %4914 }
 0x62c   : > { %v2714_v4 = vpack.c.bf16 %v4915_v54, %v4915_v54  ;;  %v4917_v55 = vpop.eup %4916  ;;  %v2773_v58 = vsel %vm515_vm0, %v2713_v52, 0 }
 0x62d   : > { %v4919_v57 = vpop.eup %4918  ;;  %v2704_v59 = vpack.c.bf16 %v4913_v61, %v4917_v55 }
 0x62e   : > { %4373 = vmatmul.mubr.msk.bf16.gmra.mxu0 %vm508_vm1, %v5987_v22  ;;  %4377 = vmatprep.subr.msk.bf16.mxu0 %vm515_vm0, %v2714_v4  ;;  %v4921_v11 = vpop.eup %4920 }
 0x62f   : > { %4376 = vmatmul.mubr.msk.bf16.gmra.mxu1 %vm508_vm1, %v5987_v22  ;;  %2995 = vmatpush1.bf16.msra.mxu0 %v2773_v58  ;;  %v2703_v19 = vpack.c.bf16 %v4919_v57, %v4921_v11 }
 0x630   : > { %2996 = vmatprep.subr.bf16.mxu0 %v2704_v59  ;;  %3014 = vmatprep.mubr.bf16.mxu0 %v5164_v2 }
 0x631   : > { %3182 = vmatprep.mubr.bf16.mxu1 %v5164_v2 }
 0x633   : > { %2997 = vmatpush1.bf16.msra.mxu0 %v2703_v19 }
 0x636   : > { %4378 = vmatmul.mubr.msk.bf16.vlgmr.msra.gmra.mxu0 %vm508_vm1, %v5975_v14 }
 0x637   : > { %3024 = vmatprep.mubr.bf16.mxu0 %v5164_v2 }
 0x63e   : > { %4379 = vmatmul.mubr.msk.bf16.gmra.mxu0 %vm508_vm1, %v5987_v22 }
 0x63f   : > { %3233 = vmatprep.mubr.bf16.mxu0 %v5164_v2 }
 0x6d5   : > { %v2812_v63 = vpop.f32.mrf.mxu0 }
 0x6d6   : > { %v2863_v3 = vpop.f32.mrf.mxu1  ;;  %v2813_v27 = vadd.f32 %v2812_v63, %v6026_v6 }
 0x6d7   : > { %v2814_v5 = vpop.f32.mrf.mxu0  ;;  %v2864_v28 = vadd.f32 %v2863_v3, %v6026_v6 }
 0x6d8   : > { %v2865_v8 = vpop.f32.mrf.mxu1  ;;  %v2815_v15 = vadd.f32 %v2814_v5, %v6026_v6 }
 0x6d9   : > { %v2816_v9 = vpop.f32.mrf.mxu0  ;;  %v2866_v30 = vadd.f32 %v2865_v8, %v6026_v6 }
 0x6da   : > { %v2867_v20 = vpop.f32.mrf.mxu1  ;;  %4922 = vtanh.f32 %v2815_v15  ;;  %v2817_v21 = vadd.f32 %v2816_v9, %v6029_v10 }
 0x6db   : > { %v2818_v44 = vpop.f32.mrf.mxu0  ;;  %v2868_v25 = vadd.f32 %v2867_v20, %v6029_v10 }
 0x6dc   : > { %v2819_v12 = vadd.f32 %v2818_v44, %v6029_v10  ;;  %v2869_v13 = vpop.f32.mrf.mxu1 }
 0x6dd   : > { %v2870_v14 = vadd.f32 %v2869_v13, %v6029_v10  ;;  %v2822_v16 = vpop.f32.mrf.mxu0 }
 0x6de   : > { %4924 = vtanh.f32 %v2819_v12  ;;  %v2823_v43 = vadd.f32 %v2822_v16, %v6024_v62  ;;  %v2873_v17 = vpop.f32.mrf.mxu1 }
 0x6df   : > { %4926 = vtanh.f32 %v2870_v14  ;;  %v2874_v24 = vadd.f32 %v2873_v17, %v6024_v62  ;;  %v2824_v18 = vpop.f32.mrf.mxu0 }
 0x6e0   : > { %4928 = vtanh.f32 %v2823_v43  ;;  %v2825_v49 = vadd.f32 %v2824_v18, %v6024_v62  ;;  %v2875_v38 = vpop.f32.mrf.mxu1 }
 0x6e1   : > { %4930 = vtanh.f32 %v2874_v24  ;;  %v2876_v22 = vadd.f32 %v2875_v38, %v6024_v62  ;;  %v2826_v23 = vpop.f32.mrf.mxu0 }
 0x6e2   : > { %4932 = vtanh.f32 %v2825_v49  ;;  %v2877_v26 = vpop.f32.mrf.mxu1  ;;  %v6061_v23 = vld [vmem:[%s6299_s3 + $0x54] sm:$0xff]  }
 0x6e3   : > { %4934 = vtanh.f32 %v2876_v22  ;;  %v2827_v1 = vpop.f32.mrf.mxu0 }
 0x6e4   : > { %4936 = vtanh.f32 %v2866_v30  ;;  %v2878_v41 = vpop.f32.mrf.mxu1 }
 0x6e5   : > { %4938 = vtanh.f32 %v2817_v21 }
 0x6e6   : > { %4940 = vtanh.f32 %v2868_v25  ;;  %v2914_v29 = vpop.f32.mrf.mxu0 }
 0x6e7   : > { %4942 = vtanh.f32 %v2813_v27  ;;  %v2965_v7 = vpop.f32.mrf.mxu1  ;;  %v4923_v0 = vpop.eup %4922  ;;  %v2915_v17 = vadd.f32 %v2914_v29, %v6026_v6 }
 0x6e8   : > { %4944 = vtanh.f32 %v2864_v28  ;;  %v2916_v50 = vpop.f32.mrf.mxu0  ;;  %v2966_v30 = vadd.f32 %v2965_v7, %v6026_v6 }
 0x6e9   : > { %v2967_v31 = vpop.f32.mrf.mxu1  ;;  %v2917_v32 = vadd.f32 %v2916_v50, %v6026_v6 }
 0x6ea   : > { %v2918_v33 = vpop.f32.mrf.mxu0  ;;  %v2968_v55 = vadd.f32 %v2967_v31, %v6026_v6  ;;  %v6073_v31 = vld [vmem:[%s6299_s3 + $0x5c] ss:$0 sps:$4 sm:$0x33]  }
 0x6eb   : > { %v4925_v37 = vpop.eup %4924  ;;  %v2969_v47 = vpop.f32.mrf.mxu1  ;;  %4946 = vtanh.f32 %v2917_v32  ;;  %v2919_v19 = vadd.f32 %v2918_v33, %v6029_v10 }
 0x6ec   : > { %v4927_v36 = vpop.eup %4926  ;;  %v2920_v53 = vpop.f32.mrf.mxu0  ;;  %v3068_v20 = vpack.c.bf16 %v4925_v37, %v4923_v0  ;;  %v2970_v12 = vadd.f32 %v2969_v47, %v6029_v10 }
 0x6ed   : > { %v4929_v40 = vpop.eup %4928  ;;  %v2921_v60 = vadd.f32 %v2920_v53, %v6029_v10  ;;  %v2971_v42 = vpop.f32.mrf.mxu1 }
 0x6ee   : > { %v4931_v45 = vpop.eup %4930  ;;  %v3077_v46 = vpack.c.bf16 %v4929_v40, %v4929_v40  ;;  %v2972_v48 = vadd.f32 %v2971_v42, %v6029_v10  ;;  %v2924_v51 = vpop.f32.mrf.mxu0 }
 0x6ef   : > { %v4933_v39 = vpop.eup %4932  ;;  %v3079_v56 = vpack.c.bf16 %v4931_v45, %v4931_v45  ;;  %4948 = vtanh.f32 %v2921_v60  ;;  %v2925_v61 = vadd.f32 %v2924_v51, %v6024_v62  ;;  %v2975_v52 = vpop.f32.mrf.mxu1 }
 0x6f0   : > { %v4935_v54 = vpop.eup %4934  ;;  %v3078_v4 = vpack.c.bf16 %v4933_v39, %v4933_v39  ;;  %4950 = vtanh.f32 %v2972_v48  ;;  %v2976_v57 = vadd.f32 %v2975_v52, %v6024_v62  ;;  %v2926_v58 = vpop.f32.mrf.mxu0  ;;  %v3121_v9 = vsel %vm515_vm0, %v3077_v46, 0 }
 0x6f1   : > { %v4937_v59 = vpop.eup %4936  ;;  %v3080_v11 = vpack.c.bf16 %v4935_v54, %v4935_v54  ;;  %4952 = vtanh.f32 %v2925_v61  ;;  %v2927_v63 = vadd.f32 %v2926_v58, %v6024_v62  ;;  %v2977_v3 = vpop.f32.mrf.mxu1  ;;  %v3127_v13 = vsel %vm515_vm0, %v3079_v56, 0 }
 0x6f2   : > { %v4939_v5 = vpop.eup %4938  ;;  %4954 = vtanh.f32 %v2976_v57  ;;  %v2978_v8 = vadd.f32 %v2977_v3, %v6024_v62  ;;  %v2928_v15 = vpop.f32.mrf.mxu0  ;;  %4388 = vmatprep.subr.msk.bf16.mxu1 %vm515_vm0, %v3078_v4  ;;  %v3070_v14 = vpack.c.bf16 %v4927_v36, %v4937_v59 }
 0x6f3   : > { %v4941_v44 = vpop.eup %4940  ;;  %4956 = vtanh.f32 %v2927_v63  ;;  %4391 = vmatprep.subr.msk.bf16.mxu0 %vm515_vm0, %v3080_v11  ;;  %3163 = vmatpush1.bf16.msra.mxu1 %v3121_v9  ;;  %v2979_v16 = vpop.f32.mrf.mxu1 }
 0x6f4   : > { %v4943_v43 = vpop.eup %4942  ;;  %4958 = vtanh.f32 %v2978_v8  ;;  %v2929_v24 = vpop.f32.mrf.mxu0  ;;  %3214 = vmatpush1.bf16.msra.mxu0 %v3127_v13  ;;  %3164 = vmatprep.subr.bf16.mxu1 %v3068_v20 }
 0x6f5   : > { %v4945_v18 = vpop.eup %4944  ;;  %4960 = vtanh.f32 %v2968_v55  ;;  %3215 = vmatprep.subr.bf16.mxu0 %v3070_v14  ;;  %v3067_v49 = vpack.c.bf16 %v4939_v5, %v4943_v43  ;;  %v2980_v38 = vpop.f32.mrf.mxu1 }
 0x6f6   : > { %4962 = vtanh.f32 %v2919_v19  ;;  %v3016_v21 = vpop.f32.mrf.mxu0  ;;  %v3069_v22 = vpack.c.bf16 %v4941_v44, %v4945_v18  ;;  %v6112_v43 = vpop.permute.xlu0 %3093 }
 0x6f7   : > { %4964 = vtanh.f32 %v2970_v12  ;;  %3165 = vmatpush1.bf16.msra.mxu1 %v3067_v49  ;;  %v3017_v52 = vadd.f32 %v3016_v21, %v6026_v6  ;;  %v6110_v12 = vpop.permute.xlu1 %3103 }
 0x6f8   : > { %4966 = vtanh.f32 %v2915_v17  ;;  %v3018_v25 = vpop.f32.mrf.mxu0  ;;  %3216 = vmatpush1.bf16.msra.mxu0 %v3069_v22  ;;  %v4947_v27 = vpop.eup %4946 }
 0x6f9   : > { %4968 = vtanh.f32 %v2966_v30  ;;  %v3019_v60 = vadd.f32 %v3018_v25, %v6026_v6 }
 0x6fa   : > { %v3020_v26 = vpop.f32.mrf.mxu0  ;;  %4389 = vmatmul.mubr.msk.bf16.vlgmr.msra.gmra.mxu1 %vm508_vm1, %v6061_v23 }
 0x6fb   : > { %4392 = vmatmul.mubr.msk.bf16.vlgmr.msra.gmra.mxu0 %vm508_vm1, %v6061_v23  ;;  %3192 = vmatprep.mubr.bf16.mxu1 %v5164_v2  ;;  %v3021_v48 = vadd.f32 %v3020_v26, %v6029_v10  ;;  %v6115_v49 = vpop.permute.xlu1 %3098 }
 0x6fc   : > { %v4949_v1 = vpop.eup %4948  ;;  %v3022_v28 = vpop.f32.mrf.mxu0  ;;  %3243 = vmatprep.mubr.bf16.mxu0 %v5164_v2 }
 0x6fd   : > { %v4951_v41 = vpop.eup %4950  ;;  %v3023_v7 = vadd.f32 %v3022_v28, %v6029_v10  ;;  %v3072_v61 = vpack.c.bf16 %v4949_v1, %v4947_v27 }
 0x6fe   : > { %v4953_v29 = vpop.eup %4952  ;;  %v3026_v50 = vpop.f32.mrf.mxu0 }
 0x6ff   : > { %v4955_v0 = vpop.eup %4954  ;;  %v3081_v32 = vpack.c.bf16 %v4953_v29, %v4953_v29  ;;  %v3027_v33 = vadd.f32 %v3026_v50, %v6024_v62 }
 0x700   : > { %v4957_v37 = vpop.eup %4956  ;;  %v3083_v47 = vpack.c.bf16 %v4955_v0, %v4955_v0  ;;  %v3028_v36 = vpop.f32.mrf.mxu0 }
 0x701   : > { %v4959_v53 = vpop.eup %4958  ;;  %v3082_v40 = vpack.c.bf16 %v4957_v37, %v4957_v37  ;;  %4970 = vtanh.f32 %v3027_v33  ;;  %v3029_v42 = vadd.f32 %v3028_v36, %v6024_v62  ;;  %v3133_v56 = vsel %vm515_vm0, %v3081_v32, 0 }
 0x702   : > { %v4961_v45 = vpop.eup %4960  ;;  %v3084_v46 = vpack.c.bf16 %v4959_v53, %v4959_v53  ;;  %4972 = vtanh.f32 %v3023_v7  ;;  %v3030_v51 = vpop.f32.mrf.mxu0  ;;  %4390 = vmatmul.mubr.msk.bf16.gmra.mxu1 %vm508_vm1, %v6073_v31  ;;  %v3139_v54 = vsel %vm515_vm0, %v3083_v47, 0 }
 0x703   : > { %v4963_v39 = vpop.eup %4962  ;;  %4974 = vtanh.f32 %v3029_v42  ;;  %4393 = vmatmul.mubr.msk.bf16.gmra.mxu0 %vm508_vm1, %v6073_v31  ;;  %4394 = vmatprep.subr.msk.bf16.mxu1 %vm515_vm0, %v3082_v40  ;;  %v3074_v4 = vpack.c.bf16 %v4951_v41, %v4961_v45 }
 0x704   : > { %v4965_v62 = vpop.eup %4964  ;;  %4397 = vmatprep.subr.msk.bf16.mxu0 %vm515_vm0, %v3084_v46  ;;  %v3031_v10 = vpop.f32.mrf.mxu0  ;;  %3265 = vmatpush1.bf16.msra.mxu1 %v3133_v56  ;;  %4976 = vtanh.f32 %v3019_v60 }
 0x705   : > { %v4967_v55 = vpop.eup %4966  ;;  %3316 = vmatpush1.bf16.msra.mxu0 %v3139_v54  ;;  %3266 = vmatprep.subr.bf16.mxu1 %v3072_v61  ;;  %4978 = vtanh.f32 %v3021_v48 }
 0x706   : > { %v4969_v57 = vpop.eup %4968  ;;  %3317 = vmatprep.subr.bf16.mxu0 %v3074_v4  ;;  %v3071_v58 = vpack.c.bf16 %v4963_v39, %v4967_v55  ;;  %3284 = vmatprep.mubr.bf16.mxu1 %v5164_v2  ;;  %4980 = vtanh.f32 %v3017_v52 }
 0x707   : > { %v3073_v59 = vpack.c.bf16 %v4965_v62, %v4969_v57  ;;  %3335 = vmatprep.mubr.bf16.mxu0 %v5164_v2 }
 0x708   : > { %3267 = vmatpush1.bf16.msra.mxu1 %v3071_v58 }
 0x709   : > { %3318 = vmatpush1.bf16.msra.mxu0 %v3073_v59 }
 0x70b   : > { %4395 = vmatmul.mubr.msk.bf16.vlgmr.msra.gmra.mxu1 %vm508_vm1, %v6061_v23 }
 0x70c   : > { %4398 = vmatmul.mubr.msk.bf16.vlgmr.msra.gmra.mxu0 %vm508_vm1, %v6061_v23  ;;  %3294 = vmatprep.mubr.bf16.mxu1 %v5164_v2 }
 0x70d   : > { %3345 = vmatprep.mubr.bf16.mxu0 %v5164_v2 }
 0x70e   : > { %v4971_v6 = vpop.eup %4970 }
 0x70f   : > { %v4973_v11 = vpop.eup %4972  ;;  %v3085_v19 = vpack.c.bf16 %v4971_v6, %v4971_v6 }
 0x710   : > { %v4975_v63 = vpop.eup %4974 }
 0x711   : > { %v3086_v3 = vpack.c.bf16 %v4975_v63, %v4975_v63  ;;  %v4977_v5 = vpop.eup %4976  ;;  %v3145_v15 = vsel %vm515_vm0, %v3085_v19, 0 }
 0x712   : > { %v4979_v8 = vpop.eup %4978  ;;  %v3076_v9 = vpack.c.bf16 %v4973_v11, %v4977_v5 }
 0x713   : > { %4396 = vmatmul.mubr.msk.bf16.gmra.mxu1 %vm508_vm1, %v6073_v31  ;;  %4400 = vmatprep.subr.msk.bf16.mxu1 %vm515_vm0, %v3086_v3  ;;  %v4981_v20 = vpop.eup %4980 }
 0x714   : > { %4399 = vmatmul.mubr.msk.bf16.gmra.mxu0 %vm508_vm1, %v6073_v31  ;;  %3367 = vmatpush1.bf16.msra.mxu1 %v3145_v15  ;;  %v3075_v44 = vpack.c.bf16 %v4979_v8, %v4981_v20 }
 0x715   : > { %3368 = vmatprep.subr.bf16.mxu1 %v3076_v9  ;;  %3386 = vmatprep.mubr.bf16.mxu1 %v5164_v2 }
 0x716   : > { %3554 = vmatprep.mubr.bf16.mxu0 %v5164_v2 }
 0x718   : > { %3369 = vmatpush1.bf16.msra.mxu1 %v3075_v44 }
 0x71b   : > { %4401 = vmatmul.mubr.msk.bf16.vlgmr.msra.gmra.mxu1 %vm508_vm1, %v6061_v23 }
 0x71c   : > { %3396 = vmatprep.mubr.bf16.mxu1 %v5164_v2 }
 0x723   : > { %4402 = vmatmul.mubr.msk.bf16.gmra.mxu1 %vm508_vm1, %v6073_v31 }
 0x724   : > { %3605 = vmatprep.mubr.bf16.mxu1 %v5164_v2 }
 0x7ba   : > { %v3184_v13 = vpop.f32.mrf.mxu1 }
 0x7bb   : > { %v3235_v14 = vpop.f32.mrf.mxu0  ;;  %v3185_v37 = vadd.f32 %v3184_v13, %v6112_v43 }
 0x7bc   : > { %v3186_v16 = vpop.f32.mrf.mxu1  ;;  %v3236_v36 = vadd.f32 %v3235_v14, %v6112_v43 }
 0x7bd   : > { %v3237_v17 = vpop.f32.mrf.mxu0  ;;  %v3187_v24 = vadd.f32 %v3186_v16, %v6112_v43 }
 0x7be   : > { %v3188_v18 = vpop.f32.mrf.mxu1  ;;  %v3238_v41 = vadd.f32 %v3237_v17, %v6112_v43 }
 0x7bf   : > { %v3239_v30 = vpop.f32.mrf.mxu0  ;;  %4982 = vtanh.f32 %v3187_v24  ;;  %v3189_v50 = vadd.f32 %v3188_v18, %v6115_v49 }
 0x7c0   : > { %v3190_v38 = vpop.f32.mrf.mxu1  ;;  %v3240_v32 = vadd.f32 %v3239_v30, %v6115_v49 }
 0x7c1   : > { %v3191_v21 = vadd.f32 %v3190_v38, %v6115_v49  ;;  %v3241_v22 = vpop.f32.mrf.mxu0 }
 0x7c2   : > { %v3242_v23 = vadd.f32 %v3241_v22, %v6115_v49  ;;  %v3194_v25 = vpop.f32.mrf.mxu1 }
 0x7c3   : > { %4984 = vtanh.f32 %v3191_v21  ;;  %v3195_v26 = vadd.f32 %v3194_v25, %v6110_v12  ;;  %v3245_v27 = vpop.f32.mrf.mxu0 }
 0x7c4   : > { %4986 = vtanh.f32 %v3242_v23  ;;  %v3246_v1 = vadd.f32 %v3245_v27, %v6110_v12  ;;  %v3196_v28 = vpop.f32.mrf.mxu1 }
 0x7c5   : > { %4988 = vtanh.f32 %v3195_v26  ;;  %v3197_v29 = vadd.f32 %v3196_v28, %v6110_v12  ;;  %v3247_v7 = vpop.f32.mrf.mxu0 }
 0x7c6   : > { %4990 = vtanh.f32 %v3246_v1  ;;  %v3248_v31 = vadd.f32 %v3247_v7, %v6110_v12  ;;  %v3198_v0 = vpop.f32.mrf.mxu1 }
 0x7c7   : > { %4992 = vtanh.f32 %v3197_v29  ;;  %v3249_v33 = vpop.f32.mrf.mxu0  ;;  %v6147_v0 = vld [vmem:[%s6299_s3 + $0x60] sm:$0xff]  }
 0x7c8   : > { %4994 = vtanh.f32 %v3248_v31  ;;  %v3199_v47 = vpop.f32.mrf.mxu1 }
 0x7c9   : > { %4996 = vtanh.f32 %v3238_v41  ;;  %v3250_v53 = vpop.f32.mrf.mxu0 }
 0x7ca   : > { %4998 = vtanh.f32 %v3189_v50 }
 0x7cb   : > { %5000 = vtanh.f32 %v3240_v32  ;;  %v3286_v40 = vpop.f32.mrf.mxu1 }
 0x7cc   : > { %5002 = vtanh.f32 %v3185_v37  ;;  %v3337_v60 = vpop.f32.mrf.mxu0  ;;  %v4983_v46 = vpop.eup %4982  ;;  %v3287_v27 = vadd.f32 %v3286_v40, %v6112_v43 }
 0x7cd   : > { %5004 = vtanh.f32 %v3236_v36  ;;  %v3288_v42 = vpop.f32.mrf.mxu1  ;;  %v3338_v41 = vadd.f32 %v3337_v60, %v6112_v43 }
 0x7ce   : > { %v3339_v45 = vpop.f32.mrf.mxu0  ;;  %v3289_v48 = vadd.f32 %v3288_v42, %v6112_v43 }
 0x7cf   : > { %v3290_v51 = vpop.f32.mrf.mxu1  ;;  %v3340_v5 = vadd.f32 %v3339_v45, %v6112_v43  ;;  %v6159_v45 = vld [vmem:[%s6299_s3 + $0x68] ss:$0 sps:$4 sm:$0x33]  }
 0x7d0   : > { %v4985_v39 = vpop.eup %4984  ;;  %v3341_v56 = vpop.f32.mrf.mxu0  ;;  %5006 = vtanh.f32 %v3289_v48  ;;  %v3291_v44 = vadd.f32 %v3290_v51, %v6115_v49 }
 0x7d1   : > { %v4987_v61 = vpop.eup %4986  ;;  %v3292_v62 = vpop.f32.mrf.mxu1  ;;  %v3440_v30 = vpack.c.bf16 %v4985_v39, %v4983_v46  ;;  %v3342_v21 = vadd.f32 %v3341_v56, %v6115_v49 }
 0x7d2   : > { %v4989_v52 = vpop.eup %4988  ;;  %v3293_v10 = vadd.f32 %v3292_v62, %v6115_v49  ;;  %v3343_v54 = vpop.f32.mrf.mxu0 }
 0x7d3   : > { %v4991_v4 = vpop.eup %4990  ;;  %v3449_v55 = vpack.c.bf16 %v4989_v52, %v4989_v52  ;;  %v3344_v57 = vadd.f32 %v3343_v54, %v6115_v49  ;;  %v3296_v58 = vpop.f32.mrf.mxu1 }
 0x7d4   : > { %v4993_v59 = vpop.eup %4992  ;;  %v3451_v6 = vpack.c.bf16 %v4991_v4, %v4991_v4  ;;  %5008 = vtanh.f32 %v3293_v10  ;;  %v3297_v11 = vadd.f32 %v3296_v58, %v6110_v12  ;;  %v3347_v19 = vpop.f32.mrf.mxu0 }
 0x7d5   : > { %v4995_v63 = vpop.eup %4994  ;;  %v3450_v3 = vpack.c.bf16 %v4993_v59, %v4993_v59  ;;  %5010 = vtanh.f32 %v3344_v57  ;;  %v3348_v8 = vadd.f32 %v3347_v19, %v6110_v12  ;;  %v3298_v15 = vpop.f32.mrf.mxu1  ;;  %v3493_v18 = vsel %vm515_vm0, %v3449_v55, 0 }
 0x7d6   : > { %v4997_v9 = vpop.eup %4996  ;;  %v3452_v20 = vpack.c.bf16 %v4995_v63, %v4995_v63  ;;  %5012 = vtanh.f32 %v3297_v11  ;;  %v3299_v13 = vadd.f32 %v3298_v15, %v6110_v12  ;;  %v3349_v14 = vpop.f32.mrf.mxu0  ;;  %v3499_v22 = vsel %vm515_vm0, %v3451_v6, 0 }
 0x7d7   : > { %v4999_v16 = vpop.eup %4998  ;;  %5014 = vtanh.f32 %v3348_v8  ;;  %v3350_v17 = vadd.f32 %v3349_v14, %v6110_v12  ;;  %v3300_v24 = vpop.f32.mrf.mxu1  ;;  %4411 = vmatprep.subr.msk.bf16.mxu0 %vm515_vm0, %v3450_v3  ;;  %v3442_v23 = vpack.c.bf16 %v4987_v61, %v4997_v9 }
 0x7d8   : > { %v5001_v38 = vpop.eup %5000  ;;  %5016 = vtanh.f32 %v3299_v13  ;;  %4414 = vmatprep.subr.msk.bf16.mxu1 %vm515_vm0, %v3452_v20  ;;  %3535 = vmatpush1.bf16.msra.mxu0 %v3493_v18  ;;  %v3351_v25 = vpop.f32.mrf.mxu0 }
 0x7d9   : > { %v5003_v26 = vpop.eup %5002  ;;  %5018 = vtanh.f32 %v3350_v17  ;;  %v3301_v1 = vpop.f32.mrf.mxu1  ;;  %3586 = vmatpush1.bf16.msra.mxu1 %v3499_v22  ;;  %3536 = vmatprep.subr.bf16.mxu0 %v3440_v30 }
 0x7da   : > { %v5005_v28 = vpop.eup %5004  ;;  %5020 = vtanh.f32 %v3340_v5  ;;  %3587 = vmatprep.subr.bf16.mxu1 %v3442_v23  ;;  %v3439_v29 = vpack.c.bf16 %v4999_v16, %v5003_v26  ;;  %v3352_v7 = vpop.f32.mrf.mxu0 }
 0x7db   : > { %5022 = vtanh.f32 %v3291_v44  ;;  %v3388_v50 = vpop.f32.mrf.mxu1  ;;  %v3441_v31 = vpack.c.bf16 %v5001_v38, %v5005_v28  ;;  %v6196_v22 = vpop.permute.xlu0 %3475 }
 0x7dc   : > { %5024 = vtanh.f32 %v3342_v21  ;;  %3537 = vmatpush1.bf16.msra.mxu0 %v3439_v29  ;;  %v3389_v19 = vadd.f32 %v3388_v50, %v6112_v43 }
 0x7dd   : > { %5026 = vtanh.f32 %v3287_v27  ;;  %v3390_v32 = vpop.f32.mrf.mxu1  ;;  %3588 = vmatpush1.bf16.msra.mxu1 %v3441_v31  ;;  %v5007_v37 = vpop.eup %5006 }
 0x7de   : > { %5028 = vtanh.f32 %v3338_v41  ;;  %v3391_v10 = vadd.f32 %v3390_v32, %v6112_v43  ;;  %v6201_v31 = vpop.permute.xlu1 %3465 }
 0x7df   : > { %v3392_v33 = vpop.f32.mrf.mxu1  ;;  %4412 = vmatmul.mubr.msk.bf16.vlgmr.msra.gmra.mxu0 %vm508_vm1, %v6147_v0  ;;  %v6198_v41 = vpop.permute.xlu0 %3470 }
 0x7e0   : > { %4415 = vmatmul.mubr.msk.bf16.vlgmr.msra.gmra.mxu1 %vm508_vm1, %v6147_v0  ;;  %3564 = vmatprep.mubr.bf16.mxu0 %v5164_v2  ;;  %v3393_v57 = vadd.f32 %v3392_v33, %v6115_v49 }
 0x7e1   : > { %v5009_v47 = vpop.eup %5008  ;;  %v3394_v36 = vpop.f32.mrf.mxu1  ;;  %3615 = vmatprep.mubr.bf16.mxu1 %v5164_v2 }
 0x7e2   : > { %v5011_v53 = vpop.eup %5010  ;;  %v3395_v60 = vadd.f32 %v3394_v36, %v6115_v49  ;;  %v3444_v11 = vpack.c.bf16 %v5009_v47, %v5007_v37 }
 0x7e3   : > { %v5013_v40 = vpop.eup %5012  ;;  %v3398_v42 = vpop.f32.mrf.mxu1 }
 0x7e4   : > { %v5015_v46 = vpop.eup %5014  ;;  %v3453_v48 = vpack.c.bf16 %v5013_v40, %v5013_v40  ;;  %v3399_v51 = vadd.f32 %v3398_v42, %v6110_v12 }
 0x7e5   : > { %v5017_v39 = vpop.eup %5016  ;;  %v3455_v56 = vpack.c.bf16 %v5015_v46, %v5015_v46  ;;  %v3400_v61 = vpop.f32.mrf.mxu1 }
 0x7e6   : > { %v5019_v62 = vpop.eup %5018  ;;  %v3454_v52 = vpack.c.bf16 %v5017_v39, %v5017_v39  ;;  %5030 = vtanh.f32 %v3399_v51  ;;  %v3401_v54 = vadd.f32 %v3400_v61, %v6110_v12  ;;  %v3505_v6 = vsel %vm515_vm0, %v3453_v48, 0 }
 0x7e7   : > { %v5021_v4 = vpop.eup %5020  ;;  %v3456_v55 = vpack.c.bf16 %v5019_v62, %v5019_v62  ;;  %5032 = vtanh.f32 %v3395_v60  ;;  %v3402_v58 = vpop.f32.mrf.mxu1  ;;  %4413 = vmatmul.mubr.msk.bf16.gmra.mxu0 %vm508_vm1, %v6159_v45  ;;  %v3511_v63 = vsel %vm515_vm0, %v3455_v56, 0 }
 0x7e8   : > { %v5023_v59 = vpop.eup %5022  ;;  %5034 = vtanh.f32 %v3401_v54  ;;  %4416 = vmatmul.mubr.msk.bf16.gmra.mxu1 %vm508_vm1, %v6159_v45  ;;  %4417 = vmatprep.subr.msk.bf16.mxu0 %vm515_vm0, %v3454_v52  ;;  %v3446_v3 = vpack.c.bf16 %v5011_v53, %v5021_v4 }
 0x7e9   : > { %v5025_v12 = vpop.eup %5024  ;;  %4420 = vmatprep.subr.msk.bf16.mxu1 %vm515_vm0, %v3456_v55  ;;  %v3403_v49 = vpop.f32.mrf.mxu1  ;;  %3637 = vmatpush1.bf16.msra.mxu0 %v3505_v6  ;;  %5036 = vtanh.f32 %v3391_v10 }
 0x7ea   : > { %v5027_v5 = vpop.eup %5026  ;;  %3688 = vmatpush1.bf16.msra.mxu1 %v3511_v63  ;;  %3638 = vmatprep.subr.bf16.mxu0 %v3444_v11  ;;  %5038 = vtanh.f32 %v3393_v57 }
 0x7eb   : > { %v5029_v8 = vpop.eup %5028  ;;  %3689 = vmatprep.subr.bf16.mxu1 %v3446_v3  ;;  %v3443_v15 = vpack.c.bf16 %v5023_v59, %v5027_v5  ;;  %3656 = vmatprep.mubr.bf16.mxu0 %v5164_v2  ;;  %5040 = vtanh.f32 %v3389_v19 }
 0x7ec   : > { %v3445_v9 = vpack.c.bf16 %v5025_v12, %v5029_v8  ;;  %3707 = vmatprep.mubr.bf16.mxu1 %v5164_v2 }
 0x7ed   : > { %3639 = vmatpush1.bf16.msra.mxu0 %v3443_v15 }
 0x7ee   : > { %3690 = vmatpush1.bf16.msra.mxu1 %v3445_v9 }
 0x7f0   : > { %4418 = vmatmul.mubr.msk.bf16.vlgmr.msra.gmra.mxu0 %vm508_vm1, %v6147_v0 }
 0x7f1   : > { %4421 = vmatmul.mubr.msk.bf16.vlgmr.msra.gmra.mxu1 %vm508_vm1, %v6147_v0  ;;  %3666 = vmatprep.mubr.bf16.mxu0 %v5164_v2 }
 0x7f2   : > { %3717 = vmatprep.mubr.bf16.mxu1 %v5164_v2 }
 0x7f3   : > { %v5031_v43 = vpop.eup %5030 }
 0x7f4   : > { %v5033_v20 = vpop.eup %5032  ;;  %v3457_v44 = vpack.c.bf16 %v5031_v43, %v5031_v43 }
 0x7f5   : > { %v5035_v13 = vpop.eup %5034 }
 0x7f6   : > { %v3458_v14 = vpack.c.bf16 %v5035_v13, %v5035_v13  ;;  %v5037_v16 = vpop.eup %5036  ;;  %v3517_v24 = vsel %vm515_vm0, %v3457_v44, 0 }
 0x7f7   : > { %v5039_v17 = vpop.eup %5038  ;;  %v3448_v18 = vpack.c.bf16 %v5033_v20, %v5037_v16 }
 0x7f8   : > { %4419 = vmatmul.mubr.msk.bf16.gmra.mxu0 %vm508_vm1, %v6159_v45  ;;  %4423 = vmatprep.subr.msk.bf16.mxu0 %vm515_vm0, %v3458_v14  ;;  %v5041_v30 = vpop.eup %5040 }
 0x7f9   : > { %4422 = vmatmul.mubr.msk.bf16.gmra.mxu1 %vm508_vm1, %v6159_v45  ;;  %3739 = vmatpush1.bf16.msra.mxu0 %v3517_v24  ;;  %v3447_v38 = vpack.c.bf16 %v5039_v17, %v5041_v30 }
 0x7fa   : > { %3740 = vmatprep.subr.bf16.mxu0 %v3448_v18  ;;  %3758 = vmatprep.mubr.bf16.mxu0 %v5164_v2 }
 0x7fb   : > { %3895 = vmatprep.mubr.bf16.mxu1 %v5164_v2 }
 0x7fd   : > { %3741 = vmatpush1.bf16.msra.mxu0 %v3447_v38 }
 0x800   : > { %4424 = vmatmul.mubr.msk.bf16.vlgmr.msra.gmra.mxu0 %vm508_vm1, %v6147_v0 }
 0x801   : > { %3768 = vmatprep.mubr.bf16.mxu0 %v5164_v2 }
 0x808   : > { %4425 = vmatmul.mubr.msk.bf16.gmra.mxu0 %vm508_vm1, %v6159_v45 }
 0x809   : > { %3977 = vmatprep.mubr.bf16.mxu0 %v5164_v2 }
 0x89f   : > { %v3556_v21 = vpop.f32.mrf.mxu0 }
 0x8a0   : > { %v3607_v23 = vpop.f32.mrf.mxu1  ;;  %v3557_v46 = vadd.f32 %v3556_v21, %v6201_v31 }
 0x8a1   : > { %v3558_v25 = vpop.f32.mrf.mxu0  ;;  %v3608_v61 = vadd.f32 %v3607_v23, %v6201_v31 }
 0x8a2   : > { %v3609_v26 = vpop.f32.mrf.mxu1  ;;  %v3559_v33 = vadd.f32 %v3558_v25, %v6201_v31 }
 0x8a3   : > { %v3560_v27 = vpop.f32.mrf.mxu0  ;;  %v3610_v52 = vadd.f32 %v3609_v26, %v6201_v31 }
 0x8a4   : > { %v3611_v1 = vpop.f32.mrf.mxu1  ;;  %v3561_v47 = vadd.f32 %v3560_v27, %v6198_v41 }
 0x8a5   : > { %v3562_v28 = vpop.f32.mrf.mxu0  ;;  %v3612_v54 = vadd.f32 %v3611_v1, %v6198_v41 }
 0x8a6   : > { %v3613_v29 = vpop.f32.mrf.mxu1  ;;  %v3563_v7 = vadd.f32 %v3562_v28, %v6198_v41 }
 0x8a7   : > { %v3566_v50 = vpop.f32.mrf.mxu0  ;;  %v3614_v39 = vadd.f32 %v3613_v29, %v6198_v41 }
 0x8a8   : > { %v3567_v0 = vadd.f32 %v3566_v50, %v6196_v22  ;;  %v3617_v32 = vpop.f32.mrf.mxu1 }
 0x8a9   : > { %v3568_v37 = vpop.f32.mrf.mxu0  ;;  %v3618_v40 = vadd.f32 %v3617_v32, %v6196_v22 }
 0x8aa   : > { %5042 = vtanh.f32 %v3567_v0  ;;  %v3569_v36 = vadd.f32 %v3568_v37, %v6196_v22  ;;  %v3619_v53 = vpop.f32.mrf.mxu1 }
 0x8ab   : > { %5044 = vtanh.f32 %v3563_v7  ;;  %v3570_v60 = vpop.f32.mrf.mxu0  ;;  %v3620_v42 = vadd.f32 %v3619_v53, %v6196_v22 }
 0x8ac   : > { %5046 = vtanh.f32 %v3569_v36  ;;  %v3621_v45 = vpop.f32.mrf.mxu1  ;;  %v6231_v36 = vld [vmem:[%s6301_s5] sm:$0x1] }
 0x8ad   : > { %5048 = vtanh.f32 %v3559_v33  ;;  %v3571_v48 = vpop.f32.mrf.mxu0 }
 0x8ae   : > { %5050 = vtanh.f32 %v3561_v47  ;;  %v3622_v51 = vpop.f32.mrf.mxu1 }
 0x8af   : > { %5052 = vtanh.f32 %v3618_v40 }
 0x8b0   : > { %5054 = vtanh.f32 %v3620_v42  ;;  %v3658_v56 = vpop.f32.mrf.mxu0 }
 0x8b1   : > { %5056 = vtanh.f32 %v3557_v46  ;;  %v3709_v62 = vpop.f32.mrf.mxu1  ;;  %v3659_v28 = vadd.f32 %v3658_v56, %v6201_v31 }
 0x8b2   : > { %v3660_v10 = vpop.f32.mrf.mxu0  ;;  %5058 = vtanh.f32 %v3614_v39  ;;  %v3710_v7 = vadd.f32 %v3709_v62, %v6201_v31 }
 0x8b3   : > { %v3711_v4 = vpop.f32.mrf.mxu1  ;;  %v3661_v55 = vadd.f32 %v3660_v10, %v6201_v31  ;;  %5060 = vtanh.f32 %v3608_v61 }
 0x8b4   : > { %v3662_v57 = vpop.f32.mrf.mxu0  ;;  %5062 = vtanh.f32 %v3610_v52  ;;  %v3712_v14 = vadd.f32 %v3711_v4, %v6201_v31 }
 0x8b5   : > { %v3713_v58 = vpop.f32.mrf.mxu1  ;;  %5064 = vtanh.f32 %v3612_v54  ;;  %v3663_v16 = vadd.f32 %v3662_v57, %v6198_v41 }
 0x8b6   : > { %v3664_v59 = vpop.f32.mrf.mxu0  ;;  %5066 = vtanh.f32 %v3661_v55  ;;  %v3714_v26 = vadd.f32 %v3713_v58, %v6198_v41 }
 0x8b7   : > { %v5043_v6 = vpop.eup %5042  ;;  %v3665_v11 = vadd.f32 %v3664_v59, %v6198_v41  ;;  %v3715_v12 = vpop.f32.mrf.mxu1 }
 0x8b8   : > { %v5045_v19 = vpop.eup %5044  ;;  %v3818_v49 = vpack.c.bf16 %v5043_v6, %v5043_v6  ;;  %v3716_v63 = vadd.f32 %v3715_v12, %v6198_v41  ;;  %v3668_v3 = vpop.f32.mrf.mxu0 }
 0x8b9   : > { %v5047_v5 = vpop.eup %5046  ;;  %5068 = vtanh.f32 %v3665_v11  ;;  %v3669_v8 = vadd.f32 %v3668_v3, %v6196_v22  ;;  %v3719_v15 = vpop.f32.mrf.mxu1 }
 0x8ba   : > { %v5049_v9 = vpop.eup %5048  ;;  %v3819_v43 = vpack.c.bf16 %v5047_v5, %v5047_v5  ;;  %5070 = vtanh.f32 %v3716_v63  ;;  %v3720_v20 = vadd.f32 %v3719_v15, %v6196_v22  ;;  %v3670_v44 = vpop.f32.mrf.mxu0  ;;  %v3834_v21 = vsel %vm515_vm0, %v3818_v49, 0 }
 0x8bb   : > { %v5051_v13 = vpop.eup %5050  ;;  %5072 = vtanh.f32 %v3669_v8  ;;  %v3671_v17 = vadd.f32 %v3670_v44, %v6196_v22  ;;  %v3721_v24 = vpop.f32.mrf.mxu1  ;;  %v3809_v23 = vpack.c.bf16 %v5045_v19, %v5049_v9 }
 0x8bc   : > { %v5053_v18 = vpop.eup %5052  ;;  %5074 = vtanh.f32 %v3720_v20  ;;  %v3722_v30 = vadd.f32 %v3721_v24, %v6196_v22  ;;  %v3672_v38 = vpop.f32.mrf.mxu0  ;;  %4426 = vmatprep.subr.msk.bf16.mxu1 %vm515_vm0, %v3819_v43 }
 0x8bd   : > { %v5055_v25 = vpop.eup %5054  ;;  %5076 = vtanh.f32 %v3671_v17  ;;  %3876 = vmatpush1.bf16.msra.mxu1 %v3834_v21  ;;  %v3723_v27 = vpop.f32.mrf.mxu1  ;;  %v3820_v32 = vpack.c.bf16 %v5053_v18, %v5053_v18 }
 0x8be   : > { %v5057_v1 = vpop.eup %5056  ;;  %5078 = vtanh.f32 %v3722_v30  ;;  %v3673_v29 = vpop.f32.mrf.mxu0  ;;  %3877 = vmatprep.subr.bf16.mxu1 %v3809_v23  ;;  %v3821_v33 = vpack.c.bf16 %v5055_v25, %v5055_v25 }
 0x8bf   : > { %5080 = vtanh.f32 %v3712_v14  ;;  %v3808_v50 = vpack.c.bf16 %v5051_v13, %v5057_v1  ;;  %v3724_v0 = vpop.f32.mrf.mxu1  ;;  %v5059_v47 = vpop.eup %5058  ;;  %v3840_v46 = vsel %vm515_vm0, %v3820_v32, 0 }
 0x8c0   : > { %5082 = vtanh.f32 %v3663_v16  ;;  %v3760_v37 = vpop.f32.mrf.mxu0  ;;  %v5061_v53 = vpop.eup %5060  ;;  %v5165_v0 = vmov 1966171168  }
 0x8c1   : > { %5084 = vtanh.f32 %v3714_v26  ;;  %3878 = vmatpush1.bf16.msra.mxu1 %v3808_v50  ;;  %v5063_v60 = vpop.eup %5062  ;;  %v4083_v32 = vunpack.c.l.s4 %v5165_v0 }
 0x8c2   : > { %5086 = vtanh.f32 %v3659_v28  ;;  %v3762_v40 = vpop.f32.mrf.mxu0  ;;  %4428 = vmatprep.subr.msk.bf16.mxu1 %vm515_vm0, %v3821_v33  ;;  %v5065_v42 = vpop.eup %5064  ;;  %v3811_v48 = vpack.c.bf16 %v5059_v47, %v5063_v60 }
 0x8c3   : > { %5088 = vtanh.f32 %v3710_v7  ;;  %v5067_v51 = vpop.eup %5066  ;;  %v3810_v62 = vpack.c.bf16 %v5065_v42, %v5061_v53  ;;  %v3763_v19 = vadd.f32 %v3762_v40, %v6201_v31  ;;  %v4084_v53 = vunpack.c.0.s8 %v4083_v32 }
 0x8c4   : > { %v3764_v45 = vpop.f32.mrf.mxu0  ;;  %4427 = vmatmul.mubr.msk.bf16.vlgmr.msra.gmra.mxu1 %vm508_vm1, %v6231_v36 }
 0x8c5   : > { %3917 = vmatpush1.bf16.msra.mxu1 %v3840_v46  ;;  %3936 = vmatprep.mubr.bf16.mxu1 %v5164_v2  ;;  %v3765_v5 = vadd.f32 %v3764_v45, %v6198_v41 }
 0x8c6   : > { %v5069_v39 = vpop.eup %5068  ;;  %v3766_v56 = vpop.f32.mrf.mxu0  ;;  %3918 = vmatprep.subr.bf16.mxu1 %v3811_v48 }
 0x8c7   : > { %v5071_v61 = vpop.eup %5070  ;;  %v3767_v10 = vadd.f32 %v3766_v56, %v6198_v41  ;;  %v3813_v43 = vpack.c.bf16 %v5069_v39, %v5067_v51 }
 0x8c8   : > { %v5073_v52 = vpop.eup %5072  ;;  %v3770_v54 = vpop.f32.mrf.mxu0 }
 0x8c9   : > { %v5075_v4 = vpop.eup %5074  ;;  %v3822_v55 = vpack.c.bf16 %v5073_v52, %v5073_v52  ;;  %v3771_v57 = vadd.f32 %v3770_v54, %v6196_v22  ;;  %3919 = vmatpush1.bf16.msra.mxu1 %v3810_v62 }
 0x8ca   : > { %v5077_v58 = vpop.eup %5076  ;;  %v3824_v59 = vpack.c.bf16 %v5075_v4, %v5075_v4  ;;  %v3772_v6 = vpop.f32.mrf.mxu0 }
 0x8cb   : > { %v5079_v11 = vpop.eup %5078  ;;  %v3823_v12 = vpack.c.bf16 %v5077_v58, %v5077_v58  ;;  %5090 = vtanh.f32 %v3771_v57  ;;  %v3773_v49 = vadd.f32 %v3772_v6, %v6196_v22  ;;  %v3846_v9 = vsel %vm515_vm0, %v3822_v55, 0 }
 0x8cc   : > { %v5081_v63 = vpop.eup %5080  ;;  %v3825_v3 = vpack.c.bf16 %v5079_v11, %v5079_v11  ;;  %5092 = vtanh.f32 %v3767_v10  ;;  %v3774_v8 = vpop.f32.mrf.mxu0  ;;  %4429 = vmatmul.mubr.msk.bf16.vlgmr.msra.gmra.mxu1 %vm508_vm1, %v6231_v36  ;;  %v3761_v22 = vadd.f32 %v3760_v37, %v6201_v31  ;;  %v3852_v41 = vsel %vm515_vm0, %v3824_v59, 0 }
 0x8cd   : > { %v5083_v15 = vpop.eup %5082  ;;  %5094 = vtanh.f32 %v3773_v49  ;;  %4430 = vmatprep.subr.msk.bf16.mxu0 %vm515_vm0, %v3823_v12  ;;  %4018 = vmatprep.mubr.bf16.mxu1 %v5164_v2  ;;  %v3815_v44 = vpack.c.bf16 %v5071_v61, %v5081_v63  ;;  %v3829_v37 = vstv %s3828_s17 }
 0x8ce   : > { %v5085_v20 = vpop.eup %5084  ;;  %4432 = vmatprep.subr.msk.bf16.mxu1 %vm515_vm0, %v3825_v3  ;;  %3958 = vmatpush1.bf16.msra.mxu0 %v3846_v9  ;;  %v3775_v13 = vpop.f32.mrf.mxu0  ;;  %5096 = vtanh.f32 %v3763_v19 }
 0x8cf   : > { %v5087_v14 = vpop.eup %5086  ;;  %3999 = vmatpush1.bf16.msra.mxu1 %v3852_v41  ;;  %3959 = vmatprep.subr.bf16.mxu0 %v3813_v43  ;;  %5098 = vtanh.f32 %v3765_v5 }
 0x8d0   : > { %v5089_v16 = vpop.eup %5088  ;;  %4000 = vmatprep.subr.bf16.mxu1 %v3815_v44  ;;  %v3812_v17 = vpack.c.bf16 %v5083_v15, %v5087_v14  ;;  %5100 = vtanh.f32 %v3761_v22 }
 0x8d1   : > { %v3814_v24 = vpack.c.bf16 %v5085_v20, %v5089_v16 }
 0x8d2   : > { %3960 = vmatpush1.bf16.msra.mxu0 %v3812_v17 }
 0x8d3   : > { %4001 = vmatpush1.bf16.msra.mxu1 %v3814_v24 }
 0x8d5   : > { %4431 = vmatmul.mubr.msk.bf16.vlgmr.msra.gmra.mxu0 %vm508_vm1, %v6231_v36 }
 0x8d6   : > { %4433 = vmatmul.mubr.msk.bf16.vlgmr.msra.gmra.mxu1 %vm508_vm1, %v6231_v36  ;;  %4059 = vmatprep.mubr.bf16.mxu0 %v5164_v2 }
 0x8d8   : > { %v5091_v31 = vpop.eup %5090 }
 0x8d9   : > { %v5093_v18 = vpop.eup %5092  ;;  %v3826_v30 = vpack.c.bf16 %v5091_v31, %v5091_v31 }
 0x8da   : > { %v5095_v38 = vpop.eup %5094 }
 0x8db   : > { %v3827_v21 = vpack.c.bf16 %v5095_v38, %v5095_v38  ;;  %v5097_v23 = vpop.eup %5096  ;;  %v3858_v26 = vsel %vm515_vm0, %v3826_v30, 0 }
 0x8dc   : > { %v5099_v25 = vpop.eup %5098  ;;  %v3817_v27 = vpack.c.bf16 %v5093_v18, %v5097_v23 }
 0x8dd   : > { %4434 = vmatprep.subr.msk.bf16.mxu0 %vm515_vm0, %v3827_v21  ;;  %v5101_v1 = vpop.eup %5100 }
 0x8de   : > { %4040 = vmatpush1.bf16.msra.mxu0 %v3858_v26  ;;  %v3816_v28 = vpack.c.bf16 %v5099_v25, %v5101_v1 }
 0x8df   : > { %4041 = vmatprep.subr.bf16.mxu0 %v3817_v27 }
 0x8e2   : > { %4042 = vmatpush1.bf16.msra.mxu0 %v3816_v28 }
 0x8e5   : > { %4435 = vmatmul.mubr.msk.bf16.vlgmr.msra.gmra.mxu0 %vm508_vm1, %v6231_v36  ;;  %v4087_v36 = vsub.s32 %v4084_v53, %v5363_v35 }
 0x984   : > { %v3897_v2 = vpop.f32.mrf.mxu1 }
 0x985   : > { %v3898_v60 = vadd.f32 %v3897_v2, %v3829_v37 }
 0x986   : > { %v3899_v29 = vpop.f32.mrf.mxu1 }
 0x987   : > { %v3900_v42 = vadd.f32 %v3899_v29, %v3829_v37 }
 0x988   : > { %v3901_v7 = vpop.f32.mrf.mxu1 }
 0x989   : > { %v4078_v51 = vcombine.low %v3898_v60, %v3900_v42 }
 0x98a   : > { %v3902_v50 = vpop.f32.mrf.mxu1 }
 0x98b   : > { %v4088_v55 = vrot.slane %v4078_v51, %v4087_v36 }
 0x98c   : > { %v3938_v33 = vpop.f32.mrf.mxu1 }
 0x98d   : > { %v3939_v45 = vadd.f32 %v3938_v33, %v3829_v37 }
 0x98e   : > { %v3940_v47 = vpop.f32.mrf.mxu1 }
 0x98f   : > { %v3941_v46 = vadd.f32 %v3940_v47, %v3829_v37 }
 0x990   : > { %v3942_v40 = vpop.f32.mrf.mxu1 }
 0x991   : > { %v4079_v39 = vcombine.low %v3939_v45, %v3941_v46 }
 0x992   : > { %v3943_v48 = vpop.f32.mrf.mxu1 }
 0x993   : > { %v4095_v57 = vrot.slane %v4079_v39, %v4087_v36 }
 0x995   : > { %v3979_v56 = vpop.f32.mrf.mxu0  ;;  %v4110_v63 = vcombine.low %v4088_v55, %v4095_v57 }
 0x996   : > { %v3980_v61 = vadd.f32 %v3979_v56, %v3829_v37  ;;  %v4020_v62 = vpop.f32.mrf.mxu1 }
 0x997   : > { %v4021_v52 = vadd.f32 %v4020_v62, %v3829_v37  ;;  %v3981_v10 = vpop.f32.mrf.mxu0  ;;  %v4118_v8 = vrot.slane %v4110_v63, %v4087_v36 }
 0x998   : > { %v3982_v54 = vadd.f32 %v3981_v10, %v3829_v37  ;;  %v4022_v4 = vpop.f32.mrf.mxu1 }
 0x999   : > { %v4023_v58 = vadd.f32 %v4022_v4, %v3829_v37  ;;  %v3983_v59 = vpop.f32.mrf.mxu0 }
 0x99a   : > { %v4080_v6 = vcombine.low %v3980_v61, %v3982_v54  ;;  %v4024_v11 = vpop.f32.mrf.mxu1 }
 0x99b   : > { %v4081_v12 = vcombine.low %v4021_v52, %v4023_v58  ;;  %v3984_v19 = vpop.f32.mrf.mxu0 }
 0x99c   : > { %v4102_v49 = vrot.slane %v4080_v6, %v4087_v36  ;;  %v4025_v35 = vpop.f32.mrf.mxu1 }
 0x99d   : > { %v4109_v3 = vrot.slane %v4081_v12, %v4087_v36 }
 0x99f   : > { %v4111_v5 = vcombine.low %v4102_v49, %v4109_v3 }
 0x9a1   : > { %v4125_v15 = vrot.slane %v4111_v5, %v4087_v36 }
 0x9a3   : > { %v4126_v9 = vcombine.low %v4118_v8, %v4125_v15 }
 0x9a5   : > { %v4061_v43 = vpop.f32.mrf.mxu0  ;;  %4144 = vst [vmem:[%s271_s20] sm:$0xff] %v4126_v9 }
 0x9a6   : > { %v4062_v22 = vadd.f32 %v4061_v43, %v3829_v37 }
 0x9a7   : > { %v4063_v20 = vpop.f32.mrf.mxu0 }
 0x9a8   : > { %v4064_v41 = vadd.f32 %v4063_v20, %v3829_v37 }
 0x9a9   : > { %v4065_v44 = vpop.f32.mrf.mxu0 }
 0x9aa   : > { %v4127_v13 = vcombine.low %v4062_v22, %v4064_v41 }
 0x9ab   : > { %v4066_v14 = vpop.f32.mrf.mxu0 }
 0x9ac   : > { %v4134_v16 = vrot.slane %v4127_v13, %v4087_v36 }
 0x9ae   : > { %v4141_v17 = vrot.slane %v4134_v16, %v4087_v36 }
 0x9b0   : > { %4149 = vst.msk [vmem:[%s271_s20 + $0x8] sm:$0x3] %vm4147_vm2, %v4141_v17 }
 0x9b1   : > { %5115 = shalt.err (!%p5112_p3)
}
 0x9b2   : > { %s5116_s15 = scalar_lea.hbm %s4163_s25, 160  ;;  %s5120_s18 = scalar_lea.hbm %s6303_s7, 320 }
 0x9b3   : > { %p5117_p4 = scmp.ne.s32.totalorder %s4163_s25, %s5116_s15  ;;  %p5121_p9 = scmp.lt.s32.totalorder %s4163_s25, %s6303_s7 }
 0x9b4   : > { %p5122_p10 = scmp.lt.s32.totalorder %s5120_s18, %s5116_s15 }
 0x9b5   : > { %p5118_p7 = pnand %p5117_p4, %p5248_p5 }
 0x9b6   : > { %p5123_p11 = por %p5122_p10, %p5121_p9 }
 0x9b7   : > { %p5119_p8 = pneg %p5118_p7 }
 0x9b9   : > { %p5124_p12 = pnand %p5123_p11, %p5119_p8 }
 0x9bb   : > { %5127 = shalt.err (!%p5124_p12)
}
 0x9bc   : > { %4441 = dma.vmem_to_hbm [thread:$0]  (%p5248_p5), %s4166_s22, 160, %s4163_s25, %s4151_s30  }
 0x9bd PF: > { %p4447_p13 = scmp.ge.s32.totalorder %s5162_s29, 2  ;;  %s4177_s21 = sand.u32 1, %s5150_s26  }
 0x9be   : > { %s4178_s23 = scalar_lea.sflag [#allocation4], %s4177_s21 }
 0x9bf   : > { %p4444_p0 = pnand %p4447_p13, %p5252_p6 }
 0x9c1   : > { %p4445_p1 = pneg %p4444_p0 }
 0x9c3   : > { %5145 = dma.done.wait (%p4445_p1), %s4178_s23, 160  }
 0x9c4   : > { %5147 = vsyncadd (%p4445_p1), %s4178_s23, 4294967136  ;;  %p18_p2 = scmp.ge.s32.totalorder %s5235_s8, 4   ;;  %s6306_s26 = smov %s5154_s27 }
 0x9c5   : > { %s6307_s27 = smov %s5158_s28  ;;  %s6308_s28 = smov %s5246_s11 }
 0x9c6   : > { %s6309_s29 = smov %s5235_s8  ;;  %20 = sbr.rel (!%p18_p2) target bundleno = 5 (0x5), region = 99 }
 0x9cb   :  { %4183 = vsyncpa [#allocation4], 1 }
 0x9cc   :  { %4185 = vsyncpa [#allocation4 + $0x1], 1 }

</bundles_post_ra>
